<compile_context>
chip_gen: v6e
topology: v6e:2x2x1
jax: 0.10.0
libtpu: 0.0.40
codegen_flags: <defaults>
</compile_context>

<pallas_src>
import numpy as np
import jax
import jax.numpy as jnp
from jax.experimental import pallas as pl
from jax.experimental.pallas import tpu as pltpu


def _round_up(x, m):
    return ((x + m - 1) // m) * m


# ----------------------------------------------------------------------------
# Host-side construction of tight, per-stage constant matrices  (one-time)
# ----------------------------------------------------------------------------
def prepare_params(params, batch, geometry_dim):
    H0, W0 = geometry_dim
    assert H0 % 8 == 0 and W0 % 8 == 0, "geometry must be divisible by 8"

    conv_w = [np.asarray(params[f'conv{k}_w'], np.float32) for k in (1, 2, 3)]   # HWIO
    conv_b = [np.asarray(params[f'conv{k}_b'], np.float32).reshape(-1) for k in (1, 2, 3)]

    Hs = [H0 >> s for s in range(3)]
    Ws = [W0 >> s for s in range(3)]
    Cin = [w.shape[2] for w in conv_w]
    Cout = [w.shape[3] for w in conv_w]

    # ---- per-stage row geometry (rows = batch * image_height) ----
    Rval, Rin, Rout = [], [], []
    r_in = batch * Hs[0]
    for s in range(3):
        rv = batch * Hs[s]
        Rval.append(rv)
        Rin.append(r_in)
        r_out = _round_up(rv // 2, 8)          # pad pooled rows to sublane multiple
        Rout.append(r_out)
        r_in = r_out

    # ---- per-stage lane geometry ----
    L = [Ws[s] * Cout[s] for s in range(3)]            # conv-output lanes
    Lh = [(Ws[s] // 2) * Cout[s] for s in range(3)]    # pooled lanes (valid)
    Lhpad = [_round_up(l, 128) for l in Lh]            # pooled lanes (physical)
    Kval = [Ws[s] * Cin[s] for s in range(3)]
    Kphys = [_round_up(Kval[0], 128), Lhpad[0], Lhpad[1]]
    for s in range(3):
        # alignment invariants so every rolled array is (8k, 128m)
        assert L[s] % 128 == 0 and Rin[s] % 8 == 0

    bands, cbias, masks, rowsel, lanesel = [], [], [], [], []
    for s in range(3):
        W, Ci, Co, Hst = Ws[s], Cin[s], Cout[s], Hs[s]

        # fused banded conv weights: vstack of [row-above ; row-same ; row-below]
        bd = np.zeros((3, Kphys[s], L[s]), np.float32)
        for dh in range(3):
            for j in range(W):
                for dw in range(3):
                    jp = j + dw - 1
                    if 0 <= jp < W:
                        bd[dh, jp * Ci:(jp + 1) * Ci, j * Co:(j + 1) * Co] = conv_w[s][dh, dw]
        bands.append(bd.reshape(3 * Kphys[s], L[s]))
        cbias.append(np.tile(conv_b[s], W).reshape(1, L[s]))

        # per-image top/bottom boundary masks for the rolled copies
        mk = np.zeros((2, Rin[s], 1), np.float32)
        for r in range(Rval[s]):
            mk[0, r, 0] = 0.0 if (r % Hst) == 0 else 1.0
            mk[1, r, 0] = 0.0 if (r % Hst) == Hst - 1 else 1.0
        masks.append(mk)

        # even-row compaction for the 2x1 row pool (pad rows stay exactly zero)
        re = np.zeros((Rout[s], Rin[s]), np.float32)
        for i in range(Rval[s] // 2):
            re[i, 2 * i] = 1.0
        rowsel.append(re)

        # stacked [even | odd] lane-block selection for the 1x2 lane pool
        cc = np.zeros((L[s], 2 * Lhpad[s]), np.float32)
        for jo in range(W // 2):
            for c in range(Co):
                cc[(2 * jo) * Co + c, jo * Co + c] = 1.0
                cc[(2 * jo + 1) * Co + c, Lhpad[s] + jo * Co + c] = 1.0
        lanesel.append(cc)

    # ---- flatten + fc1 (torch NCHW flatten permutation folded into wfc) ----
    H3, W3, C3 = Hs[2] // 2, Ws[2] // 2, Cout[2]
    fc1_w = np.asarray(params['fc1_w'], np.float32)                 # (C3*H3*W3, dout)
    dout = fc1_w.shape[1]
    esel = np.zeros((H3, batch, Rout[2]), np.float32)
    for i in range(H3):
        for b in range(batch):
            esel[i, b, b * H3 + i] = 1.0
    fc1_blocks = fc1_w.reshape(C3, H3, W3, dout).transpose(1, 2, 0, 3).reshape(
        H3, W3 * C3, dout)
    wfc = np.zeros((H3 * Lhpad[2], dout), np.float32)
    for h in range(H3):
        wfc[h * Lhpad[2]:h * Lhpad[2] + W3 * C3] = fc1_blocks[h]
    fc1b = np.asarray(params['fc1_b'], np.float32).reshape(1, dout)

    # ---- branch2 (natural) and trunk (pre-transposed) MLP weights, tight ----
    b2 = [np.asarray(params[k], np.float32) for k in
          ('b2_w1', 'b2_b1', 'b2_w2', 'b2_b2', 'b2_w3', 'b2_b3')]
    tw = [np.asarray(params['tr_w1'], np.float32).T,
          np.asarray(params['tr_b1'], np.float32).reshape(-1, 1),
          np.asarray(params['tr_w2'], np.float32).T,
          np.asarray(params['tr_b2'], np.float32).reshape(-1, 1),
          np.asarray(params['tr_w3'], np.float32).T,
          np.asarray(params['tr_b3'], np.float32).reshape(-1, 1)]

    const = tuple(jnp.asarray(a) for a in (
        bands + cbias + masks + rowsel + lanesel + [esel, wfc, fc1b] + b2 + tw))

    cfg = dict(batch=batch, H0=H0, W0=W0, Cin0=Cin[0],
               Rin=tuple(Rin), Lhpad=tuple(Lhpad), H3=H3,
               Kin0=Kval[0], Kphys0=Kphys[0])
    return const, cfg


# ----------------------------------------------------------------------------
# The single fused Pallas kernel
# ----------------------------------------------------------------------------
def _make_kernel(cfg):
    Rin, Lhpad, H3 = cfg['Rin'], cfg['Lhpad'], cfg['H3']

    def kernel(*refs):
        (x0_ref, src_ref, crd_ref,
         bd0, bd1, bd2, cb0, cb1, cb2, mk0, mk1, mk2,
         re0, re1, re2, cc0, cc1, cc2,
         esel_ref, wfc_ref, fc1b_ref,
         b2w1, b2b1, b2w2, b2b2, b2w3, b2b3,
         tw1, tb1, tw2, tb2, tw3, tb3,
         out_ref) = refs

        dot = lambda a, b: jnp.dot(a, b, preferred_element_type=jnp.float32)
        bands = (bd0, bd1, bd2)
        cbs = (cb0, cb1, cb2)
        mks = (mk0, mk1, mk2)
        rsel = (re0, re1, re2)
        csel = (cc0, cc1, cc2)

        # ---- 3x [conv3x3 + bias + ReLU -> 2x2 maxpool]; x is (B*H, W*C) ----
        x = x0_ref[...]
        for s in range(3):
            R = Rin[s]
            # vertical neighbours: XLU roll + VPU per-image boundary mask
            x_up = pltpu.roll(x, shift=1, axis=0) * mks[s][0]
            x_dn = pltpu.roll(x, shift=R - 1, axis=0) * mks[s][1]
            # fused 3x3 conv: single banded matmul over [up | mid | down]
            xcat = jnp.concatenate([x_up, x, x_dn], axis=1)
            y = jnp.maximum(dot(xcat, bands[s][...]) + cbs[s][...], 0.0)
            # 2x1 row pool: max with rolled copy + one even-row compaction matmul
            yp = jnp.maximum(y, pltpu.roll(y, shift=R - 1, axis=0))
            rp = dot(rsel[s][...], yp)
            # 1x2 lane pool: one stacked selection matmul, max of aligned halves
            pr = dot(rp, csel[s][...])
            Lhp = Lhpad[s]
            x = jnp.maximum(pr[:, :Lhp], pr[:, Lhp:])

        # ---- flatten (NCHW permutation folded into wfc) + fc1 + ReLU ----
        zs = [dot(esel_ref[i], x) for i in range(H3)]
        z = zs[0] if H3 == 1 else jnp.concatenate(zs, axis=1)
        y1 = jnp.maximum(dot(z, wfc_ref[...]) + fc1b_ref[...], 0.0)

        # ---- branch 2 MLP ----
        h = jnp.maximum(dot(src_ref[...], b2w1[...]) + b2b1[...], 0.0)
        h = jnp.maximum(dot(h, b2w2[...]) + b2b2[...], 0.0)
        y2 = dot(h, b2w3[...]) + b2b3[...]

        # ---- trunk MLP, computed transposed: (64, Npad) ----
        t = jnp.tanh(dot(tw1[...], crd_ref[...]) + tb1[...])
        t = jnp.tanh(dot(tw2[...], t) + tb2[...])
        yt = dot(tw3[...], t) + tb3[...]

        # ---- gate + final contraction: lane-dense (B, 64) @ (64, Npad) ----
        out_ref[...] = dot(y1 * y2, yt)

    return kernel


def make_forward(params, batch, geometry_dim):
    const, cfg = prepare_params(params, batch, geometry_dim)
    kernel = _make_kernel(cfg)
    H0, W0, C0 = cfg['H0'], cfg['W0'], cfg['Cin0']
    K0, K0p = cfg['Kin0'], cfg['Kphys0']
    vmem = pl.BlockSpec(memory_space=pltpu.MemorySpace.VMEM)

    def forward(geometry, source_loc, coords):
        B = geometry.shape[0]
        N = coords.shape[0]
        Npad = _round_up(N, 128)
        # NCHW -> (B*H, W*C) layout prep + lane padding: the only XLA glue.
        x0 = jnp.transpose(geometry.astype(jnp.float32), (0, 2, 3, 1)).reshape(
            B * H0, W0 * C0)
        if K0p > K0:
            x0 = jnp.pad(x0, ((0, 0), (0, K0p - K0)))
        crd = coords.astype(jnp.float32)
        if Npad > N:
            crd = jnp.pad(crd, ((0, Npad - N), (0, 0)))
        crdT = jnp.transpose(crd)

        args = (x0, source_loc.astype(jnp.float32), crdT) + const
        out = pl.pallas_call(
            kernel,
            out_shape=jax.ShapeDtypeStruct((B, Npad), jnp.float32),
            in_specs=[vmem] * len(args),
            out_specs=vmem,
            compiler_params=pltpu.CompilerParams(
                vmem_limit_bytes=32 * 1024 * 1024),
        )(*args)
        return out[:, :N]

    return jax.jit(forward)


# ----------------------------------------------------------------------------
# Deterministic parameter init (synthetic; shapes follow opnn.__init__)
# ----------------------------------------------------------------------------
def init_params(key, branch2_dim, trunk_dim, geometry_dim):
    ph, pw = geometry_dim[0] // 8, geometry_dim[1] // 8
    keys = iter(jax.random.split(key, 32))

    def w(shape, scale):
        return (scale * jax.random.normal(next(keys), shape)).astype(jnp.float32)

    return {
        'conv1_w': w((3, 3, 3, 16), 0.2),   'conv1_b': w((1, 16), 0.1),
        'conv2_w': w((3, 3, 16, 32), 0.15), 'conv2_b': w((1, 32), 0.1),
        'conv3_w': w((3, 3, 32, 64), 0.1),  'conv3_b': w((1, 64), 0.1),
        'fc1_w': w((64 * ph * pw, 64), 0.08), 'fc1_b': w((1, 64), 0.1),
        'b2_w1': w((branch2_dim[0], branch2_dim[1]), 0.3), 'b2_b1': w((1, branch2_dim[1]), 0.1),
        'b2_w2': w((branch2_dim[1], branch2_dim[2]), 0.2), 'b2_b2': w((1, branch2_dim[2]), 0.1),
        'b2_w3': w((branch2_dim[2], 64), 0.2),             'b2_b3': w((1, 64), 0.1),
        'tr_w1': w((trunk_dim[0], trunk_dim[1]), 0.3),     'tr_b1': w((1, trunk_dim[1]), 0.1),
        'tr_w2': w((trunk_dim[1], trunk_dim[2]), 0.2),     'tr_b2': w((1, trunk_dim[2]), 0.1),
        'tr_w3': w((trunk_dim[2], 64), 0.2),               'tr_b3': w((1, 64), 0.1),
    }


# ----------------------------------------------------------------------------
# Pure-JAX reference (sanity check for the Pallas path)
# ----------------------------------------------------------------------------
def maxpool2(x):
    B, H, W, C = x.shape
    return x.reshape(B, H // 2, 2, W // 2, 2, C).max(axis=(2, 4))


def ref_forward(params, geometry, source_loc, coords):
    x = jnp.transpose(geometry, (0, 2, 3, 1)).astype(jnp.float32)
    for i in (1, 2, 3):
        wk, bk = params[f'conv{i}_w'], params[f'conv{i}_b']
        x = jax.lax.conv_general_dilated(
            x, wk, window_strides=(1, 1), padding='SAME',
            dimension_numbers=('NHWC', 'HWIO', 'NHWC'))
        x = jax.nn.relu(x + bk.reshape(1, 1, 1, -1))
        x = maxpool2(x)
    B = x.shape[0]
    xf = jnp.transpose(x, (0, 3, 1, 2)).reshape(B, -1)
    y1 = jax.nn.relu(xf @ params['fc1_w'] + params['fc1_b'])
    h = jax.nn.relu(source_loc @ params['b2_w1'] + params['b2_b1'])
    h = jax.nn.relu(h @ params['b2_w2'] + params['b2_b2'])
    y2 = h @ params['b2_w3'] + params['b2_b3']
    t = jnp.tanh(coords @ params['tr_w1'] + params['tr_b1'])
    t = jnp.tanh(t @ params['tr_w2'] + params['tr_b2'])
    yt = t @ params['tr_w3'] + params['tr_b3']
    return (y1 * y2) @ yt.T


# ----------------------------------------------------------------------------
if __name__ == "__main__":
    key = jax.random.PRNGKey(0)
    kp, kg, ks, kc = jax.random.split(key, 4)

    geometry_dim = (16, 16)
    branch2_dim = [3, 32, 32]
    trunk_dim = [3, 32, 32]
    B, N = 2, 8

    params = init_params(kp, branch2_dim, trunk_dim, geometry_dim)
    geometry = jax.random.normal(kg, (B, 3, geometry_dim[0], geometry_dim[1]),
                                 jnp.float32)                       # NCHW
    source_loc = jax.random.normal(ks, (B, branch2_dim[0]), jnp.float32)
    coords = jax.random.normal(kc, (N, trunk_dim[0]), jnp.float32)

    forward = make_forward(params, B, geometry_dim)
    out = jax.block_until_ready(forward(geometry, source_loc, coords))
    assert out.shape == (B, N), out.shape
    assert out.dtype == jnp.float32

    ref = ref_forward(params, geometry, source_loc, coords)
    max_err = float(jnp.max(jnp.abs(out - ref)))
    assert jnp.allclose(out, ref, atol=2e-3, rtol=2e-3), f"max abs err = {max_err}"

    print("KERNEL_OK")
</pallas_src>

<mosaic_0001>
module attributes {stable_mosaic.version = 11 : i64} {
  func.func @kernel(%arg0: memref<32x128xf32, #tpu.memory_space<vmem>>, %arg1: memref<2x3xf32, #tpu.memory_space<vmem>>, %arg2: memref<3x128xf32, #tpu.memory_space<vmem>>, %arg3: memref<384x256xf32, #tpu.memory_space<vmem>>, %arg4: memref<384x256xf32, #tpu.memory_space<vmem>>, %arg5: memref<384x256xf32, #tpu.memory_space<vmem>>, %arg6: memref<1x256xf32, #tpu.memory_space<vmem>>, %arg7: memref<1x256xf32, #tpu.memory_space<vmem>>, %arg8: memref<1x256xf32, #tpu.memory_space<vmem>>, %arg9: memref<2x32x1xf32, #tpu.memory_space<vmem>>, %arg10: memref<2x16x1xf32, #tpu.memory_space<vmem>>, %arg11: memref<2x8x1xf32, #tpu.memory_space<vmem>>, %arg12: memref<16x32xf32, #tpu.memory_space<vmem>>, %arg13: memref<8x16xf32, #tpu.memory_space<vmem>>, %arg14: memref<8x8xf32, #tpu.memory_space<vmem>>, %arg15: memref<256x256xf32, #tpu.memory_space<vmem>>, %arg16: memref<256x256xf32, #tpu.memory_space<vmem>>, %arg17: memref<256x256xf32, #tpu.memory_space<vmem>>, %arg18: memref<2x2x8xf32, #tpu.memory_space<vmem>>, %arg19: memref<256x64xf32, #tpu.memory_space<vmem>>, %arg20: memref<1x64xf32, #tpu.memory_space<vmem>>, %arg21: memref<3x32xf32, #tpu.memory_space<vmem>>, %arg22: memref<1x32xf32, #tpu.memory_space<vmem>>, %arg23: memref<32x32xf32, #tpu.memory_space<vmem>>, %arg24: memref<1x32xf32, #tpu.memory_space<vmem>>, %arg25: memref<32x64xf32, #tpu.memory_space<vmem>>, %arg26: memref<1x64xf32, #tpu.memory_space<vmem>>, %arg27: memref<32x3xf32, #tpu.memory_space<vmem>>, %arg28: memref<32x1xf32, #tpu.memory_space<vmem>>, %arg29: memref<32x32xf32, #tpu.memory_space<vmem>>, %arg30: memref<32x1xf32, #tpu.memory_space<vmem>>, %arg31: memref<64x32xf32, #tpu.memory_space<vmem>>, %arg32: memref<64x1xf32, #tpu.memory_space<vmem>>, %arg33: memref<2x128xf32, #tpu.memory_space<vmem>>) attributes {dimension_semantics = [], scalar_prefetch = 0 : i64, scratch_operands = 0 : i64, tpu.core_type = #tpu.core_type<tc>} {
    %c0 = arith.constant 0 : index
    %c0_0 = arith.constant 0 : index
    %0 = vector.load %arg0[%c0, %c0_0] : memref<32x128xf32, #tpu.memory_space<vmem>>, vector<32x128xf32>
    %c1_i32 = arith.constant 1 : i32
    %1 = tpu.dynamic_rotate %0 by %c1_i32 dim 0 : vector<32x128xf32>, i32 -> vector<32x128xf32>
    %c0_1 = arith.constant 0 : index
    %c0_2 = arith.constant 0 : index
    %c0_3 = arith.constant 0 : index
    %2 = vector.load %arg9[%c0_1, %c0_2, %c0_3] : memref<2x32x1xf32, #tpu.memory_space<vmem>>, vector<1x32x1xf32>
    %3 = vector.shape_cast %2 : vector<1x32x1xf32> to vector<32x1xf32>
    %4 = vector.broadcast %3 : vector<32x1xf32> to vector<32x128xf32>
    %5 = arith.mulf %1, %4 : vector<32x128xf32>
    %c31_i32 = arith.constant 31 : i32
    %6 = tpu.dynamic_rotate %0 by %c31_i32 dim 0 : vector<32x128xf32>, i32 -> vector<32x128xf32>
    %c1 = arith.constant 1 : index
    %c0_4 = arith.constant 0 : index
    %c0_5 = arith.constant 0 : index
    %7 = vector.load %arg9[%c1, %c0_4, %c0_5] : memref<2x32x1xf32, #tpu.memory_space<vmem>>, vector<1x32x1xf32>
    %8 = vector.shape_cast %7 : vector<1x32x1xf32> to vector<32x1xf32>
    %9 = vector.broadcast %8 : vector<32x1xf32> to vector<32x128xf32>
    %10 = arith.mulf %6, %9 : vector<32x128xf32>
    %11 = tpu.concatenate %5, %0, %10 in 1 : vector<32x128xf32>, vector<32x128xf32>, vector<32x128xf32> -> vector<32x384xf32>
    %c0_6 = arith.constant 0 : index
    %c0_7 = arith.constant 0 : index
    %12 = vector.load %arg3[%c0_6, %c0_7] : memref<384x256xf32, #tpu.memory_space<vmem>>, vector<384x256xf32>
    %cst = arith.constant dense<0.000000e+00> : vector<32x256xf32>
    %13 = tpu.matmul %11, %12, %cst {dimension_numbers = #tpu.dot_dimension_numbers<[1], [0], [0], [1], [0, 0, 1, 1], [], []>} : vector<32x384xf32>, vector<384x256xf32>, vector<32x256xf32> -> vector<32x256xf32>
    %c0_8 = arith.constant 0 : index
    %c0_9 = arith.constant 0 : index
    %14 = vector.load %arg6[%c0_8, %c0_9] : memref<1x256xf32, #tpu.memory_space<vmem>>, vector<1x256xf32>
    %15 = vector.broadcast %14 : vector<1x256xf32> to vector<32x256xf32>
    %16 = arith.addf %13, %15 : vector<32x256xf32>
    %cst_10 = arith.constant 0.000000e+00 : f32
    %17 = vector.broadcast %cst_10 : f32 to vector<32x256xf32>
    %18 = arith.maximumf %16, %17 : vector<32x256xf32>
    %c31_i32_11 = arith.constant 31 : i32
    %19 = tpu.dynamic_rotate %18 by %c31_i32_11 dim 0 : vector<32x256xf32>, i32 -> vector<32x256xf32>
    %20 = arith.maximumf %18, %19 : vector<32x256xf32>
    %c0_12 = arith.constant 0 : index
    %c0_13 = arith.constant 0 : index
    %21 = vector.load %arg12[%c0_12, %c0_13] : memref<16x32xf32, #tpu.memory_space<vmem>>, vector<16x32xf32>
    %cst_14 = arith.constant dense<0.000000e+00> : vector<16x256xf32>
    %22 = tpu.matmul %21, %20, %cst_14 {dimension_numbers = #tpu.dot_dimension_numbers<[1], [0], [0], [1], [0, 0, 1, 1], [], []>} : vector<16x32xf32>, vector<32x256xf32>, vector<16x256xf32> -> vector<16x256xf32>
    %c0_15 = arith.constant 0 : index
    %c0_16 = arith.constant 0 : index
    %23 = vector.load %arg15[%c0_15, %c0_16] : memref<256x256xf32, #tpu.memory_space<vmem>>, vector<256x256xf32>
    %cst_17 = arith.constant dense<0.000000e+00> : vector<16x256xf32>
    %24 = tpu.matmul %22, %23, %cst_17 {dimension_numbers = #tpu.dot_dimension_numbers<[1], [0], [0], [1], [0, 0, 1, 1], [], []>} : vector<16x256xf32>, vector<256x256xf32>, vector<16x256xf32> -> vector<16x256xf32>
    %25 = vector.extract_strided_slice %24 {offsets = [0, 0], sizes = [16, 128], strides = [1, 1]} : vector<16x256xf32> to vector<16x128xf32>
    %26 = vector.extract_strided_slice %24 {offsets = [0, 128], sizes = [16, 128], strides = [1, 1]} : vector<16x256xf32> to vector<16x128xf32>
    %27 = arith.maximumf %25, %26 : vector<16x128xf32>
    %c1_i32_18 = arith.constant 1 : i32
    %28 = tpu.dynamic_rotate %27 by %c1_i32_18 dim 0 : vector<16x128xf32>, i32 -> vector<16x128xf32>
    %c0_19 = arith.constant 0 : index
    %c0_20 = arith.constant 0 : index
    %c0_21 = arith.constant 0 : index
    %29 = vector.load %arg10[%c0_19, %c0_20, %c0_21] : memref<2x16x1xf32, #tpu.memory_space<vmem>>, vector<1x16x1xf32>
    %30 = vector.shape_cast %29 : vector<1x16x1xf32> to vector<16x1xf32>
    %31 = vector.broadcast %30 : vector<16x1xf32> to vector<16x128xf32>
    %32 = arith.mulf %28, %31 : vector<16x128xf32>
    %c15_i32 = arith.constant 15 : i32
    %33 = tpu.dynamic_rotate %27 by %c15_i32 dim 0 : vector<16x128xf32>, i32 -> vector<16x128xf32>
    %c1_22 = arith.constant 1 : index
    %c0_23 = arith.constant 0 : index
    %c0_24 = arith.constant 0 : index
    %34 = vector.load %arg10[%c1_22, %c0_23, %c0_24] : memref<2x16x1xf32, #tpu.memory_space<vmem>>, vector<1x16x1xf32>
    %35 = vector.shape_cast %34 : vector<1x16x1xf32> to vector<16x1xf32>
    %36 = vector.broadcast %35 : vector<16x1xf32> to vector<16x128xf32>
    %37 = arith.mulf %33, %36 : vector<16x128xf32>
    %38 = tpu.concatenate %32, %27, %37 in 1 : vector<16x128xf32>, vector<16x128xf32>, vector<16x128xf32> -> vector<16x384xf32>
    %c0_25 = arith.constant 0 : index
    %c0_26 = arith.constant 0 : index
    %39 = vector.load %arg4[%c0_25, %c0_26] : memref<384x256xf32, #tpu.memory_space<vmem>>, vector<384x256xf32>
    %cst_27 = arith.constant dense<0.000000e+00> : vector<16x256xf32>
    %40 = tpu.matmul %38, %39, %cst_27 {dimension_numbers = #tpu.dot_dimension_numbers<[1], [0], [0], [1], [0, 0, 1, 1], [], []>} : vector<16x384xf32>, vector<384x256xf32>, vector<16x256xf32> -> vector<16x256xf32>
    %c0_28 = arith.constant 0 : index
    %c0_29 = arith.constant 0 : index
    %41 = vector.load %arg7[%c0_28, %c0_29] : memref<1x256xf32, #tpu.memory_space<vmem>>, vector<1x256xf32>
    %42 = vector.broadcast %41 : vector<1x256xf32> to vector<16x256xf32>
    %43 = arith.addf %40, %42 : vector<16x256xf32>
    %cst_30 = arith.constant 0.000000e+00 : f32
    %44 = vector.broadcast %cst_30 : f32 to vector<16x256xf32>
    %45 = arith.maximumf %43, %44 : vector<16x256xf32>
    %c15_i32_31 = arith.constant 15 : i32
    %46 = tpu.dynamic_rotate %45 by %c15_i32_31 dim 0 : vector<16x256xf32>, i32 -> vector<16x256xf32>
    %47 = arith.maximumf %45, %46 : vector<16x256xf32>
    %c0_32 = arith.constant 0 : index
    %c0_33 = arith.constant 0 : index
    %48 = vector.load %arg13[%c0_32, %c0_33] : memref<8x16xf32, #tpu.memory_space<vmem>>, vector<8x16xf32>
    %cst_34 = arith.constant dense<0.000000e+00> : vector<8x256xf32>
    %49 = tpu.matmul %48, %47, %cst_34 {dimension_numbers = #tpu.dot_dimension_numbers<[1], [0], [0], [1], [0, 0, 1, 1], [], []>} : vector<8x16xf32>, vector<16x256xf32>, vector<8x256xf32> -> vector<8x256xf32>
    %c0_35 = arith.constant 0 : index
    %c0_36 = arith.constant 0 : index
    %50 = vector.load %arg16[%c0_35, %c0_36] : memref<256x256xf32, #tpu.memory_space<vmem>>, vector<256x256xf32>
    %cst_37 = arith.constant dense<0.000000e+00> : vector<8x256xf32>
    %51 = tpu.matmul %49, %50, %cst_37 {dimension_numbers = #tpu.dot_dimension_numbers<[1], [0], [0], [1], [0, 0, 1, 1], [], []>} : vector<8x256xf32>, vector<256x256xf32>, vector<8x256xf32> -> vector<8x256xf32>
    %52 = vector.extract_strided_slice %51 {offsets = [0, 0], sizes = [8, 128], strides = [1, 1]} : vector<8x256xf32> to vector<8x128xf32>
    %53 = vector.extract_strided_slice %51 {offsets = [0, 128], sizes = [8, 128], strides = [1, 1]} : vector<8x256xf32> to vector<8x128xf32>
    %54 = arith.maximumf %52, %53 : vector<8x128xf32>
    %c1_i32_38 = arith.constant 1 : i32
    %55 = tpu.dynamic_rotate %54 by %c1_i32_38 dim 0 : vector<8x128xf32>, i32 -> vector<8x128xf32>
    %c0_39 = arith.constant 0 : index
    %c0_40 = arith.constant 0 : index
    %c0_41 = arith.constant 0 : index
    %56 = vector.load %arg11[%c0_39, %c0_40, %c0_41] : memref<2x8x1xf32, #tpu.memory_space<vmem>>, vector<1x8x1xf32>
    %57 = vector.shape_cast %56 : vector<1x8x1xf32> to vector<8x1xf32>
    %58 = vector.broadcast %57 : vector<8x1xf32> to vector<8x128xf32>
    %59 = arith.mulf %55, %58 : vector<8x128xf32>
    %c7_i32 = arith.constant 7 : i32
    %60 = tpu.dynamic_rotate %54 by %c7_i32 dim 0 : vector<8x128xf32>, i32 -> vector<8x128xf32>
    %c1_42 = arith.constant 1 : index
    %c0_43 = arith.constant 0 : index
    %c0_44 = arith.constant 0 : index
    %61 = vector.load %arg11[%c1_42, %c0_43, %c0_44] : memref<2x8x1xf32, #tpu.memory_space<vmem>>, vector<1x8x1xf32>
    %62 = vector.shape_cast %61 : vector<1x8x1xf32> to vector<8x1xf32>
    %63 = vector.broadcast %62 : vector<8x1xf32> to vector<8x128xf32>
    %64 = arith.mulf %60, %63 : vector<8x128xf32>
    %65 = tpu.concatenate %59, %54, %64 in 1 : vector<8x128xf32>, vector<8x128xf32>, vector<8x128xf32> -> vector<8x384xf32>
    %c0_45 = arith.constant 0 : index
    %c0_46 = arith.constant 0 : index
    %66 = vector.load %arg5[%c0_45, %c0_46] : memref<384x256xf32, #tpu.memory_space<vmem>>, vector<384x256xf32>
    %cst_47 = arith.constant dense<0.000000e+00> : vector<8x256xf32>
    %67 = tpu.matmul %65, %66, %cst_47 {dimension_numbers = #tpu.dot_dimension_numbers<[1], [0], [0], [1], [0, 0, 1, 1], [], []>} : vector<8x384xf32>, vector<384x256xf32>, vector<8x256xf32> -> vector<8x256xf32>
    %c0_48 = arith.constant 0 : index
    %c0_49 = arith.constant 0 : index
    %68 = vector.load %arg8[%c0_48, %c0_49] : memref<1x256xf32, #tpu.memory_space<vmem>>, vector<1x256xf32>
    %69 = vector.broadcast %68 : vector<1x256xf32> to vector<8x256xf32>
    %70 = arith.addf %67, %69 : vector<8x256xf32>
    %cst_50 = arith.constant 0.000000e+00 : f32
    %71 = vector.broadcast %cst_50 : f32 to vector<8x256xf32>
    %72 = arith.maximumf %70, %71 : vector<8x256xf32>
    %c7_i32_51 = arith.constant 7 : i32
    %73 = tpu.dynamic_rotate %72 by %c7_i32_51 dim 0 : vector<8x256xf32>, i32 -> vector<8x256xf32>
    %74 = arith.maximumf %72, %73 : vector<8x256xf32>
    %c0_52 = arith.constant 0 : index
    %c0_53 = arith.constant 0 : index
    %75 = vector.load %arg14[%c0_52, %c0_53] : memref<8x8xf32, #tpu.memory_space<vmem>>, vector<8x8xf32>
    %cst_54 = arith.constant dense<0.000000e+00> : vector<8x256xf32>
    %76 = tpu.matmul %75, %74, %cst_54 {dimension_numbers = #tpu.dot_dimension_numbers<[1], [0], [0], [1], [0, 0, 1, 1], [], []>} : vector<8x8xf32>, vector<8x256xf32>, vector<8x256xf32> -> vector<8x256xf32>
    %c0_55 = arith.constant 0 : index
    %c0_56 = arith.constant 0 : index
    %77 = vector.load %arg17[%c0_55, %c0_56] : memref<256x256xf32, #tpu.memory_space<vmem>>, vector<256x256xf32>
    %cst_57 = arith.constant dense<0.000000e+00> : vector<8x256xf32>
    %78 = tpu.matmul %76, %77, %cst_57 {dimension_numbers = #tpu.dot_dimension_numbers<[1], [0], [0], [1], [0, 0, 1, 1], [], []>} : vector<8x256xf32>, vector<256x256xf32>, vector<8x256xf32> -> vector<8x256xf32>
    %79 = vector.extract_strided_slice %78 {offsets = [0, 0], sizes = [8, 128], strides = [1, 1]} : vector<8x256xf32> to vector<8x128xf32>
    %80 = vector.extract_strided_slice %78 {offsets = [0, 128], sizes = [8, 128], strides = [1, 1]} : vector<8x256xf32> to vector<8x128xf32>
    %81 = arith.maximumf %79, %80 : vector<8x128xf32>
    %c0_58 = arith.constant 0 : index
    %c0_59 = arith.constant 0 : index
    %c0_60 = arith.constant 0 : index
    %82 = vector.load %arg18[%c0_58, %c0_59, %c0_60] : memref<2x2x8xf32, #tpu.memory_space<vmem>>, vector<1x2x8xf32>
    %83 = vector.shape_cast %82 : vector<1x2x8xf32> to vector<2x8xf32>
    %cst_61 = arith.constant dense<0.000000e+00> : vector<2x128xf32>
    %84 = tpu.matmul %83, %81, %cst_61 {dimension_numbers = #tpu.dot_dimension_numbers<[1], [0], [0], [1], [0, 0, 1, 1], [], []>} : vector<2x8xf32>, vector<8x128xf32>, vector<2x128xf32> -> vector<2x128xf32>
    %c1_62 = arith.constant 1 : index
    %c0_63 = arith.constant 0 : index
    %c0_64 = arith.constant 0 : index
    %85 = vector.load %arg18[%c1_62, %c0_63, %c0_64] : memref<2x2x8xf32, #tpu.memory_space<vmem>>, vector<1x2x8xf32>
    %86 = vector.shape_cast %85 : vector<1x2x8xf32> to vector<2x8xf32>
    %cst_65 = arith.constant dense<0.000000e+00> : vector<2x128xf32>
    %87 = tpu.matmul %86, %81, %cst_65 {dimension_numbers = #tpu.dot_dimension_numbers<[1], [0], [0], [1], [0, 0, 1, 1], [], []>} : vector<2x8xf32>, vector<8x128xf32>, vector<2x128xf32> -> vector<2x128xf32>
    %88 = tpu.concatenate %84, %87 in 1 : vector<2x128xf32>, vector<2x128xf32> -> vector<2x256xf32>
    %c0_66 = arith.constant 0 : index
    %c0_67 = arith.constant 0 : index
    %89 = vector.load %arg19[%c0_66, %c0_67] : memref<256x64xf32, #tpu.memory_space<vmem>>, vector<256x64xf32>
    %cst_68 = arith.constant dense<0.000000e+00> : vector<2x64xf32>
    %90 = tpu.matmul %88, %89, %cst_68 {dimension_numbers = #tpu.dot_dimension_numbers<[1], [0], [0], [1], [0, 0, 1, 1], [], []>} : vector<2x256xf32>, vector<256x64xf32>, vector<2x64xf32> -> vector<2x64xf32>
    %c0_69 = arith.constant 0 : index
    %c0_70 = arith.constant 0 : index
    %91 = vector.load %arg20[%c0_69, %c0_70] : memref<1x64xf32, #tpu.memory_space<vmem>>, vector<1x64xf32>
    %92 = vector.broadcast %91 : vector<1x64xf32> to vector<2x64xf32>
    %93 = arith.addf %90, %92 : vector<2x64xf32>
    %cst_71 = arith.constant 0.000000e+00 : f32
    %94 = vector.broadcast %cst_71 : f32 to vector<2x64xf32>
    %95 = arith.maximumf %93, %94 : vector<2x64xf32>
    %c0_72 = arith.constant 0 : index
    %c0_73 = arith.constant 0 : index
    %96 = vector.load %arg1[%c0_72, %c0_73] : memref<2x3xf32, #tpu.memory_space<vmem>>, vector<2x3xf32>
    %c0_74 = arith.constant 0 : index
    %c0_75 = arith.constant 0 : index
    %97 = vector.load %arg21[%c0_74, %c0_75] : memref<3x32xf32, #tpu.memory_space<vmem>>, vector<3x32xf32>
    %cst_76 = arith.constant dense<0.000000e+00> : vector<2x32xf32>
    %98 = tpu.matmul %96, %97, %cst_76 {dimension_numbers = #tpu.dot_dimension_numbers<[1], [0], [0], [1], [0, 0, 1, 1], [], []>} : vector<2x3xf32>, vector<3x32xf32>, vector<2x32xf32> -> vector<2x32xf32>
    %c0_77 = arith.constant 0 : index
    %c0_78 = arith.constant 0 : index
    %99 = vector.load %arg22[%c0_77, %c0_78] : memref<1x32xf32, #tpu.memory_space<vmem>>, vector<1x32xf32>
    %100 = vector.broadcast %99 : vector<1x32xf32> to vector<2x32xf32>
    %101 = arith.addf %98, %100 : vector<2x32xf32>
    %cst_79 = arith.constant 0.000000e+00 : f32
    %102 = vector.broadcast %cst_79 : f32 to vector<2x32xf32>
    %103 = arith.maximumf %101, %102 : vector<2x32xf32>
    %c0_80 = arith.constant 0 : index
    %c0_81 = arith.constant 0 : index
    %104 = vector.load %arg23[%c0_80, %c0_81] : memref<32x32xf32, #tpu.memory_space<vmem>>, vector<32x32xf32>
    %cst_82 = arith.constant dense<0.000000e+00> : vector<2x32xf32>
    %105 = tpu.matmul %103, %104, %cst_82 {dimension_numbers = #tpu.dot_dimension_numbers<[1], [0], [0], [1], [0, 0, 1, 1], [], []>} : vector<2x32xf32>, vector<32x32xf32>, vector<2x32xf32> -> vector<2x32xf32>
    %c0_83 = arith.constant 0 : index
    %c0_84 = arith.constant 0 : index
    %106 = vector.load %arg24[%c0_83, %c0_84] : memref<1x32xf32, #tpu.memory_space<vmem>>, vector<1x32xf32>
    %107 = vector.broadcast %106 : vector<1x32xf32> to vector<2x32xf32>
    %108 = arith.addf %105, %107 : vector<2x32xf32>
    %cst_85 = arith.constant 0.000000e+00 : f32
    %109 = vector.broadcast %cst_85 : f32 to vector<2x32xf32>
    %110 = arith.maximumf %108, %109 : vector<2x32xf32>
    %c0_86 = arith.constant 0 : index
    %c0_87 = arith.constant 0 : index
    %111 = vector.load %arg25[%c0_86, %c0_87] : memref<32x64xf32, #tpu.memory_space<vmem>>, vector<32x64xf32>
    %cst_88 = arith.constant dense<0.000000e+00> : vector<2x64xf32>
    %112 = tpu.matmul %110, %111, %cst_88 {dimension_numbers = #tpu.dot_dimension_numbers<[1], [0], [0], [1], [0, 0, 1, 1], [], []>} : vector<2x32xf32>, vector<32x64xf32>, vector<2x64xf32> -> vector<2x64xf32>
    %c0_89 = arith.constant 0 : index
    %c0_90 = arith.constant 0 : index
    %113 = vector.load %arg26[%c0_89, %c0_90] : memref<1x64xf32, #tpu.memory_space<vmem>>, vector<1x64xf32>
    %114 = vector.broadcast %113 : vector<1x64xf32> to vector<2x64xf32>
    %115 = arith.addf %112, %114 : vector<2x64xf32>
    %c0_91 = arith.constant 0 : index
    %c0_92 = arith.constant 0 : index
    %116 = vector.load %arg27[%c0_91, %c0_92] : memref<32x3xf32, #tpu.memory_space<vmem>>, vector<32x3xf32>
    %c0_93 = arith.constant 0 : index
    %c0_94 = arith.constant 0 : index
    %117 = vector.load %arg2[%c0_93, %c0_94] : memref<3x128xf32, #tpu.memory_space<vmem>>, vector<3x128xf32>
    %cst_95 = arith.constant dense<0.000000e+00> : vector<32x128xf32>
    %118 = tpu.matmul %116, %117, %cst_95 {dimension_numbers = #tpu.dot_dimension_numbers<[1], [0], [0], [1], [0, 0, 1, 1], [], []>} : vector<32x3xf32>, vector<3x128xf32>, vector<32x128xf32> -> vector<32x128xf32>
    %c0_96 = arith.constant 0 : index
    %c0_97 = arith.constant 0 : index
    %119 = vector.load %arg28[%c0_96, %c0_97] : memref<32x1xf32, #tpu.memory_space<vmem>>, vector<32x1xf32>
    %120 = vector.broadcast %119 : vector<32x1xf32> to vector<32x128xf32>
    %121 = arith.addf %118, %120 : vector<32x128xf32>
    %122 = math.tanh %121 : vector<32x128xf32>
    %c0_98 = arith.constant 0 : index
    %c0_99 = arith.constant 0 : index
    %123 = vector.load %arg29[%c0_98, %c0_99] : memref<32x32xf32, #tpu.memory_space<vmem>>, vector<32x32xf32>
    %cst_100 = arith.constant dense<0.000000e+00> : vector<32x128xf32>
    %124 = tpu.matmul %123, %122, %cst_100 {dimension_numbers = #tpu.dot_dimension_numbers<[1], [0], [0], [1], [0, 0, 1, 1], [], []>} : vector<32x32xf32>, vector<32x128xf32>, vector<32x128xf32> -> vector<32x128xf32>
    %c0_101 = arith.constant 0 : index
    %c0_102 = arith.constant 0 : index
    %125 = vector.load %arg30[%c0_101, %c0_102] : memref<32x1xf32, #tpu.memory_space<vmem>>, vector<32x1xf32>
    %126 = vector.broadcast %125 : vector<32x1xf32> to vector<32x128xf32>
    %127 = arith.addf %124, %126 : vector<32x128xf32>
    %128 = math.tanh %127 : vector<32x128xf32>
    %c0_103 = arith.constant 0 : index
    %c0_104 = arith.constant 0 : index
    %129 = vector.load %arg31[%c0_103, %c0_104] : memref<64x32xf32, #tpu.memory_space<vmem>>, vector<64x32xf32>
    %cst_105 = arith.constant dense<0.000000e+00> : vector<64x128xf32>
    %130 = tpu.matmul %129, %128, %cst_105 {dimension_numbers = #tpu.dot_dimension_numbers<[1], [0], [0], [1], [0, 0, 1, 1], [], []>} : vector<64x32xf32>, vector<32x128xf32>, vector<64x128xf32> -> vector<64x128xf32>
    %c0_106 = arith.constant 0 : index
    %c0_107 = arith.constant 0 : index
    %131 = vector.load %arg32[%c0_106, %c0_107] : memref<64x1xf32, #tpu.memory_space<vmem>>, vector<64x1xf32>
    %132 = vector.broadcast %131 : vector<64x1xf32> to vector<64x128xf32>
    %133 = arith.addf %130, %132 : vector<64x128xf32>
    %134 = arith.mulf %95, %115 : vector<2x64xf32>
    %cst_108 = arith.constant dense<0.000000e+00> : vector<2x128xf32>
    %135 = tpu.matmul %134, %133, %cst_108 {dimension_numbers = #tpu.dot_dimension_numbers<[1], [0], [0], [1], [0, 0, 1, 1], [], []>} : vector<2x64xf32>, vector<64x128xf32>, vector<2x128xf32> -> vector<2x128xf32>
    %c0_109 = arith.constant 0 : index
    %c0_110 = arith.constant 0 : index
    %136 = vector.load %arg33[%c0_109, %c0_110] : memref<2x128xf32, #tpu.memory_space<vmem>>, vector<2x128xf32>
    tpu.vector_store %arg33[%c0_109, %c0_110], %135 {strides = array<i32>} : memref<2x128xf32, #tpu.memory_space<vmem>>, vector<2x128xf32>,
    return
  }
}

</mosaic_0001>

<bundles_post_ra>
// kernel: forward.1
= control target key start
LH: loop header
LB: loop body
LE: loop exit
PB: predicated region body
PF: predicated region fallthrough
CT: control target
= control target key end

     0   :  { %s4049_s6 = smov 1   ;;  %s4050_s10 = smov 2   ;;  %s4587_s0 = inlined_call_operand.smem [shape: u32[34], index: -1, kind: input, shape index: {}] }
   0x1   :  { %s4123_s5 = sld [smem:[%s4587_s0]]   ;;  %s4051_s14 = smov 3  }
   0x2   :  { %s4128_s9 = sld [smem:[%s4587_s0 + %s4049_s6]]   ;;  %s4052_s18 = smov 4  }
   0x3   :  { %s4133_s13 = sld [smem:[%s4587_s0 + %s4050_s10]]   ;;  %s4053_s22 = smov 5  }
   0x4   :  { %s4138_s17 = sld [smem:[%s4587_s0 + %s4051_s14]]   ;;  %s4054_s26 = smov 6  }
   0x5   :  { %s4143_s21 = sld [smem:[%s4587_s0 + %s4052_s18]]   ;;  %s4055_s30 = smov 7  }
   0x6   :  { %s4148_s25 = sld [smem:[%s4587_s0 + %s4053_s22]]   ;;  %s4056_s4 = smov 8  }
   0x7   :  { %4592 = sst [smem:[#allocation56_spill]] %s4123_s5  ;;  %s4057_s10 = smov 9  }
   0x8   :  { %s4153_s29 = sld [smem:[%s4587_s0 + %s4054_s26]]   ;;  %s4058_s15 = smov 10  }
   0x9   :  { %4593 = sst [smem:[#allocation57_spill]] %s4133_s13  ;;  %s4059_s20 = smov 11  }
   0xa   :  { %s4158_s3 = sld [smem:[%s4587_s0 + %s4055_s30]]   ;;  %s4060_s26 = smov 12  }
   0xb   :  { %s4163_s8 = sld [smem:[%s4587_s0 + %s4056_s4]]   ;;  %s4061_s1 = smov 13  }
   0xc   :  { %s4168_s14 = sld [smem:[%s4587_s0 + %s4057_s10]]   ;;  %s4062_s7 = smov 14  }
   0xd   :  { %s4173_s19 = sld [smem:[%s4587_s0 + %s4058_s15]]   ;;  %s4063_s15 = smov 15  }
   0xe   :  { %4594 = sst [smem:[#allocation58_spill]] %s4153_s29  ;;  %s4064_s22 = smov 16  }
   0xf   :  { %s4178_s24 = sld [smem:[%s4587_s0 + %s4059_s20]]   ;;  %s4065_s28 = smov 17  }
  0x10   :  { %4595 = sst [smem:[#allocation59_spill]] %s4158_s3 }
  0x11   :  { %4596 = sst [smem:[#allocation60_spill]] %s4163_s8 }
  0x12   :  { %s4183_s30 = sld [smem:[%s4587_s0 + %s4060_s26]]  }
  0x13   :  { %s4188_s6 = sld [smem:[%s4587_s0 + %s4061_s1]]  }
  0x14   :  { %s4193_s12 = sld [smem:[%s4587_s0 + %s4062_s7]]   ;;  %s4066_s7 = smov 18  }
  0x15   :  { %4597 = sst [smem:[#allocation61_spill]] %s4178_s24 }
  0x16   :  { %s4198_s20 = sld [smem:[%s4587_s0 + %s4063_s15]]   ;;  %s4067_s15 = smov 19  }
  0x17   :  { %s4203_s27 = sld [smem:[%s4587_s0 + %s4064_s22]]   ;;  %s4068_s22 = smov 20  }
  0x18   :  { %4598 = sst [smem:[#allocation62_spill]] %s4183_s30 }
  0x19   :  { %s4208_s4 = sld [smem:[%s4587_s0 + %s4065_s28]]   ;;  %s4069_s28 = smov 21  }
  0x1a   :  { %4599 = sst [smem:[#allocation63_spill]] %s4193_s12 }
  0x1b   :  { %s4213_s13 = sld [smem:[%s4587_s0 + %s4066_s7]]   ;;  %s4070_s7 = smov 22  }
  0x1c   :  { %4600 = sst [smem:[#allocation64_spill]] %s4198_s20 }
  0x1d   :  { %s4218_s8 = sld [smem:[%s4587_s0 + %s4067_s15]]   ;;  %s4071_s15 = smov 23  }
  0x1e   :  { %s4223_s3 = sld [smem:[%s4587_s0 + %s4068_s22]]   ;;  %s4072_s22 = smov 24  }
  0x1f   :  { %4601 = sst [smem:[#allocation65_spill]] %s4208_s4 }
  0x20   :  { %s4228_s20 = sld [smem:[%s4587_s0 + %s4069_s28]]   ;;  %s4073_s28 = smov 25  }
  0x21   :  { %4602 = sst [smem:[#allocation66_spill]] %s4213_s13 }
  0x22   :  { %s4233_s13 = sld [smem:[%s4587_s0 + %s4070_s7]]   ;;  %s4074_s7 = smov 26  }
  0x23   :  { %s4238_s29 = sld [smem:[%s4587_s0 + %s4071_s15]]   ;;  %s4075_s15 = smov 27  }
  0x24   :  { %4603 = sst [smem:[#allocation67_spill]] %s4223_s3 }
  0x25   :  { %s4243_s5 = sld [smem:[%s4587_s0 + %s4072_s22]]   ;;  %s4076_s22 = smov 28  }
  0x26   :  { %s4248_s24 = sld [smem:[%s4587_s0 + %s4073_s28]]   ;;  %s4077_s28 = smov 29  }
  0x27   :  { %s4258_s3 = sld [smem:[%s4587_s0 + %s4075_s15]]   ;;  %s4079_s15 = smov 31  }
  0x28   :  { %4604 = sst [smem:[#allocation68_spill]] %s4233_s13 }
  0x29   :  { %s4253_s13 = sld [smem:[%s4587_s0 + %s4074_s7]]   ;;  %s4078_s7 = smov 30  }
  0x2a   :  { %s4268_s4 = sld [smem:[%s4587_s0 + %s4077_s28]]   ;;  %s4081_s28 = smov 33  }
  0x2b   :  { %4605 = sst [smem:[#allocation69_spill]] %s4243_s5 }
  0x2c   :  { %s4263_s5 = sld [smem:[%s4587_s0 + %s4076_s22]]   ;;  %s4080_s22 = smov 32  }
  0x2d   :  { %s4278_s12 = sld [smem:[%s4587_s0 + %s4079_s15]]  }
  0x2e   :  { %s4288_s30 = sld [smem:[%s4587_s0 + %s4081_s28]]  }
  0x2f   :  { %4606 = sst [smem:[#allocation70_spill]] %s4253_s13 }
  0x30   :  { %s4273_s13 = sld [smem:[%s4587_s0 + %s4078_s7]]  }
  0x32   :  { %4607 = sst [smem:[#allocation71_spill]] %s4263_s5 }
  0x33   :  { %s4283_s5 = sld [smem:[%s4587_s0 + %s4080_s22]]  }
  0x34   :  { %72 = vsyncpa [#allocation3], 0 }
  0x35   :  { %73 = vsyncpa [#allocation6], 0 }
  0x36   :  { %74 = vsyncpa [#allocation9], 0 }
  0x37   :  { %75 = vsyncpa [#allocation12], 0 }
  0x38   :  { %76 = vsyncpa [#allocation15], 0 }
  0x39   :  { %77 = vsyncpa [#allocation18], 0 }
  0x3a   :  { %78 = vsyncpa [#allocation21], 0 }
  0x3b   :  { %79 = vsyncpa [#allocation24], 0 }
  0x3c   :  { %80 = vsyncpa [#allocation27], 0 }
  0x3d   :  { %81 = vsyncpa [#allocation30], 0 }
  0x3e   :  { %82 = vsyncpa [#allocation33], 0 }
  0x3f   :  { %83 = vsyncpa [#allocation36], 0 }
  0x40   :  { %84 = vsyncpa [#allocation39], 0 }
  0x41   :  { %85 = vsyncpa [#allocation4], 0  ;;  %s4082_s7 = smov [#allocation5]  }
  0x42   :  { %s105_s10 = sshll.u32 %s4082_s7, 4  ;;  %s106_s10 = int_to_ptr.vmem [resolvable:$true] %s105_s10 }
  0x43   :  { %s3509_s11 = scalar_lea.vmem %s106_s10, 12288  ;;  %p3514_p1 = scmp.lt.s32.totalorder %s106_s10, %s106_s10 }
  0x44   :  { %p3510_p0 = scmp.ne.s32.totalorder %s106_s10, %s3509_s11  ;;  %p3515_p2 = scmp.lt.s32.totalorder %s3509_s11, %s3509_s11 }
  0x46   :  { %p3516_p3 = por %p3515_p2, %p3514_p1 }
  0x48   :  { %p3517_p4 = pnand %p3516_p3, %p3510_p0 }
  0x4a   :  { %3520 = shalt.err (!%p3517_p4)
}
  0x4b   :  { %s4083_s0 = smov 256   ;;  %s4084_s15 = smov 16  }
  0x4c   :  { %111 = dma.hbm_to_vmem [thread:$0]  %s4138_s17, 12288, %s106_s10, [#allocation6], %s4083_s0, %s4083_s0, %s4084_s15  }
  0x4d   :  { %s4085_s16 = smov [#allocation8]  }
  0x4e   :  { %s129_s18 = sshll.u32 %s4085_s16, 4  ;;  %s130_s18 = int_to_ptr.vmem [resolvable:$true] %s129_s18 }
  0x4f   :  { %s3529_s22 = scalar_lea.vmem %s130_s18, 12288  ;;  %p3534_p6 = scmp.lt.s32.totalorder %s130_s18, %s130_s18 }
  0x50   :  { %p3530_p5 = scmp.ne.s32.totalorder %s130_s18, %s3529_s22  ;;  %p3535_p7 = scmp.lt.s32.totalorder %s3529_s22, %s3529_s22 }
  0x52   :  { %p3536_p8 = por %p3535_p7, %p3534_p6 }
  0x54   :  { %p3537_p9 = pnand %p3536_p8, %p3530_p5 }
  0x56   :  { %3540 = shalt.err (!%p3537_p9)
}
  0x57   :  { %135 = dma.hbm_to_vmem [thread:$0]  %s4148_s25, 12288, %s130_s18, [#allocation9], %s4083_s0, %s4083_s0, %s4084_s15  }
  0x58   :  { %s4086_s23 = smov [#allocation11]   ;;  %s4087_s28 = smov [#allocation14]  }
  0x59   :  { %s159_s26 = sshll.u32 %s4086_s23, 4  ;;  %s186_s1 = sshll.u32 %s4087_s28, 4  ;;  %s160_s26 = int_to_ptr.vmem [resolvable:$true] %s159_s26  ;;  %s187_s1 = int_to_ptr.vmem [resolvable:$true] %s186_s1 }
  0x5a   :  { %s3549_s17 = scalar_lea.vmem %s160_s26, 512  ;;  %p3554_p11 = scmp.lt.s32.totalorder %s160_s26, %s160_s26 }
  0x5b   :  { %p3550_p10 = scmp.ne.s32.totalorder %s160_s26, %s3549_s17  ;;  %p3555_p12 = scmp.lt.s32.totalorder %s3549_s17, %s3549_s17 }
  0x5d   :  { %p3556_p13 = por %p3555_p12, %p3554_p11 }
  0x5f   :  { %p3557_p0 = pnand %p3556_p13, %p3550_p10 }
  0x61   :  { %3560 = shalt.err (!%p3557_p0)
}
  0x62   :  { %s4088_s2 = smov 128   ;;  %s4089_s7 = smov 8  }
  0x63   :  { %165 = dma.hbm_to_vmem [thread:$0]  %s4173_s19, 512, %s160_s26, [#allocation12], %s4088_s2, %s4088_s2, %s4089_s7  }
  0x64   :  { %s3569_s25 = scalar_lea.vmem %s187_s1, 128  ;;  %p3574_p2 = scmp.lt.s32.totalorder %s187_s1, %s187_s1 }
  0x65   :  { %p3570_p1 = scmp.ne.s32.totalorder %s187_s1, %s3569_s25  ;;  %p3575_p3 = scmp.lt.s32.totalorder %s3569_s25, %s3569_s25 }
  0x67   :  { %p3576_p4 = por %p3575_p3, %p3574_p2 }
  0x69   :  { %p3577_p5 = pnand %p3576_p4, %p3570_p1 }
  0x6b   :  { %3580 = shalt.err (!%p3577_p5)
}
  0x6c   :  { %189 = dma.hbm_to_vmem [thread:$0]  %s4188_s6, 128, %s187_s1, [#allocation15]  }
  0x6d   :  { %s4090_s10 = smov [#allocation17]   ;;  %s4091_s16 = smov [#allocation20]  }
  0x6e   :  { %s207_s11 = sshll.u32 %s4090_s10, 4  ;;  %s233_s18 = sshll.u32 %s4091_s16, 4  ;;  %s208_s11 = int_to_ptr.vmem [resolvable:$true] %s207_s11  ;;  %s234_s18 = int_to_ptr.vmem [resolvable:$true] %s233_s18 }
  0x6f   :  { %s3589_s22 = scalar_lea.vmem %s208_s11, 8192  ;;  %p3594_p7 = scmp.lt.s32.totalorder %s208_s11, %s208_s11 }
  0x70   :  { %p3590_p6 = scmp.ne.s32.totalorder %s208_s11, %s3589_s22  ;;  %p3595_p8 = scmp.lt.s32.totalorder %s3589_s22, %s3589_s22 }
  0x72   :  { %p3596_p9 = por %p3595_p8, %p3594_p7 }
  0x74   :  { %p3597_p10 = pnand %p3596_p9, %p3590_p6 }
  0x76   :  { %3600 = shalt.err (!%p3597_p10)
}
  0x77   :  { %213 = dma.hbm_to_vmem [thread:$0]  %s4203_s27, 8192, %s208_s11, [#allocation18], %s4083_s0, %s4083_s0, %s4084_s15  }
  0x78   :  { %s3609_s19 = scalar_lea.vmem %s234_s18, 4096  ;;  %p3614_p12 = scmp.lt.s32.totalorder %s234_s18, %s234_s18 }
  0x79   :  { %p3610_p11 = scmp.ne.s32.totalorder %s234_s18, %s3609_s19  ;;  %p3615_p13 = scmp.lt.s32.totalorder %s3609_s19, %s3609_s19 }
  0x7b   :  { %p3616_p0 = por %p3615_p13, %p3614_p12 }
  0x7d   :  { %p3617_p1 = pnand %p3616_p0, %p3610_p11 }
  0x7f   :  { %3620 = shalt.err (!%p3617_p1)
}
  0x80   :  { %239 = dma.hbm_to_vmem [thread:$0]  %s4218_s8, 4096, %s234_s18, [#allocation21], %s4088_s2, %s4088_s2, %s4089_s7  }
  0x81   :  { %s4092_s6 = smov [#allocation23]   ;;  %s4093_s26 = smov [#allocation26]  }
  0x82   :  { %s256_s23 = sshll.u32 %s4092_s6, 4  ;;  %s275_s28 = sshll.u32 %s4093_s26, 4  ;;  %s257_s23 = int_to_ptr.vmem [resolvable:$true] %s256_s23  ;;  %s276_s28 = int_to_ptr.vmem [resolvable:$true] %s275_s28 }
  0x83   :  { %s3629_s1 = scalar_lea.vmem %s257_s23, 64  ;;  %p3634_p3 = scmp.lt.s32.totalorder %s257_s23, %s257_s23 }
  0x84   :  { %p3630_p2 = scmp.ne.s32.totalorder %s257_s23, %s3629_s1  ;;  %p3635_p4 = scmp.lt.s32.totalorder %s3629_s1, %s3629_s1 }
  0x86   :  { %p3636_p5 = por %p3635_p4, %p3634_p3 }
  0x88   :  { %p3637_p6 = pnand %p3636_p5, %p3630_p2 }
  0x8a   :  { %3640 = shalt.err (!%p3637_p6)
}
  0x8b   :  { %259 = dma.hbm_to_vmem [thread:$0]  %s4228_s20, 64, %s257_s23, [#allocation24]  }
  0x8c   :  { %s3649_s27 = scalar_lea.vmem %s276_s28, 512  ;;  %p3654_p8 = scmp.lt.s32.totalorder %s276_s28, %s276_s28 }
  0x8d   :  { %p3650_p7 = scmp.ne.s32.totalorder %s276_s28, %s3649_s27  ;;  %p3655_p9 = scmp.lt.s32.totalorder %s3649_s27, %s3649_s27 }
  0x8f   :  { %p3656_p10 = por %p3655_p9, %p3654_p8 }
  0x91   :  { %p3657_p11 = pnand %p3656_p10, %p3650_p7 }
  0x93   :  { %3660 = shalt.err (!%p3657_p11)
}
  0x94   :  { %281 = dma.hbm_to_vmem [thread:$0]  %s4238_s29, 512, %s276_s28, [#allocation27], %s4088_s2, %s4088_s2, %s4089_s7  }
  0x95   :  { %s4094_s8 = smov [#allocation29]   ;;  %s4095_s25 = smov [#allocation32]  }
  0x96   :  { %s297_s17 = sshll.u32 %s4094_s8, 4  ;;  %s319_s10 = sshll.u32 %s4095_s25, 4  ;;  %s298_s17 = int_to_ptr.vmem [resolvable:$true] %s297_s17  ;;  %s320_s10 = int_to_ptr.vmem [resolvable:$true] %s319_s10 }
  0x97   :  { %s3669_s11 = scalar_lea.vmem %s298_s17, 512  ;;  %p3674_p13 = scmp.lt.s32.totalorder %s298_s17, %s298_s17 }
  0x98   :  { %p3670_p12 = scmp.ne.s32.totalorder %s298_s17, %s3669_s11  ;;  %p3675_p0 = scmp.lt.s32.totalorder %s3669_s11, %s3669_s11 }
  0x9a   :  { %p3676_p1 = por %p3675_p0, %p3674_p13 }
  0x9c   :  { %p3677_p2 = pnand %p3676_p1, %p3670_p12 }
  0x9e   :  { %3680 = shalt.err (!%p3677_p2)
}
  0x9f   :  { %303 = dma.hbm_to_vmem [thread:$0]  %s4248_s24, 512, %s298_s17, [#allocation30], %s4088_s2, %s4088_s2, %s4089_s7  }
  0xa0   :  { %s3689_s20 = scalar_lea.vmem %s320_s10, 512  ;;  %p3694_p4 = scmp.lt.s32.totalorder %s320_s10, %s320_s10 }
  0xa1   :  { %p3690_p3 = scmp.ne.s32.totalorder %s320_s10, %s3689_s20  ;;  %p3695_p5 = scmp.lt.s32.totalorder %s3689_s20, %s3689_s20 }
  0xa3   :  { %p3696_p6 = por %p3695_p5, %p3694_p4 }
  0xa5   :  { %p3697_p7 = pnand %p3696_p6, %p3690_p3 }
  0xa7   :  { %3700 = shalt.err (!%p3697_p7)
}
  0xa8   :  { %325 = dma.hbm_to_vmem [thread:$0]  %s4258_s3, 512, %s320_s10, [#allocation33], %s4088_s2, %s4088_s2, %s4089_s7  }
  0xa9   :  { %s4096_s29 = smov [#allocation35]   ;;  %s4097_s18 = smov [#allocation38]  }
  0xaa   :  { %s343_s16 = sshll.u32 %s4096_s29, 4  ;;  %s367_s22 = sshll.u32 %s4097_s18, 4  ;;  %s344_s16 = int_to_ptr.vmem [resolvable:$true] %s343_s16  ;;  %s368_s22 = int_to_ptr.vmem [resolvable:$true] %s367_s22 }
  0xab   :  { %s3709_s19 = scalar_lea.vmem %s344_s16, 512  ;;  %p3714_p9 = scmp.lt.s32.totalorder %s344_s16, %s344_s16 }
  0xac   :  { %p3710_p8 = scmp.ne.s32.totalorder %s344_s16, %s3709_s19  ;;  %p3715_p10 = scmp.lt.s32.totalorder %s3709_s19, %s3709_s19 }
  0xae   :  { %p3716_p11 = por %p3715_p10, %p3714_p9 }
  0xb0   :  { %p3717_p12 = pnand %p3716_p11, %p3710_p8 }
  0xb2   :  { %3720 = shalt.err (!%p3717_p12)
}
  0xb3   :  { %349 = dma.hbm_to_vmem [thread:$0]  %s4268_s4, 512, %s344_s16, [#allocation36], %s4088_s2, %s4088_s2, %s4089_s7  }
  0xb4   :  { %s3729_s24 = scalar_lea.vmem %s368_s22, 1024  ;;  %p3734_p0 = scmp.lt.s32.totalorder %s368_s22, %s368_s22 }
  0xb5   :  { %p3730_p13 = scmp.ne.s32.totalorder %s368_s22, %s3729_s24  ;;  %p3735_p1 = scmp.lt.s32.totalorder %s3729_s24, %s3729_s24 }
  0xb7   :  { %p3736_p2 = por %p3735_p1, %p3734_p0 }
  0xb9   :  { %p3737_p3 = pnand %p3736_p2, %p3730_p13 }
  0xbb   :  { %3740 = shalt.err (!%p3737_p3)
}
  0xbc   :  { %373 = dma.hbm_to_vmem [thread:$0]  %s4278_s12, 1024, %s368_s22, [#allocation39], %s4088_s2, %s4088_s2, %s4089_s7  }
  0xbd   :  { %s4098_s3 = smov [#allocation2]   ;;  %s4099_s23 = smov [#allocation7]  }
  0xbe   :  { %s94_s6 = sshll.u32 %s4098_s3, 4  ;;  %s117_s26 = sshll.u32 %s4099_s23, 4  ;;  %s95_s6 = int_to_ptr.vmem [resolvable:$true] %s94_s6  ;;  %s118_s26 = int_to_ptr.vmem [resolvable:$true] %s117_s26 }
  0xbf   :  { %s3749_s28 = scalar_lea.vmem %s95_s6, 32  ;;  %p3754_p5 = scmp.lt.s32.totalorder %s95_s6, %s95_s6 }
  0xc0   :  { %p3750_p4 = scmp.ne.s32.totalorder %s95_s6, %s3749_s28  ;;  %p3755_p6 = scmp.lt.s32.totalorder %s3749_s28, %s3749_s28 }
  0xc2   :  { %p3756_p7 = por %p3755_p6, %p3754_p5 }
  0xc4   :  { %p3757_p8 = pnand %p3756_p7, %p3750_p4 }
  0xc6   :  { %3760 = shalt.err (!%p3757_p8)
}
  0xc7   :  { %97 = dma.hbm_to_vmem [thread:$0]  %s4128_s9, 32, %s95_s6, [#allocation3]  }
  0xc8   :  { %s3769_s4 = scalar_lea.vmem %s118_s26, 12288  ;;  %p3774_p10 = scmp.lt.s32.totalorder %s118_s26, %s118_s26 }
  0xc9   :  { %p3770_p9 = scmp.ne.s32.totalorder %s118_s26, %s3769_s4  ;;  %p3775_p11 = scmp.lt.s32.totalorder %s3769_s4, %s3769_s4 }
  0xcb   :  { %p3776_p12 = por %p3775_p11, %p3774_p10 }
  0xcd   :  { %p3777_p13 = pnand %p3776_p12, %p3770_p9 }
  0xcf   :  { %3780 = shalt.err (!%p3777_p13)
}
  0xd0   :  { %123 = dma.hbm_to_vmem [thread:$0]  %s4143_s21, 12288, %s118_s26, [#allocation6], %s4083_s0, %s4083_s0, %s4084_s15  }
  0xd1   :  { %s4100_s12 = smov [#allocation10]   ;;  %s4101_s27 = smov [#allocation13]  }
  0xd2   :  { %s147_s1 = sshll.u32 %s4100_s12, 4  ;;  %s173_s8 = sshll.u32 %s4101_s27, 4  ;;  %s148_s1 = int_to_ptr.vmem [resolvable:$true] %s147_s1  ;;  %s174_s8 = int_to_ptr.vmem [resolvable:$true] %s173_s8 }
  0xd3   :  { %s3789_s17 = scalar_lea.vmem %s148_s1, 1024  ;;  %p3794_p1 = scmp.lt.s32.totalorder %s148_s1, %s148_s1 }
  0xd4   :  { %p3790_p0 = scmp.ne.s32.totalorder %s148_s1, %s3789_s17  ;;  %p3795_p2 = scmp.lt.s32.totalorder %s3789_s17, %s3789_s17 }
  0xd6   :  { %p3796_p3 = por %p3795_p2, %p3794_p1 }
  0xd8   :  { %p3797_p4 = pnand %p3796_p3, %p3790_p0 }
  0xda   :  { %3800 = shalt.err (!%p3797_p4)
}
  0xdb   :  { %153 = dma.hbm_to_vmem [thread:$0]  %s4168_s14, 1024, %s148_s1, [#allocation9], %s4088_s2, %s4088_s2, %s4089_s7  }
  0xdc   :  { %s3809_s9 = scalar_lea.vmem %s174_s8, 256  ;;  %p3814_p6 = scmp.lt.s32.totalorder %s174_s8, %s174_s8 }
  0xdd   :  { %p3810_p5 = scmp.ne.s32.totalorder %s174_s8, %s3809_s9  ;;  %p3815_p7 = scmp.lt.s32.totalorder %s3809_s9, %s3809_s9 }
  0xdf   :  { %p3816_p8 = por %p3815_p7, %p3814_p6 }
  0xe1   :  { %p3817_p9 = pnand %p3816_p8, %p3810_p5 }
  0xe3   :  { %3820 = shalt.err (!%p3817_p9)
}
  0xe4   :  { %s4608_s21 = sld [smem:[#allocation62_spill]]  ;;  %s4102_s25 = smov [#allocation16]  }
  0xe5   :  { %s196_s10 = sshll.u32 %s4102_s25, 4  ;;  %s4103_s11 = smov [#allocation19]   ;;  %s197_s10 = int_to_ptr.vmem [resolvable:$true] %s196_s10 }
  0xe6   :  { %s219_s20 = sshll.u32 %s4103_s11, 4  ;;  %s3829_s29 = scalar_lea.vmem %s197_s10, 128  ;;  %s220_s20 = int_to_ptr.vmem [resolvable:$true] %s219_s20 }
  0xe7   :  { %p3830_p10 = scmp.ne.s32.totalorder %s197_s10, %s3829_s29  ;;  %p3834_p11 = scmp.lt.s32.totalorder %s197_s10, %s197_s10 }
  0xe8   :  { %p3835_p12 = scmp.lt.s32.totalorder %s3829_s29, %s3829_s29 }
  0xea   :  { %179 = dma.hbm_to_vmem [thread:$0]  %s4608_s21, 256, %s174_s8, [#allocation12], %s4088_s2, %s4088_s2, %s4089_s7  }
  0xeb   :  { %p3836_p13 = por %p3835_p12, %p3834_p11 }
  0xed   :  { %p3837_p0 = pnand %p3836_p13, %p3830_p10 }
  0xef   :  { %3840 = shalt.err (!%p3837_p0)
}
  0xf0   :  { %s4609_s14 = sld [smem:[#allocation63_spill]]  ;;  %s3849_s16 = scalar_lea.vmem %s220_s20, 8192 }
  0xf1   :  { %p3850_p1 = scmp.ne.s32.totalorder %s220_s20, %s3849_s16  ;;  %p3854_p2 = scmp.lt.s32.totalorder %s220_s20, %s220_s20 }
  0xf2   :  { %p3855_p3 = scmp.lt.s32.totalorder %s3849_s16, %s3849_s16 }
  0xf4   :  { %p3856_p4 = por %p3855_p3, %p3854_p2 }
  0xf6   :  { %199 = dma.hbm_to_vmem [thread:$0]  %s4609_s14, 128, %s197_s10, [#allocation15]  }
  0xf7   :  { %p3857_p5 = pnand %p3856_p4, %p3850_p1 }
  0xf9   :  { %3860 = shalt.err (!%p3857_p5)
}
  0xfa   :  { %s4610_s18 = sld [smem:[#allocation65_spill]]  ;;  %s4104_s22 = smov [#allocation22]  }
  0xfb   :  { %s246_s19 = sshll.u32 %s4104_s22, 4  ;;  %s4105_s24 = smov [#allocation25]   ;;  %s247_s19 = int_to_ptr.vmem [resolvable:$true] %s246_s19 }
  0xfc   :  { %s266_s3 = sshll.u32 %s4105_s24, 4  ;;  %s3869_s6 = scalar_lea.vmem %s247_s19, 16  ;;  %s267_s3 = int_to_ptr.vmem [resolvable:$true] %s266_s3 }
  0xfd   :  { %p3870_p6 = scmp.ne.s32.totalorder %s247_s19, %s3869_s6  ;;  %s3873_s23 = scalar_lea.vmem %s247_s19, 32 }
  0xfe   :  { %p3874_p7 = scmp.lt.s32.totalorder %s247_s19, %s247_s19  ;;  %p3875_p8 = scmp.lt.s32.totalorder %s3873_s23, %s3869_s6 }
 0x100   :  { %225 = dma.hbm_to_vmem [thread:$0]  %s4610_s18, 8192, %s220_s20, [#allocation18], %s4083_s0, %s4083_s0, %s4084_s15  }
 0x101   :  { %p3876_p9 = por %p3875_p8, %p3874_p7 }
 0x103   :  { %p3877_p10 = pnand %p3876_p9, %p3870_p6 }
 0x105   :  { %3880 = shalt.err (!%p3877_p10)
}
 0x106   :  { %s4611_s26 = sld [smem:[#allocation67_spill]]  ;;  %s3889_s28 = scalar_lea.vmem %s267_s3, 16 }
 0x107   :  { %p3890_p11 = scmp.ne.s32.totalorder %s267_s3, %s3889_s28  ;;  %s3893_s4 = scalar_lea.vmem %s267_s3, 32 }
 0x108   :  { %p3894_p12 = scmp.lt.s32.totalorder %s267_s3, %s267_s3  ;;  %p3895_p13 = scmp.lt.s32.totalorder %s3893_s4, %s3889_s28 }
 0x10a   :  { %p3896_p0 = por %p3895_p13, %p3894_p12 }
 0x10c   :  { %249 = dma.hbm_to_vmem [thread:$0]  %s4611_s26, 16, %s247_s19, [#allocation21]  }
 0x10d   :  { %p3897_p1 = pnand %p3896_p0, %p3890_p11 }
 0x10f   :  { %3900 = shalt.err (!%p3897_p1)
}
 0x110   :  { %s4612_s0 = sld [smem:[#allocation68_spill]]  ;;  %s4106_s15 = smov [#allocation28]  }
 0x111   :  { %s288_s12 = sshll.u32 %s4106_s15, 4  ;;  %s4107_s1 = smov [#allocation31]   ;;  %s289_s12 = int_to_ptr.vmem [resolvable:$true] %s288_s12 }
 0x112   :  { %s310_s27 = sshll.u32 %s4107_s1, 4  ;;  %s3909_s8 = scalar_lea.vmem %s289_s12, 16  ;;  %s311_s27 = int_to_ptr.vmem [resolvable:$true] %s310_s27 }
 0x113   :  { %p3910_p2 = scmp.ne.s32.totalorder %s289_s12, %s3909_s8  ;;  %s3913_s17 = scalar_lea.vmem %s289_s12, 32 }
 0x114   :  { %p3914_p3 = scmp.lt.s32.totalorder %s289_s12, %s289_s12  ;;  %p3915_p4 = scmp.lt.s32.totalorder %s3913_s17, %s3909_s8 }
 0x116   :  { %269 = dma.hbm_to_vmem [thread:$0]  %s4612_s0, 16, %s267_s3, [#allocation24]  }
 0x117   :  { %p3916_p5 = por %p3915_p4, %p3914_p3 }
 0x119   :  { %p3917_p6 = pnand %p3916_p5, %p3910_p2 }
 0x11b   :  { %3920 = shalt.err (!%p3917_p6)
}
 0x11c   :  { %s4613_s9 = sld [smem:[#allocation69_spill]]  ;;  %s3929_s21 = scalar_lea.vmem %s311_s27, 16 }
 0x11d   :  { %p3930_p7 = scmp.ne.s32.totalorder %s311_s27, %s3929_s21  ;;  %s3933_s25 = scalar_lea.vmem %s311_s27, 32 }
 0x11e   :  { %p3934_p8 = scmp.lt.s32.totalorder %s311_s27, %s311_s27  ;;  %p3935_p9 = scmp.lt.s32.totalorder %s3933_s25, %s3929_s21 }
 0x120   :  { %p3936_p10 = por %p3935_p9, %p3934_p8 }
 0x122   :  { %291 = dma.hbm_to_vmem [thread:$0]  %s4613_s9, 16, %s289_s12, [#allocation27]  }
 0x123   :  { %p3937_p11 = pnand %p3936_p10, %p3930_p7 }
 0x125   :  { %3940 = shalt.err (!%p3937_p11)
}
 0x126   :  { %s4614_s10 = sld [smem:[#allocation70_spill]]  ;;  %s4108_s11 = smov [#allocation34]  }
 0x127   :  { %s331_s20 = sshll.u32 %s4108_s11, 4  ;;  %s4109_s29 = smov [#allocation37]   ;;  %s332_s20 = int_to_ptr.vmem [resolvable:$true] %s331_s20 }
 0x128   :  { %s355_s14 = sshll.u32 %s4109_s29, 4  ;;  %s3949_s16 = scalar_lea.vmem %s332_s20, 512  ;;  %s356_s14 = int_to_ptr.vmem [resolvable:$true] %s355_s14 }
 0x129   :  { %p3950_p12 = scmp.ne.s32.totalorder %s332_s20, %s3949_s16  ;;  %p3954_p13 = scmp.lt.s32.totalorder %s332_s20, %s332_s20 }
 0x12a   :  { %p3955_p0 = scmp.lt.s32.totalorder %s3949_s16, %s3949_s16 }
 0x12c   :  { %313 = dma.hbm_to_vmem [thread:$0]  %s4614_s10, 16, %s311_s27, [#allocation30]  }
 0x12d   :  { %p3956_p1 = por %p3955_p0, %p3954_p13 }
 0x12f   :  { %p3957_p2 = pnand %p3956_p1, %p3950_p12 }
 0x131   :  { %3960 = shalt.err (!%p3957_p2)
}
 0x132   :  { %s4615_s18 = sld [smem:[#allocation71_spill]]  ;;  %s3969_s22 = scalar_lea.vmem %s356_s14, 512 }
 0x133   :  { %p3970_p3 = scmp.ne.s32.totalorder %s356_s14, %s3969_s22  ;;  %p3974_p4 = scmp.lt.s32.totalorder %s356_s14, %s356_s14 }
 0x134   :  { %p3975_p5 = scmp.lt.s32.totalorder %s3969_s22, %s3969_s22 }
 0x136   :  { %p3976_p6 = por %p3975_p5, %p3974_p4 }
 0x138   :  { %337 = dma.hbm_to_vmem [thread:$0]  %s4615_s18, 512, %s332_s20, [#allocation33], %s4088_s2, %s4088_s2, %s4089_s7  }
 0x139   :  { %p3977_p7 = pnand %p3976_p6, %p3970_p3 }
 0x13b   :  { %3980 = shalt.err (!%p3977_p7)
}
 0x13c   :  { %361 = dma.hbm_to_vmem [thread:$0]  %s4273_s13, 512, %s356_s14, [#allocation36], %s4088_s2, %s4088_s2, %s4089_s7  }
 0x13d   :  { %s4110_s19 = smov [#allocation40]  }
 0x13e   :  { %s379_s24 = sshll.u32 %s4110_s19, 4  ;;  %s380_s24 = int_to_ptr.vmem [resolvable:$true] %s379_s24 }
 0x13f   :  { %s3989_s3 = scalar_lea.vmem %s380_s24, 1024  ;;  %p3994_p9 = scmp.lt.s32.totalorder %s380_s24, %s380_s24 }
 0x140   :  { %p3990_p8 = scmp.ne.s32.totalorder %s380_s24, %s3989_s3  ;;  %p3995_p10 = scmp.lt.s32.totalorder %s3989_s3, %s3989_s3 }
 0x142   :  { %p3996_p11 = por %p3995_p10, %p3994_p9 }
 0x144   :  { %p3997_p12 = pnand %p3996_p11, %p3990_p8 }
 0x146   :  { %4000 = shalt.err (!%p3997_p12)
}
 0x147   :  { %385 = dma.hbm_to_vmem [thread:$0]  %s4283_s5, 1024, %s380_s24, [#allocation39], %s4088_s2, %s4088_s2, %s4089_s7  }
 0x148   :  { %4021 = dma.done.wait [#allocation3], 32  }
 0x149   :  { %4022 = vsyncadd [#allocation3], 4294967264 }
 0x14a   :  { %4023 = dma.done.wait [#allocation6], 24576  }
 0x14b   :  { %4024 = vsyncadd [#allocation6], 4294942720 }
 0x14c   :  { %4025 = dma.done.wait [#allocation9], 13312  }
 0x14d   :  { %4026 = vsyncadd [#allocation9], 4294953984 }
 0x14e   :  { %4027 = dma.done.wait [#allocation12], 768  }
 0x14f   :  { %4028 = vsyncadd [#allocation12], 4294966528 }
 0x150   :  { %4029 = dma.done.wait [#allocation15], 256  }
 0x151   :  { %4030 = vsyncadd [#allocation15], 4294967040 }
 0x152   :  { %4031 = dma.done.wait [#allocation18], 16384  }
 0x153   :  { %4032 = vsyncadd [#allocation18], 4294950912 }
 0x154   :  { %4033 = dma.done.wait [#allocation21], 4112  }
 0x155   :  { %4034 = vsyncadd [#allocation21], 4294963184 }
 0x156   :  { %4035 = dma.done.wait [#allocation24], 80  }
 0x157   :  { %4036 = vsyncadd [#allocation24], 4294967216 }
 0x158   :  { %4037 = dma.done.wait [#allocation27], 528  }
 0x159   :  { %4038 = vsyncadd [#allocation27], 4294966768 }
 0x15a   :  { %4039 = dma.done.wait [#allocation30], 528  }
 0x15b   :  { %4040 = vsyncadd [#allocation30], 4294966768 }
 0x15c   :  { %4041 = dma.done.wait [#allocation33], 1024  }
 0x15d   :  { %4042 = vsyncadd [#allocation33], 4294966272 }
 0x15e   :  { %4043 = dma.done.wait [#allocation36], 1024  }
 0x15f   :  { %4044 = vsyncadd [#allocation36], 4294966272 }
 0x160   :  { %4045 = dma.done.wait [#allocation39], 2048  }
 0x161   :  { %4046 = vsyncadd [#allocation39], 4294965248  ;;  %v4111_v0 = vmov 0   ;;  %v477_v1 = vld [vmem:[#allocation10 + $0x8] sm:$0xff]  ;;  %v476_v2 = vld [vmem:[#allocation10] sm:$0xff]  ;;  %v4112_v5 = vmov 0.0  }
 0x162   :  { %3484 = vset.pattern.permute.xlu1 %v4111_v0  ;;  %3483 = vset.pattern.permute.xlu0 %v4111_v0  ;;  %v515_v3 = vld [vmem:[#allocation10 + $0x28] sm:$0xff]  ;;  %v514_v4 = vld [vmem:[#allocation10 + $0x20] sm:$0xff]  ;;  %v516_v6 = vld [vmem:[#allocation10 + $0x30] sm:$0xff]  ;;  %s4616_s5 = sld [smem:[#allocation61_spill]]  ;;  %vm862_vm2 = vcmask 261120   ;;  %vm1405_vm3 = vcmask 130048  }
 0x163   :  { %487 = vperm.xlu1 %3484, %v477_v1   ;;  %482 = vperm.xlu0 %3483, %v476_v2   ;;  %v478_v7 = vld [vmem:[#allocation10 + $0x10] sm:$0xff]  ;;  %v517_v8 = vld [vmem:[#allocation10 + $0x38] sm:$0xff]  ;;  %v571_v12 = vld [vmem:[#allocation5 + $0xe8] sm:$0xff]  ;;  %s4617_s13 = sld [smem:[#allocation56_spill]]  ;;  %vm1890_vm4 = vcmask 64512   ;;  %vm4113_vm5 = vmmov 0  }
 0x164   :  { %803 = vmatprep.mubr.f32.mxu1 %v4112_v5  ;;  %v479_v9 = vld [vmem:[#allocation10 + $0x18] sm:$0xff]  ;;  %v572_v11 = vld [vmem:[#allocation5 + $0xf0] sm:$0xff]  ;;  %v570_v13 = vld [vmem:[#allocation5 + $0xe0] sm:$0xff]  ;;  %s4618_s2 = sld [smem:[#allocation58_spill]]  ;;  %vm2373_vm6 = vcmask 1042432   ;;  %vm2369_vm7 = vcmask 23552  }
 0x165   :  { %v573_v10 = vld [vmem:[#allocation5 + $0xf8] sm:$0xff]  ;;  %v1112_v15 = vld [vmem:[#allocation11 + $0x10] sm:$0xff]  ;;  %v1093_v16 = vld [vmem:[#allocation11] sm:$0xff]  ;;  %s4619_s7 = sld [smem:[#allocation64_spill]]  ;;  %vm3065_vm8 = vcmask 523264   ;;  %s4114_s4 = smov [#allocation41]  }
 0x166   :  { %650 = vmatprep.subr.mxu0 %v573_v10  ;;  %v569_v14 = vld [vmem:[#allocation5 + $0xd8] sm:$0xff]  ;;  %v568_v17 = vld [vmem:[#allocation5 + $0xd0] sm:$0xff]  ;;  %v567_v18 = vld [vmem:[#allocation5 + $0xc8] sm:$0xff]  ;;  %s4620_s6 = sld [smem:[#allocation59_spill]]  ;;  %s3146_s0 = sshll.u32 %s4114_s4, 4  ;;  %s3147_s0 = int_to_ptr.vmem [resolvable:$true] %s3146_s0 }
 0x167   :  { %525 = vperm.xlu1 %3484, %v515_v3   ;;  %520 = vperm.xlu0 %3483, %v514_v4   ;;  %v566_v19 = vld [vmem:[#allocation5 + $0xc0] sm:$0xff]  ;;  %v1113_v20 = vld [vmem:[#allocation11 + $0x18] sm:$0xff]  ;;  %v1094_v21 = vld [vmem:[#allocation11 + $0x8] sm:$0xff]  ;;  %s4621_s23 = sld [smem:[#allocation60_spill]]  ;;  %s4001_s15 = scalar_lea.vmem %s3147_s0, 32 }
 0x168   :  { %651 = vmatpush1.msra.mxu0 %v572_v11  ;;  %v565_v22 = vld [vmem:[#allocation5 + $0xb8] sm:$0xff]  ;;  %v564_v23 = vld [vmem:[#allocation5 + $0xb0] sm:$0xff]  ;;  %v563_v24 = vld [vmem:[#allocation5 + $0xa8] sm:$0xff]  ;;  %s4622_s26 = sld [smem:[#allocation66_spill]]  ;;  %p4002_p13 = scmp.ne.s32.totalorder %s3147_s0, %s4001_s15 }
 0x169   :  { %652 = vmatprep.subr.mxu0 %v571_v12  ;;  %v3203_v25 = vld [vmem:[%s4616_s5 + $0x8] sm:$0xff]  ;;  %v1617_v26 = vld [vmem:[%s4616_s5] sm:$0xff]  ;;  %v636_v29 = vld [vmem:[#allocation5 + $0x2f0] sm:$0xff]  ;;  %s4623_s28 = sld [smem:[#allocation57_spill]]  ;;  %p4006_p0 = scmp.lt.s32.totalorder %s3147_s0, %s3147_s0 }
 0x16a   :  { %653 = vmatpush1.msra.mxu0 %v570_v13  ;;  %v637_v27 = vld [vmem:[#allocation5 + $0x2f8] sm:$0xff]  ;;  %v562_v28 = vld [vmem:[#allocation5 + $0xa0] sm:$0xff]  ;;  %v635_v30 = vld [vmem:[#allocation5 + $0x2e8] sm:$0xff]  ;;  %p4007_p1 = scmp.lt.s32.totalorder %s4001_s15, %s4001_s15 }
 0x16b   :  { %530 = vperm.xlu1 %3484, %v516_v6   ;;  %492 = vperm.xlu0 %3483, %v478_v7   ;;  %v561_v31 = vld [vmem:[#allocation5 + $0x98] sm:$0xff]  ;;  %v634_v32 = vld [vmem:[#allocation5 + $0x2e0] sm:$0xff]  ;;  %v560_v33 = vld [vmem:[#allocation5 + $0x90] sm:$0xff] }
 0x16c   :  { %654 = vmatprep.subr.mxu0 %v569_v14  ;;  %739 = vmatprep.subr.mxu1 %v637_v27  ;;  %v633_v34 = vld [vmem:[#allocation5 + $0x2d8] sm:$0xff]  ;;  %v2625_v36 = vld [vmem:[#allocation34 + $0x18] sm:$0xff]  ;;  %v632_v38 = vld [vmem:[#allocation5 + $0x2d0] sm:$0xff]  ;;  %p4008_p2 = por %p4007_p1, %p4006_p0 }
 0x16d   :  { %655 = vmatpush1.msra.mxu0 %v568_v17  ;;  %740 = vmatpush1.msra.mxu1 %v636_v29  ;;  %v2624_v35 = vld [vmem:[#allocation34 + $0x10] sm:$0xff]  ;;  %v559_v37 = vld [vmem:[#allocation5 + $0x88] sm:$0xff]  ;;  %v2623_v44 = vld [vmem:[#allocation34 + $0x8] sm:$0xff] }
 0x16e   :  { %656 = vmatprep.subr.mxu0 %v567_v18  ;;  %741 = vmatprep.subr.mxu1 %v635_v30  ;;  %v558_v39 = vld [vmem:[#allocation5 + $0x80] sm:$0xff]  ;;  %v631_v40 = vld [vmem:[#allocation5 + $0x2c8] sm:$0xff]  ;;  %v557_v41 = vld [vmem:[#allocation5 + $0x78] sm:$0xff]  ;;  %p4009_p3 = pnand %p4008_p2, %p4002_p13 }
 0x16f   :  { %535 = vperm.xlu1 %3484, %v517_v8   ;;  %497 = vperm.xlu0 %3483, %v479_v9   ;;  %v630_v42 = vld [vmem:[#allocation5 + $0x2c0] sm:$0xff]  ;;  %v2622_v43 = vld [vmem:[#allocation34] sm:$0xff]  ;;  %v629_v46 = vld [vmem:[#allocation5 + $0x2b8] sm:$0xff] }
 0x170   :  { %657 = vmatpush1.msra.mxu0 %v566_v19  ;;  %742 = vmatpush1.msra.mxu1 %v634_v32  ;;  %v556_v45 = vld [vmem:[#allocation5 + $0x70] sm:$0xff]  ;;  %v555_v47 = vld [vmem:[#allocation5 + $0x68] sm:$0xff]  ;;  %v554_v49 = vld [vmem:[#allocation5 + $0x60] sm:$0xff] }
 0x171   :  { %658 = vmatprep.subr.mxu0 %v565_v22  ;;  %743 = vmatprep.subr.mxu1 %v633_v34  ;;  %v628_v48 = vld [vmem:[#allocation5 + $0x2b0] sm:$0xff]  ;;  %v627_v50 = vld [vmem:[#allocation5 + $0x2a8] sm:$0xff]  ;;  %v2756_v51 = vld [vmem:[#allocation37 + $0x10] sm:$0xff] }
 0x172   :  { %659 = vmatpush1.msra.mxu0 %v564_v23  ;;  %744 = vmatpush1.msra.mxu1 %v632_v38  ;;  %v2757_v52 = vld [vmem:[#allocation37 + $0x18] sm:$0xff]  ;;  %v553_v53 = vld [vmem:[#allocation5 + $0x58] sm:$0xff]  ;;  %v552_v55 = vld [vmem:[#allocation5 + $0x50] sm:$0xff] }
 0x173   :  { %1116 = vperm.xlu1 %3484, %v1112_v15   ;;  %1097 = vperm.xlu0 %3483, %v1093_v16   ;;  %v626_v54 = vld [vmem:[#allocation5 + $0x2a0] sm:$0xff]  ;;  %v625_v56 = vld [vmem:[#allocation5 + $0x298] sm:$0xff]  ;;  %v551_v57 = vld [vmem:[#allocation5 + $0x48] sm:$0xff] }
 0x174   :  { %660 = vmatprep.subr.mxu0 %v563_v24  ;;  %745 = vmatprep.subr.mxu1 %v631_v40  ;;  %v624_v58 = vld [vmem:[#allocation5 + $0x290] sm:$0xff]  ;;  %v550_v61 = vld [vmem:[#allocation5 + $0x40] sm:$0xff]  ;;  %v623_v62 = vld [vmem:[#allocation5 + $0x288] sm:$0xff] }
 0x175   :  { %661 = vmatpush1.msra.mxu0 %v562_v28  ;;  %746 = vmatpush1.msra.mxu1 %v630_v42  ;;  %v2754_v59 = vld [vmem:[#allocation37] sm:$0xff]  ;;  %v2755_v60 = vld [vmem:[#allocation37 + $0x8] sm:$0xff]  ;;  %v622_v0 = vld [vmem:[#allocation5 + $0x280] sm:$0xff] }
 0x176   :  { %662 = vmatprep.subr.mxu0 %v561_v31  ;;  %747 = vmatprep.subr.mxu1 %v629_v46  ;;  %v549_v63 = vld [vmem:[#allocation5 + $0x38] sm:$0xff]  ;;  %v548_v1 = vld [vmem:[#allocation5 + $0x30] sm:$0xff]  ;;  %v2894_v4 = vld [vmem:[#allocation40 + $0x38] sm:$0xff] }
 0x177   :  { %1121 = vperm.xlu1 %3484, %v1113_v20   ;;  %1102 = vperm.xlu0 %3483, %v1094_v21   ;;  %v621_v2 = vld [vmem:[#allocation5 + $0x278] sm:$0xff]  ;;  %v547_v6 = vld [vmem:[#allocation5 + $0x28] sm:$0xff]  ;;  %v620_v7 = vld [vmem:[#allocation5 + $0x270] sm:$0xff] }
 0x178   :  { %663 = vmatpush1.msra.mxu0 %v560_v33  ;;  %748 = vmatpush1.msra.mxu1 %v628_v48  ;;  %v2893_v3 = vld [vmem:[#allocation40 + $0x30] sm:$0xff]  ;;  %v619_v9 = vld [vmem:[#allocation5 + $0x268] sm:$0xff]  ;;  %v2892_v13 = vld [vmem:[#allocation40 + $0x28] sm:$0xff] }
 0x179   :  { %664 = vmatprep.subr.mxu0 %v559_v37  ;;  %749 = vmatprep.subr.mxu1 %v627_v50  ;;  %v546_v8 = vld [vmem:[#allocation5 + $0x20] sm:$0xff]  ;;  %v545_v10 = vld [vmem:[#allocation5 + $0x18] sm:$0xff]  ;;  %v2891_v12 = vld [vmem:[#allocation40 + $0x20] sm:$0xff] }
 0x17a   :  { %665 = vmatpush1.msra.mxu0 %v558_v39  ;;  %750 = vmatpush1.msra.mxu1 %v626_v54  ;;  %v618_v11 = vld [vmem:[#allocation5 + $0x260] sm:$0xff]  ;;  %v544_v14 = vld [vmem:[#allocation5 + $0x10] sm:$0xff]  ;;  %v617_v15 = vld [vmem:[#allocation5 + $0x258] sm:$0xff] }
 0x17b   :  { %1629 = vperm.xlu1 %3484, %v3203_v25   ;;  %1620 = vperm.xlu0 %3483, %v1617_v26   ;;  %v543_v16 = vld [vmem:[#allocation5 + $0x8] sm:$0xff]  ;;  %v616_v17 = vld [vmem:[#allocation5 + $0x250] sm:$0xff]  ;;  %v542_v18 = vld [vmem:[#allocation5] sm:$0xff] }
 0x17c   :  { %666 = vmatprep.subr.mxu0 %v557_v41  ;;  %751 = vmatprep.subr.mxu1 %v625_v56  ;;  %v615_v19 = vld [vmem:[#allocation5 + $0x248] sm:$0xff]  ;;  %v2889_v20 = vld [vmem:[#allocation40 + $0x10] sm:$0xff]  ;;  %v604_v24 = vld [vmem:[#allocation5 + $0x1f0] sm:$0xff] }
 0x17d   :  { %667 = vmatpush1.msra.mxu0 %v556_v45  ;;  %752 = vmatpush1.msra.mxu1 %v624_v58  ;;  %v2890_v21 = vld [vmem:[#allocation40 + $0x18] sm:$0xff]  ;;  %v605_v22 = vld [vmem:[#allocation5 + $0x1f8] sm:$0xff]  ;;  %v612_v27 = vld [vmem:[#allocation5 + $0x230] sm:$0xff] }
 0x17e   :  { %668 = vmatprep.subr.mxu0 %v555_v47  ;;  %753 = vmatprep.subr.mxu1 %v623_v62  ;;  %v614_v23 = vld [vmem:[#allocation5 + $0x240] sm:$0xff]  ;;  %v613_v25 = vld [vmem:[#allocation5 + $0x238] sm:$0xff]  ;;  %v603_v26 = vld [vmem:[#allocation5 + $0x1e8] sm:$0xff] }
 0x17f   :  { %2638 = vperm.xlu1 %3484, %v2624_v35   ;;  %2643 = vperm.xlu0 %3483, %v2625_v36   ;;  %v2887_v28 = vld [vmem:[#allocation40] sm:$0xff]  ;;  %v2888_v29 = vld [vmem:[#allocation40 + $0x8] sm:$0xff]  ;;  %v602_v30 = vld [vmem:[#allocation5 + $0x1e0] sm:$0xff] }
 0x180   :  { %669 = vmatpush1.msra.mxu0 %v554_v49  ;;  %754 = vmatpush1.msra.mxu1 %v622_v0  ;;  %v611_v31 = vld [vmem:[#allocation5 + $0x228] sm:$0xff]  ;;  %v601_v32 = vld [vmem:[#allocation5 + $0x1d8] sm:$0xff]  ;;  %v600_v33 = vld [vmem:[#allocation5 + $0x1d0] sm:$0xff] }
 0x181   :  { %670 = vmatprep.subr.mxu0 %v553_v53  ;;  %755 = vmatprep.subr.mxu1 %v621_v2  ;;  %v610_v34 = vld [vmem:[#allocation5 + $0x220] sm:$0xff]  ;;  %v599_v35 = vld [vmem:[#allocation5 + $0x1c8] sm:$0xff]  ;;  %v609_v37 = vld [vmem:[#allocation5 + $0x218] sm:$0xff]  ;;  %v469_v2 = vlaneseq }
 0x182   :  { %671 = vmatpush1.msra.mxu0 %v552_v55  ;;  %756 = vmatpush1.msra.mxu1 %v620_v7  ;;  %v4370_v36 = vld [vmem:[%s4617_s13] sm:$0xff]  ;;  %v608_v39 = vld [vmem:[#allocation5 + $0x210] sm:$0xff]  ;;  %v607_v41 = vld [vmem:[#allocation5 + $0x208] sm:$0xff] }
 0x183   :  { %2628 = vperm.xlu1 %3484, %v2622_v43   ;;  %2633 = vperm.xlu0 %3483, %v2623_v44   ;;  %v598_v38 = vld [vmem:[#allocation5 + $0x1c0] sm:$0xff]  ;;  %v597_v40 = vld [vmem:[#allocation5 + $0x1b8] sm:$0xff]  ;;  %v596_v42 = vld [vmem:[#allocation5 + $0x1b0] sm:$0xff]  ;;  %v465_v7 = vrot.slane %v4370_v36, 7 }
 0x184   :  { %672 = vmatprep.subr.mxu0 %v551_v57  ;;  %757 = vmatprep.subr.mxu1 %v619_v9  ;;  %v606_v43 = vld [vmem:[#allocation5 + $0x200] sm:$0xff]  ;;  %v595_v44 = vld [vmem:[#allocation5 + $0x1a8] sm:$0xff]  ;;  %v593_v46 = vld [vmem:[#allocation5 + $0x198] sm:$0xff] }
 0x185   :  { %673 = vmatpush1.msra.mxu0 %v550_v61  ;;  %758 = vmatpush1.msra.mxu1 %v618_v11  ;;  %v594_v45 = vld [vmem:[#allocation5 + $0x1a0] sm:$0xff]  ;;  %v592_v47 = vld [vmem:[#allocation5 + $0x190] sm:$0xff]  ;;  %v591_v48 = vld [vmem:[#allocation5 + $0x188] sm:$0xff] }
 0x186   :  { %674 = vmatprep.subr.mxu0 %v549_v63  ;;  %759 = vmatprep.subr.mxu1 %v617_v15  ;;  %v590_v49 = vld [vmem:[#allocation5 + $0x180] sm:$0xff]  ;;  %v589_v50 = vld [vmem:[#allocation5 + $0x178] sm:$0xff]  ;;  %v584_v55 = vld [vmem:[#allocation5 + $0x150] sm:$0xff] }
 0x187   :  { %2770 = vperm.xlu1 %3484, %v2756_v51   ;;  %2775 = vperm.xlu0 %3483, %v2757_v52   ;;  %v588_v51 = vld [vmem:[#allocation5 + $0x170] sm:$0xff]  ;;  %v587_v52 = vld [vmem:[#allocation5 + $0x168] sm:$0xff]  ;;  %v586_v53 = vld [vmem:[#allocation5 + $0x160] sm:$0xff] }
 0x188   :  { %675 = vmatpush1.msra.mxu0 %v548_v1  ;;  %760 = vmatpush1.msra.mxu1 %v616_v17  ;;  %v585_v54 = vld [vmem:[#allocation5 + $0x158] sm:$0xff]  ;;  %v583_v56 = vld [vmem:[#allocation5 + $0x148] sm:$0xff]  ;;  %v582_v57 = vld [vmem:[#allocation5 + $0x140] sm:$0xff] }
 0x189   :  { %676 = vmatprep.subr.mxu0 %v547_v6  ;;  %761 = vmatprep.subr.mxu1 %v615_v19  ;;  %v581_v58 = vld [vmem:[#allocation5 + $0x138] sm:$0xff]  ;;  %v578_v61 = vld [vmem:[#allocation5 + $0x120] sm:$0xff]  ;;  %v576_v63 = vld [vmem:[#allocation5 + $0x110] sm:$0xff] }
 0x18a   :  { %677 = vmatpush1.msra.mxu0 %v546_v8  ;;  %762 = vmatpush1.msra.mxu1 %v614_v23  ;;  %v577_v62 = vld [vmem:[#allocation5 + $0x118] sm:$0xff]  ;;  %v575_v0 = vld [vmem:[#allocation5 + $0x108] sm:$0xff]  ;;  %v574_v1 = vld [vmem:[#allocation5 + $0x100] sm:$0xff] }
 0x18b   :  { %2760 = vperm.xlu1 %3484, %v2754_v59   ;;  %2765 = vperm.xlu0 %3483, %v2755_v60   ;;  %v580_v59 = vld [vmem:[#allocation5 + $0x130] sm:$0xff]  ;;  %v579_v60 = vld [vmem:[#allocation5 + $0x128] sm:$0xff] }
 0x18c   :  { %678 = vmatprep.subr.mxu0 %v545_v10  ;;  %763 = vmatprep.subr.mxu1 %v613_v25  ;;  %v462_v6 = vld [vmem:[%s4617_s13 + $0x8] sm:$0xff] }
 0x18d   :  { %679 = vmatpush1.msra.mxu0 %v544_v14  ;;  %764 = vmatpush1.msra.mxu1 %v612_v27  ;;  %v466_v9 = vrot.slane %v462_v6, 7  ;;  %v505_v11 = vrot.slane %v462_v6, 1 }
 0x18e   :  { %680 = vmatprep.subr.mxu0 %v543_v16  ;;  %765 = vmatprep.subr.mxu1 %v611_v31 }
 0x18f   :  { %2927 = vperm.xlu1 %3484, %v2893_v3   ;;  %2932 = vperm.xlu0 %3483, %v2894_v4   ;;  %v4373_v3 = vshrl.u32 %v469_v2, 7  ;;  %v464_v4 = vld [vmem:[%s4617_s13 + $0x18] sm:$0xff] }
 0x190   :  { %681 = vmatpush1.msra.mxu0 %v542_v18  ;;  %714 = vmatprep.mubr.f32.mxu0 %v4370_v36  ;;  %v468_v8 = vrot.slane %v464_v4, 7 }
 0x191   :  { %682 = vmatprep.subr.mxu0 %v605_v22  ;;  %766 = vmatpush1.msra.mxu1 %v610_v34  ;;  %vm471_vm0 = vcmp.lt.s32.totalorder %v4373_v3, 1  ;;  %vm508_vm1 = vcmp.lt.s32.totalorder %v4373_v3, 7 }
 0x192   :  { %683 = vmatpush2.msra.mxu0 %v604_v24  ;;  %767 = vmatprep.subr.mxu1 %v609_v37  ;;  %v475_v10 = vsel %vm471_vm0, %v468_v8, %v465_v7  ;;  %v474_v15 = vsel %vm471_vm0, %v465_v7, %v466_v9 }
 0x193   :  { %2917 = vperm.xlu1 %3484, %v2891_v12   ;;  %2922 = vperm.xlu0 %3483, %v2892_v13   ;;  %v504_v12 = vrot.slane %v4370_v36, 1  ;;  %v463_v13 = vld [vmem:[%s4617_s13 + $0x10] sm:$0xff] }
 0x194   :  { %684 = vmatprep.subr.mxu0 %v603_v26  ;;  %768 = vmatpush1.msra.mxu1 %v608_v39  ;;  %v506_v18 = vrot.slane %v463_v13, 1  ;;  %v507_v26 = vrot.slane %v464_v4, 1 }
 0x195   :  { %685 = vmatpush2.msra.mxu0 %v602_v30  ;;  %769 = vmatprep.subr.mxu1 %v607_v41  ;;  %v511_v19 = vsel %vm508_vm1, %v504_v12, %v505_v11 }
 0x196   :  { %686 = vmatprep.subr.mxu0 %v601_v32  ;;  %770 = vmatpush1.msra.mxu1 %v606_v43  ;;  %v510_v25 = vsel %vm508_vm1, %v505_v11, %v506_v18  ;;  %v509_v32 = vsel %vm508_vm1, %v506_v18, %v507_v26 }
 0x197   :  { %2907 = vperm.xlu1 %3484, %v2889_v20   ;;  %2912 = vperm.xlu0 %3483, %v2890_v21   ;;  %v467_v20 = vrot.slane %v463_v13, 7 }
 0x198   :  { %687 = vmatpush2.msra.mxu0 %v600_v33 }
 0x199   :  { %688 = vmatprep.subr.mxu0 %v599_v35  ;;  %v473_v27 = vsel %vm471_vm0, %v466_v9, %v467_v20  ;;  %v472_v33 = vsel %vm471_vm0, %v467_v20, %v468_v8 }
 0x19a   :  { %689 = vmatpush2.msra.mxu0 %v598_v38  ;;  %v512_v38 = vsel %vm508_vm1, %v507_v26, %v504_v12 }
 0x19b   :  { %2897 = vperm.xlu1 %3484, %v2887_v28   ;;  %2902 = vperm.xlu0 %3483, %v2888_v29  }
 0x19c   :  { %690 = vmatprep.subr.mxu0 %v597_v40 }
 0x19d   :  { %691 = vmatpush2.msra.mxu0 %v596_v42  ;;  %v4403_v42 = vsub.s32 0, %v4373_v3 }
 0x19e   :  { %692 = vmatprep.subr.mxu0 %v595_v44 }
 0x19f   :  { %693 = vmatpush2.msra.mxu0 %v594_v45  ;;  %v638_v45 = vld [vmem:[%s4618_s2] sm:$0x3] }
 0x1a0   :  { %694 = vmatprep.subr.mxu0 %v593_v46  ;;  %v4407_v46 = vsub.s32 1, %v4373_v3  ;;  %v1506_v3 = vld [vmem:[#allocation17 + $0xd0] sm:$0xff] }
 0x1a1   :  { %695 = vmatpush2.msra.mxu0 %v592_v47 }
 0x1a2   :  { %696 = vmatprep.subr.mxu0 %v591_v48 }
 0x1a3   :  { %697 = vmatpush2.msra.mxu0 %v590_v49  ;;  %v643_v49 = vrot.slane %v638_v45, %v4403_v42 }
 0x1a4   :  { %698 = vmatprep.subr.mxu0 %v589_v50 }
 0x1a5   :  { %699 = vmatpush2.msra.mxu0 %v588_v51 }
 0x1a6   :  { %700 = vmatprep.subr.mxu0 %v587_v52  ;;  %v647_v52 = vrot.slane %v638_v45, %v4407_v46 }
 0x1a7   :  { %701 = vmatpush2.msra.mxu0 %v586_v53 }
 0x1a8   :  { %702 = vmatprep.subr.mxu0 %v585_v54 }
 0x1a9   :  { %703 = vmatpush2.msra.mxu0 %v584_v55 }
 0x1aa   :  { %704 = vmatprep.subr.mxu0 %v583_v56 }
 0x1ab   :  { %705 = vmatpush2.msra.mxu0 %v582_v57 }
 0x1ac   :  { %706 = vmatprep.subr.mxu0 %v581_v58 }
 0x1ad   :  { %707 = vmatpush2.msra.mxu0 %v580_v59 }
 0x1ae   :  { %708 = vmatprep.subr.mxu0 %v579_v60 }
 0x1af   :  { %709 = vmatpush2.msra.mxu0 %v578_v61 }
 0x1b0   :  { %710 = vmatprep.subr.mxu0 %v577_v62 }
 0x1b1   :  { %711 = vmatpush2.msra.mxu0 %v576_v63 }
 0x1b2   :  { %712 = vmatprep.subr.mxu0 %v575_v0 }
 0x1b3   :  { %713 = vmatpush2.msra.mxu0 %v574_v1 }
 0x1de   :  { %v488_v14 = vpop.permute.xlu1 %487  ;;  %v483_v16 = vpop.permute.xlu0 %482 }
 0x1df   :  { %v500_v17 = vmul.f32 %v483_v16, %v475_v10  ;;  %v501_v21 = vmul.f32 %v488_v14, %v474_v15 }
 0x1e1   :  { %715 = vmatmul.mubr.f32.vlgmr.msra.gmra.mxu0 %v500_v17 }
 0x1e2   :  { %v526_v22 = vpop.permute.xlu1 %525  ;;  %v521_v23 = vpop.permute.xlu0 %520  ;;  %720 = vmatprep.mubr.f32.mxu0 %v462_v6 }
 0x1e3   :  { %v538_v24 = vmul.f32 %v521_v23, %v511_v19  ;;  %v539_v30 = vmul.f32 %v526_v22, %v510_v25 }
 0x1e5   :  { %721 = vmatmul.mubr.f32.gmra.mxu0 %v501_v21  ;;  %804 = vmatmul.mubr.f32.vlgmr.msra.gmra.mxu1 %v538_v24 }
 0x1e6   :  { %v531_v28 = vpop.permute.xlu1 %530  ;;  %v493_v29 = vpop.permute.xlu0 %492  ;;  %726 = vmatprep.mubr.f32.mxu0 %v463_v13  ;;  %809 = vmatprep.mubr.f32.mxu1 %v4112_v5 }
 0x1e7   :  { %v502_v31 = vmul.f32 %v493_v29, %v473_v27  ;;  %v540_v35 = vmul.f32 %v531_v28, %v509_v32 }
 0x1e9   :  { %727 = vmatmul.mubr.f32.gmra.mxu0 %v502_v31  ;;  %810 = vmatmul.mubr.f32.gmra.mxu1 %v539_v30 }
 0x1ea   :  { %v498_v34 = vpop.permute.xlu0 %497  ;;  %732 = vmatprep.mubr.f32.mxu0 %v464_v4  ;;  %815 = vmatprep.mubr.f32.mxu1 %v4112_v5  ;;  %v536_v37 = vpop.permute.xlu1 %535 }
 0x1eb   :  { %v503_v36 = vmul.f32 %v498_v34, %v472_v33  ;;  %v541_v39 = vmul.f32 %v536_v37, %v512_v38 }
 0x1ed   :  { %733 = vmatmul.mubr.f32.gmra.mxu0 %v503_v36  ;;  %816 = vmatmul.mubr.f32.gmra.mxu1 %v540_v35 }
 0x1ee   :  { %821 = vmatprep.mubr.f32.mxu1 %v4112_v5 }
 0x1f1   :  { %822 = vmatmul.mubr.f32.gmra.mxu1 %v541_v39 }
 0x1f2   :  { %933 = vmatprep.mubr.f32.mxu1 %v4112_v5 }
 0x2a1   :  { %v716_v40 = vpop.f32.mrf.mxu0 }
 0x2a2   :  { %v717_v55 = vadd.f32 %v716_v40, %v643_v49 }
 0x2a3   :  { %v718_v41 = vpop.f32.mrf.mxu0 }
 0x2a4   :  { %v719_v58 = vadd.f32 %v718_v41, %v647_v52 }
 0x2a5   :  { %v722_v43 = vpop.f32.mrf.mxu0  ;;  %v805_v44 = vpop.f32.mrf.mxu1 }
 0x2a6   :  { %v806_v59 = vadd.f32 %v805_v44, %v717_v55  ;;  %v723_v4 = vadd.f32 %v722_v43, %v643_v49  ;;  %v973_v55 = vld [vmem:[%s4619_s7 + $0xd8] sm:$0xff] }
 0x2a7   :  { %v724_v47 = vpop.f32.mrf.mxu0  ;;  %v807_v48 = vpop.f32.mrf.mxu1 }
 0x2a8   :  { %v725_v0 = vadd.f32 %v724_v47, %v647_v52  ;;  %v808_v1 = vadd.f32 %v807_v48, %v719_v58  ;;  %v828_v12 = vmax.f32 %v806_v59, 0.0  ;;  %v970_v58 = vld [vmem:[%s4619_s7 + $0xc0] sm:$0xff]  ;;  %v969_v59 = vld [vmem:[%s4619_s7 + $0xb8] sm:$0xff] }
 0x2a9   :  { %v728_v50 = vpop.f32.mrf.mxu0  ;;  %v811_v51 = vpop.f32.mrf.mxu1 }
 0x2aa   :  { %v729_v60 = vadd.f32 %v728_v50, %v643_v49  ;;  %v812_v13 = vadd.f32 %v811_v51, %v723_v4  ;;  %v829_v15 = vmax.f32 %v808_v1, 0.0  ;;  %v836_v23 = vrot.slane %v828_v12, 1  ;;  %v977_v50 = vld [vmem:[%s4619_s7 + $0xf8] sm:$0xff]  ;;  %v976_v51 = vld [vmem:[%s4619_s7 + $0xf0] sm:$0xff]  ;;  %v963_v1 = vld [vmem:[%s4619_s7 + $0x88] sm:$0xff] }
 0x2ab   :  { %v730_v53 = vpop.f32.mrf.mxu0  ;;  %v813_v54 = vpop.f32.mrf.mxu1  ;;  %v961_v4 = vld [vmem:[%s4619_s7 + $0x78] sm:$0xff] }
 0x2ac   :  { %v731_v61 = vadd.f32 %v730_v53, %v647_v52  ;;  %v814_v9 = vadd.f32 %v813_v54, %v725_v0  ;;  %v830_v24 = vmax.f32 %v812_v13, 0.0  ;;  %v837_v25 = vrot.slane %v829_v15, 1  ;;  %v974_v53 = vld [vmem:[%s4619_s7 + $0xe0] sm:$0xff]  ;;  %v861_v54 = vld [vmem:[#allocation13 + $0x8] sm:$0xff]  ;;  %v953_v13 = vld [vmem:[%s4619_s7 + $0x38] sm:$0xff] }
 0x2ad   :  { %v734_v56 = vpop.f32.mrf.mxu0  ;;  %v817_v57 = vpop.f32.mrf.mxu1  ;;  %v964_v0 = vld [vmem:[%s4619_s7 + $0x90] sm:$0xff] }
 0x2ae   :  { %v735_v2 = vadd.f32 %v734_v56, %v643_v49  ;;  %v818_v6 = vadd.f32 %v817_v57, %v729_v60  ;;  %v831_v20 = vmax.f32 %v814_v9, 0.0  ;;  %v838_v33 = vrot.slane %v830_v24, 1  ;;  %v860_v49 = vld [vmem:[#allocation13] sm:$0xff]  ;;  %v972_v56 = vld [vmem:[%s4619_s7 + $0xd0] sm:$0xff]  ;;  %v957_v9 = vld [vmem:[%s4619_s7 + $0x58] sm:$0xff] }
 0x2af   :  { %v736_v62 = vpop.f32.mrf.mxu0  ;;  %v819_v63 = vpop.f32.mrf.mxu1  ;;  %v971_v57 = vld [vmem:[%s4619_s7 + $0xc8] sm:$0xff]  ;;  %v968_v60 = vld [vmem:[%s4619_s7 + $0xb0] sm:$0xff] }
 0x2b0   :  { %v820_v7 = vadd.f32 %v819_v63, %v731_v61  ;;  %v737_v10 = vadd.f32 %v736_v62, %v647_v52  ;;  %v832_v19 = vmax.f32 %v818_v6, 0.0  ;;  %v839_v30 = vrot.slane %v831_v20, 1  ;;  %v975_v52 = vld [vmem:[%s4619_s7 + $0xe8] sm:$0xff]  ;;  %v966_v62 = vld [vmem:[%s4619_s7 + $0xa0] sm:$0xff]  ;;  %v965_v63 = vld [vmem:[%s4619_s7 + $0x98] sm:$0xff] }
 0x2b1   :  { %v823_v8 = vpop.f32.mrf.mxu1  ;;  %v848_v43 = vsel %vm508_vm1, %v836_v23, %v838_v33  ;;  %v967_v61 = vld [vmem:[%s4619_s7 + $0xa8] sm:$0xff]  ;;  %v960_v6 = vld [vmem:[%s4619_s7 + $0x70] sm:$0xff] }
 0x2b2   :  { %v824_v11 = vadd.f32 %v823_v8, %v735_v2  ;;  %v833_v16 = vmax.f32 %v820_v7, 0.0  ;;  %v840_v28 = vrot.slane %v832_v19, 1  ;;  %v849_v41 = vsel %vm508_vm1, %v837_v25, %v839_v30  ;;  %v962_v2 = vld [vmem:[%s4619_s7 + $0x80] sm:$0xff]  ;;  %v959_v7 = vld [vmem:[%s4619_s7 + $0x68] sm:$0xff] }
 0x2b3   :  { %v825_v14 = vpop.f32.mrf.mxu1  ;;  %v853_v47 = vmax.f32 %v829_v15, %v849_v41  ;;  %v852_v48 = vmax.f32 %v828_v12, %v848_v43  ;;  %v958_v8 = vld [vmem:[%s4619_s7 + $0x60] sm:$0xff]  ;;  %v951_v15 = vld [vmem:[%s4619_s7 + $0x28] sm:$0xff]  ;;  %v989_v41 = vld [vmem:[%s4619_s7 + $0x158] sm:$0xff] }
 0x2b4   :  { %v834_v17 = vmax.f32 %v824_v11, 0.0  ;;  %v826_v18 = vadd.f32 %v825_v14, %v737_v10  ;;  %v841_v26 = vrot.slane %v833_v16, 1  ;;  %v846_v38 = vsel %vm508_vm1, %v838_v33, %v840_v28  ;;  %v956_v10 = vld [vmem:[%s4619_s7 + $0x50] sm:$0xff]  ;;  %v955_v11 = vld [vmem:[%s4619_s7 + $0x48] sm:$0xff]  ;;  %v954_v12 = vld [vmem:[%s4619_s7 + $0x40] sm:$0xff] }
 0x2b5   :  { %v854_v45 = vmax.f32 %v830_v24, %v846_v38  ;;  %v952_v14 = vld [vmem:[%s4619_s7 + $0x30] sm:$0xff]  ;;  %v1006_v24 = vld [vmem:[%s4619_s7 + $0x1e0] sm:$0xff]  ;;  %v997_v33 = vld [vmem:[%s4619_s7 + $0x198] sm:$0xff] }
 0x2b6   :  { %v842_v21 = vrot.slane %v834_v17, 1  ;;  %v835_v22 = vmax.f32 %v826_v18, 0.0  ;;  %v847_v37 = vsel %vm508_vm1, %v839_v30, %v841_v26  ;;  %v948_v18 = vld [vmem:[%s4619_s7 + $0x10] sm:$0xff] }
 0x2b7   :  { %v855_v44 = vmax.f32 %v831_v20, %v847_v37  ;;  %v946_v20 = vld [vmem:[%s4619_s7] sm:$0xff]  ;;  %v1000_v30 = vld [vmem:[%s4619_s7 + $0x1b0] sm:$0xff]  ;;  %v993_v37 = vld [vmem:[%s4619_s7 + $0x178] sm:$0xff] }
 0x2b8   :  { %v843_v27 = vrot.slane %v835_v22, 1  ;;  %v850_v29 = vsel %vm508_vm1, %v842_v21, %v836_v23  ;;  %v844_v34 = vsel %vm508_vm1, %v840_v28, %v842_v21  ;;  %v1009_v21 = vld [vmem:[%s4619_s7 + $0x1f8] sm:$0xff]  ;;  %v1007_v23 = vld [vmem:[%s4619_s7 + $0x1e8] sm:$0xff]  ;;  %v1002_v28 = vld [vmem:[%s4619_s7 + $0x1c0] sm:$0xff] }
 0x2b9   :  { %v858_v36 = vmax.f32 %v834_v17, %v850_v29  ;;  %v856_v40 = vmax.f32 %v832_v19, %v844_v34  ;;  %v949_v17 = vld [vmem:[%s4619_s7 + $0x18] sm:$0xff]  ;;  %v947_v19 = vld [vmem:[%s4619_s7 + $0x8] sm:$0xff]  ;;  %v996_v34 = vld [vmem:[%s4619_s7 + $0x190] sm:$0xff] }
 0x2ba   :  { %v851_v31 = vsel %vm508_vm1, %v843_v27, %v837_v25  ;;  %v845_v32 = vsel %vm508_vm1, %v841_v26, %v843_v27  ;;  %v1005_v25 = vld [vmem:[%s4619_s7 + $0x1d8] sm:$0xff]  ;;  %v1004_v26 = vld [vmem:[%s4619_s7 + $0x1d0] sm:$0xff]  ;;  %v1003_v27 = vld [vmem:[%s4619_s7 + $0x1c8] sm:$0xff] }
 0x2bb   :  { %v859_v35 = vmax.f32 %v835_v22, %v851_v31  ;;  %v857_v39 = vmax.f32 %v833_v16, %v845_v32  ;;  %v950_v16 = vld [vmem:[%s4619_s7 + $0x20] sm:$0xff]  ;;  %v1008_v22 = vld [vmem:[%s4619_s7 + $0x1f0] sm:$0xff]  ;;  %v1001_v29 = vld [vmem:[%s4619_s7 + $0x1b8] sm:$0xff] }
 0x2bc   :  { %v999_v31 = vld [vmem:[%s4619_s7 + $0x1a8] sm:$0xff]  ;;  %v998_v32 = vld [vmem:[%s4619_s7 + $0x1a0] sm:$0xff]  ;;  %v992_v38 = vld [vmem:[%s4619_s7 + $0x170] sm:$0xff] }
 0x2bd   :  { %893 = vmatprep.subr.mxu1 %v859_v35  ;;  %v995_v35 = vld [vmem:[%s4619_s7 + $0x188] sm:$0xff]  ;;  %v988_v43 = vld [vmem:[%s4619_s7 + $0x150] sm:$0xff] }
 0x2be   :  { %894 = vmatpush1.msra.mxu1 %v858_v36  ;;  %v994_v36 = vld [vmem:[%s4619_s7 + $0x180] sm:$0xff] }
 0x2bf   :  { %895 = vmatprep.subr.mxu1 %v857_v39  ;;  %v991_v39 = vld [vmem:[%s4619_s7 + $0x168] sm:$0xff] }
 0x2c0   :  { %896 = vmatpush1.msra.mxu1 %v856_v40  ;;  %v990_v40 = vld [vmem:[%s4619_s7 + $0x160] sm:$0xff] }
 0x2c1   :  { %897 = vmatprep.subr.mxu1 %v855_v44  ;;  %v987_v44 = vld [vmem:[%s4619_s7 + $0x148] sm:$0xff] }
 0x2c2   :  { %898 = vmatpush1.msra.mxu1 %v854_v45  ;;  %v986_v45 = vld [vmem:[%s4619_s7 + $0x140] sm:$0xff] }
 0x2c3   :  { %899 = vmatprep.subr.mxu1 %v853_v47  ;;  %v985_v47 = vld [vmem:[%s4619_s7 + $0x138] sm:$0xff] }
 0x2c4   :  { %900 = vmatpush1.msra.mxu1 %v852_v48  ;;  %v984_v48 = vld [vmem:[%s4619_s7 + $0x130] sm:$0xff] }
 0x2c5   :  { %3200 = vmatmul.mubr.msk.f32.vlgmr.msra.gmra.mxu1 %vm862_vm2, %v860_v49  ;;  %1010 = vmatprep.subr.mxu1 %v977_v50  ;;  %v983_v49 = vld [vmem:[%s4619_s7 + $0x128] sm:$0xff]  ;;  %v982_v50 = vld [vmem:[%s4619_s7 + $0x120] sm:$0xff] }
 0x2c6   :  { %939 = vmatprep.mubr.f32.mxu1 %v4112_v5  ;;  %1011 = vmatpush1.msra.mxu1 %v976_v51  ;;  %v981_v51 = vld [vmem:[%s4619_s7 + $0x118] sm:$0xff] }
 0x2c7   :  { %1012 = vmatprep.subr.mxu1 %v975_v52  ;;  %v980_v52 = vld [vmem:[%s4619_s7 + $0x110] sm:$0xff] }
 0x2c8   :  { %1013 = vmatpush1.msra.mxu1 %v974_v53  ;;  %v979_v53 = vld [vmem:[%s4619_s7 + $0x108] sm:$0xff] }
 0x2c9   :  { %3201 = vmatmul.mubr.msk.f32.gmra.mxu1 %vm862_vm2, %v861_v54  ;;  %1014 = vmatprep.subr.mxu1 %v973_v55  ;;  %v978_v54 = vld [vmem:[%s4619_s7 + $0x100] sm:$0xff] }
 0x2ca   :  { %1015 = vmatpush1.msra.mxu1 %v972_v56  ;;  %v1157_v55 = vld [vmem:[#allocation7 + $0xf8] sm:$0xff]  ;;  %v1156_v56 = vld [vmem:[#allocation7 + $0xf0] sm:$0xff] }
 0x2cb   :  { %1016 = vmatprep.subr.mxu1 %v971_v57  ;;  %v1155_v57 = vld [vmem:[#allocation7 + $0xe8] sm:$0xff]  ;;  %1234 = vmatprep.subr.mxu0 %v1157_v55 }
 0x2cc   :  { %1017 = vmatpush1.msra.mxu1 %v970_v58  ;;  %v1154_v58 = vld [vmem:[#allocation7 + $0xe0] sm:$0xff]  ;;  %1235 = vmatpush1.msra.mxu0 %v1156_v56  ;;  %v1215_v55 = vld [vmem:[#allocation7 + $0x2c8] sm:$0xff] }
 0x2cd   :  { %1018 = vmatprep.subr.mxu1 %v969_v59  ;;  %v1153_v59 = vld [vmem:[#allocation7 + $0xd8] sm:$0xff]  ;;  %1236 = vmatprep.subr.mxu0 %v1155_v57  ;;  %v1214_v56 = vld [vmem:[#allocation7 + $0x2c0] sm:$0xff] }
 0x2ce   :  { %1019 = vmatpush1.msra.mxu1 %v968_v60  ;;  %v1152_v60 = vld [vmem:[#allocation7 + $0xd0] sm:$0xff]  ;;  %1237 = vmatpush1.msra.mxu0 %v1154_v58  ;;  %v1213_v57 = vld [vmem:[#allocation7 + $0x2b8] sm:$0xff] }
 0x2cf   :  { %1020 = vmatprep.subr.mxu1 %v967_v61  ;;  %v1151_v61 = vld [vmem:[#allocation7 + $0xc8] sm:$0xff]  ;;  %1238 = vmatprep.subr.mxu0 %v1153_v59  ;;  %v1212_v58 = vld [vmem:[#allocation7 + $0x2b0] sm:$0xff] }
 0x2d0   :  { %1021 = vmatpush1.msra.mxu1 %v966_v62  ;;  %v1150_v62 = vld [vmem:[#allocation7 + $0xc0] sm:$0xff]  ;;  %1239 = vmatpush1.msra.mxu0 %v1152_v60  ;;  %v1211_v59 = vld [vmem:[#allocation7 + $0x2a8] sm:$0xff] }
 0x2d1   :  { %1022 = vmatprep.subr.mxu1 %v965_v63  ;;  %v1149_v63 = vld [vmem:[#allocation7 + $0xb8] sm:$0xff]  ;;  %1240 = vmatprep.subr.mxu0 %v1151_v61  ;;  %v1210_v60 = vld [vmem:[#allocation7 + $0x2a0] sm:$0xff] }
 0x2d2   :  { %1023 = vmatpush1.msra.mxu1 %v964_v0  ;;  %v1148_v0 = vld [vmem:[#allocation7 + $0xb0] sm:$0xff]  ;;  %1241 = vmatpush1.msra.mxu0 %v1150_v62  ;;  %v1209_v61 = vld [vmem:[#allocation7 + $0x298] sm:$0xff] }
 0x2d3   :  { %1024 = vmatprep.subr.mxu1 %v963_v1  ;;  %v1147_v1 = vld [vmem:[#allocation7 + $0xa8] sm:$0xff]  ;;  %1242 = vmatprep.subr.mxu0 %v1149_v63  ;;  %v1208_v62 = vld [vmem:[#allocation7 + $0x290] sm:$0xff] }
 0x2d4   :  { %1025 = vmatpush1.msra.mxu1 %v962_v2  ;;  %v1146_v2 = vld [vmem:[#allocation7 + $0xa0] sm:$0xff]  ;;  %1243 = vmatpush1.msra.mxu0 %v1148_v0  ;;  %v1207_v63 = vld [vmem:[#allocation7 + $0x288] sm:$0xff] }
 0x2d5   :  { %1026 = vmatprep.subr.mxu1 %v961_v4  ;;  %v1145_v4 = vld [vmem:[#allocation7 + $0x98] sm:$0xff]  ;;  %1244 = vmatprep.subr.mxu0 %v1147_v1  ;;  %v1206_v0 = vld [vmem:[#allocation7 + $0x280] sm:$0xff] }
 0x2d6   :  { %1027 = vmatpush1.msra.mxu1 %v960_v6  ;;  %v1144_v6 = vld [vmem:[#allocation7 + $0x90] sm:$0xff]  ;;  %1245 = vmatpush1.msra.mxu0 %v1146_v2  ;;  %v1205_v1 = vld [vmem:[#allocation7 + $0x278] sm:$0xff] }
 0x2d7   :  { %1028 = vmatprep.subr.mxu1 %v959_v7  ;;  %v1221_v7 = vld [vmem:[#allocation7 + $0x2f8] sm:$0xff]  ;;  %1246 = vmatprep.subr.mxu0 %v1145_v4  ;;  %v1204_v2 = vld [vmem:[#allocation7 + $0x270] sm:$0xff]  ;;  %v1171_v4 = vld [vmem:[#allocation7 + $0x168] sm:$0xff] }
 0x2d8   :  { %1029 = vmatpush1.msra.mxu1 %v958_v8  ;;  %v1143_v8 = vld [vmem:[#allocation7 + $0x88] sm:$0xff]  ;;  %1247 = vmatpush1.msra.mxu0 %v1144_v6 }
 0x2d9   :  { %1030 = vmatprep.subr.mxu1 %v957_v9  ;;  %v1142_v9 = vld [vmem:[#allocation7 + $0x80] sm:$0xff]  ;;  %1248 = vmatprep.subr.mxu0 %v1143_v8  ;;  %v1203_v6 = vld [vmem:[#allocation7 + $0x268] sm:$0xff] }
 0x2da   :  { %1031 = vmatpush1.msra.mxu1 %v956_v10  ;;  %v1141_v10 = vld [vmem:[#allocation7 + $0x78] sm:$0xff]  ;;  %1249 = vmatpush1.msra.mxu0 %v1142_v9  ;;  %v1202_v8 = vld [vmem:[#allocation7 + $0x260] sm:$0xff] }
 0x2db   :  { %1032 = vmatprep.subr.mxu1 %v955_v11  ;;  %v1140_v11 = vld [vmem:[#allocation7 + $0x70] sm:$0xff]  ;;  %1250 = vmatprep.subr.mxu0 %v1141_v10  ;;  %v1169_v9 = vld [vmem:[#allocation7 + $0x158] sm:$0xff] }
 0x2dc   :  { %1033 = vmatpush1.msra.mxu1 %v954_v12  ;;  %v1139_v12 = vld [vmem:[#allocation7 + $0x68] sm:$0xff]  ;;  %1251 = vmatpush1.msra.mxu0 %v1140_v11  ;;  %v1201_v10 = vld [vmem:[#allocation7 + $0x258] sm:$0xff]  ;;  %v1168_v11 = vld [vmem:[#allocation7 + $0x150] sm:$0xff] }
 0x2dd   :  { %1034 = vmatprep.subr.mxu1 %v953_v13  ;;  %v1138_v13 = vld [vmem:[#allocation7 + $0x60] sm:$0xff]  ;;  %1252 = vmatprep.subr.mxu0 %v1139_v12  ;;  %v1200_v12 = vld [vmem:[#allocation7 + $0x250] sm:$0xff] }
 0x2de   :  { %1035 = vmatpush1.msra.mxu1 %v952_v14  ;;  %v1137_v14 = vld [vmem:[#allocation7 + $0x58] sm:$0xff]  ;;  %1253 = vmatpush1.msra.mxu0 %v1138_v13  ;;  %v1167_v13 = vld [vmem:[#allocation7 + $0x148] sm:$0xff] }
 0x2df   :  { %1036 = vmatprep.subr.mxu1 %v951_v15  ;;  %v1136_v15 = vld [vmem:[#allocation7 + $0x50] sm:$0xff]  ;;  %1254 = vmatprep.subr.mxu0 %v1137_v14  ;;  %v1199_v14 = vld [vmem:[#allocation7 + $0x248] sm:$0xff] }
 0x2e0   :  { %1037 = vmatpush1.msra.mxu1 %v950_v16  ;;  %v1135_v16 = vld [vmem:[#allocation7 + $0x48] sm:$0xff]  ;;  %1255 = vmatpush1.msra.mxu0 %v1136_v15  ;;  %v1166_v15 = vld [vmem:[#allocation7 + $0x140] sm:$0xff] }
 0x2e1   :  { %1038 = vmatprep.subr.mxu1 %v949_v17  ;;  %v1134_v17 = vld [vmem:[#allocation7 + $0x40] sm:$0xff]  ;;  %1256 = vmatprep.subr.mxu0 %v1135_v16 }
 0x2e2   :  { %1039 = vmatpush1.msra.mxu1 %v948_v18  ;;  %v1133_v18 = vld [vmem:[#allocation7 + $0x38] sm:$0xff]  ;;  %1257 = vmatpush1.msra.mxu0 %v1134_v17  ;;  %v1198_v16 = vld [vmem:[#allocation7 + $0x240] sm:$0xff] }
 0x2e3   :  { %1040 = vmatprep.subr.mxu1 %v947_v19  ;;  %v1132_v19 = vld [vmem:[#allocation7 + $0x30] sm:$0xff]  ;;  %1258 = vmatprep.subr.mxu0 %v1133_v18  ;;  %v1165_v17 = vld [vmem:[#allocation7 + $0x138] sm:$0xff] }
 0x2e4   :  { %1041 = vmatpush1.msra.mxu1 %v946_v20  ;;  %v1131_v20 = vld [vmem:[#allocation7 + $0x28] sm:$0xff]  ;;  %1259 = vmatpush1.msra.mxu0 %v1132_v19  ;;  %v1197_v18 = vld [vmem:[#allocation7 + $0x238] sm:$0xff]  ;;  %v1164_v19 = vld [vmem:[#allocation7 + $0x130] sm:$0xff] }
 0x2e5   :  { %1042 = vmatprep.subr.mxu1 %v1009_v21  ;;  %v1130_v21 = vld [vmem:[#allocation7 + $0x20] sm:$0xff]  ;;  %1260 = vmatprep.subr.mxu0 %v1131_v20  ;;  %v1196_v20 = vld [vmem:[#allocation7 + $0x230] sm:$0xff] }
 0x2e6   :  { %1043 = vmatpush2.msra.mxu1 %v1008_v22  ;;  %v1129_v22 = vld [vmem:[#allocation7 + $0x18] sm:$0xff]  ;;  %1261 = vmatpush1.msra.mxu0 %v1130_v21  ;;  %v1163_v21 = vld [vmem:[#allocation7 + $0x128] sm:$0xff] }
 0x2e7   :  { %1044 = vmatprep.subr.mxu1 %v1007_v23  ;;  %v1128_v23 = vld [vmem:[#allocation7 + $0x10] sm:$0xff]  ;;  %1262 = vmatprep.subr.mxu0 %v1129_v22  ;;  %v1195_v22 = vld [vmem:[#allocation7 + $0x228] sm:$0xff] }
 0x2e8   :  { %1045 = vmatpush2.msra.mxu1 %v1006_v24  ;;  %v1127_v24 = vld [vmem:[#allocation7 + $0x8] sm:$0xff]  ;;  %1263 = vmatpush1.msra.mxu0 %v1128_v23  ;;  %v1162_v23 = vld [vmem:[#allocation7 + $0x120] sm:$0xff] }
 0x2e9   :  { %1046 = vmatprep.subr.mxu1 %v1005_v25  ;;  %v1126_v25 = vld [vmem:[#allocation7] sm:$0xff]  ;;  %1264 = vmatprep.subr.mxu0 %v1127_v24 }
 0x2ea   :  { %1047 = vmatpush2.msra.mxu1 %v1004_v26  ;;  %v1189_v26 = vld [vmem:[#allocation7 + $0x1f8] sm:$0xff]  ;;  %1265 = vmatpush1.msra.mxu0 %v1126_v25  ;;  %v1194_v24 = vld [vmem:[#allocation7 + $0x220] sm:$0xff] }
 0x2eb   :  { %1048 = vmatprep.subr.mxu1 %v1003_v27  ;;  %v1188_v27 = vld [vmem:[#allocation7 + $0x1f0] sm:$0xff]  ;;  %1266 = vmatprep.subr.mxu0 %v1189_v26  ;;  %v1161_v25 = vld [vmem:[#allocation7 + $0x118] sm:$0xff] }
 0x2ec   :  { %1049 = vmatpush2.msra.mxu1 %v1002_v28  ;;  %v1187_v28 = vld [vmem:[#allocation7 + $0x1e8] sm:$0xff]  ;;  %1267 = vmatpush2.msra.mxu0 %v1188_v27  ;;  %v1193_v26 = vld [vmem:[#allocation7 + $0x218] sm:$0xff]  ;;  %v1160_v27 = vld [vmem:[#allocation7 + $0x110] sm:$0xff] }
 0x2ed   :  { %1050 = vmatprep.subr.mxu1 %v1001_v29  ;;  %v1186_v29 = vld [vmem:[#allocation7 + $0x1e0] sm:$0xff]  ;;  %1268 = vmatprep.subr.mxu0 %v1187_v28  ;;  %v1192_v28 = vld [vmem:[#allocation7 + $0x210] sm:$0xff] }
 0x2ee   :  { %1051 = vmatpush2.msra.mxu1 %v1000_v30  ;;  %v1185_v30 = vld [vmem:[#allocation7 + $0x1d8] sm:$0xff]  ;;  %1269 = vmatpush2.msra.mxu0 %v1186_v29  ;;  %v1159_v29 = vld [vmem:[#allocation7 + $0x108] sm:$0xff] }
 0x2ef   :  { %1052 = vmatprep.subr.mxu1 %v999_v31  ;;  %v1184_v31 = vld [vmem:[#allocation7 + $0x1d0] sm:$0xff]  ;;  %1270 = vmatprep.subr.mxu0 %v1185_v30  ;;  %v1191_v30 = vld [vmem:[#allocation7 + $0x208] sm:$0xff] }
 0x2f0   :  { %1053 = vmatpush2.msra.mxu1 %v998_v32  ;;  %v1183_v32 = vld [vmem:[#allocation7 + $0x1c8] sm:$0xff]  ;;  %1271 = vmatpush2.msra.mxu0 %v1184_v31  ;;  %v1158_v31 = vld [vmem:[#allocation7 + $0x100] sm:$0xff] }
 0x2f1   :  { %1054 = vmatprep.subr.mxu1 %v997_v33  ;;  %v1182_v33 = vld [vmem:[#allocation7 + $0x1c0] sm:$0xff]  ;;  %1272 = vmatprep.subr.mxu0 %v1183_v32 }
 0x2f2   :  { %1055 = vmatpush2.msra.mxu1 %v996_v34  ;;  %v1181_v34 = vld [vmem:[#allocation7 + $0x1b8] sm:$0xff]  ;;  %1273 = vmatpush2.msra.mxu0 %v1182_v33  ;;  %v1190_v32 = vld [vmem:[#allocation7 + $0x200] sm:$0xff] }
 0x2f3   :  { %1056 = vmatprep.subr.mxu1 %v995_v35  ;;  %v1180_v35 = vld [vmem:[#allocation7 + $0x1b0] sm:$0xff]  ;;  %1274 = vmatprep.subr.mxu0 %v1181_v34 }
 0x2f4   :  { %1057 = vmatpush2.msra.mxu1 %v994_v36  ;;  %v1179_v36 = vld [vmem:[#allocation7 + $0x1a8] sm:$0xff]  ;;  %1275 = vmatpush2.msra.mxu0 %v1180_v35 }
 0x2f5   :  { %1058 = vmatprep.subr.mxu1 %v993_v37  ;;  %v1178_v37 = vld [vmem:[#allocation7 + $0x1a0] sm:$0xff]  ;;  %1276 = vmatprep.subr.mxu0 %v1179_v36 }
 0x2f6   :  { %1059 = vmatpush2.msra.mxu1 %v992_v38  ;;  %v1177_v38 = vld [vmem:[#allocation7 + $0x198] sm:$0xff]  ;;  %1277 = vmatpush2.msra.mxu0 %v1178_v37 }
 0x2f7   :  { %1060 = vmatprep.subr.mxu1 %v991_v39  ;;  %v1176_v39 = vld [vmem:[#allocation7 + $0x190] sm:$0xff]  ;;  %1278 = vmatprep.subr.mxu0 %v1177_v38 }
 0x2f8   :  { %1061 = vmatpush2.msra.mxu1 %v990_v40  ;;  %v1175_v40 = vld [vmem:[#allocation7 + $0x188] sm:$0xff]  ;;  %1279 = vmatpush2.msra.mxu0 %v1176_v39  ;;  %v1117_v39 = vpop.permute.xlu1 %1116 }
 0x2f9   :  { %1062 = vmatprep.subr.mxu1 %v989_v41  ;;  %v1174_v41 = vld [vmem:[#allocation7 + $0x180] sm:$0xff]  ;;  %1280 = vmatprep.subr.mxu0 %v1175_v40  ;;  %v1098_v40 = vpop.permute.xlu0 %1097 }
 0x2fa   :  { %1063 = vmatpush2.msra.mxu1 %v988_v43  ;;  %v1173_v43 = vld [vmem:[#allocation7 + $0x178] sm:$0xff]  ;;  %1281 = vmatpush2.msra.mxu0 %v1174_v41 }
 0x2fb   :  { %1064 = vmatprep.subr.mxu1 %v987_v44  ;;  %v1172_v44 = vld [vmem:[#allocation7 + $0x170] sm:$0xff]  ;;  %1282 = vmatprep.subr.mxu0 %v1173_v43 }
 0x2fc   :  { %1065 = vmatpush2.msra.mxu1 %v986_v45  ;;  %1283 = vmatpush2.msra.mxu0 %v1172_v44 }
 0x2fd   :  { %1066 = vmatprep.subr.mxu1 %v985_v47  ;;  %1284 = vmatprep.subr.mxu0 %v1171_v4 }
 0x2fe   :  { %1067 = vmatpush2.msra.mxu1 %v984_v48  ;;  %v1220_v48 = vld [vmem:[#allocation7 + $0x2f0] sm:$0xff] }
 0x2ff   :  { %1068 = vmatprep.subr.mxu1 %v983_v49  ;;  %v1219_v49 = vld [vmem:[#allocation7 + $0x2e8] sm:$0xff] }
 0x300   :  { %1069 = vmatpush2.msra.mxu1 %v982_v50 }
 0x301   :  { %1070 = vmatprep.subr.mxu1 %v981_v51  ;;  %v1218_v51 = vld [vmem:[#allocation7 + $0x2e0] sm:$0xff] }
 0x302   :  { %1071 = vmatpush2.msra.mxu1 %v980_v52  ;;  %v1217_v52 = vld [vmem:[#allocation7 + $0x2d8] sm:$0xff] }
 0x303   :  { %1072 = vmatprep.subr.mxu1 %v979_v53 }
 0x304   :  { %1073 = vmatpush2.msra.mxu1 %v978_v54  ;;  %v1216_v54 = vld [vmem:[#allocation7 + $0x2d0] sm:$0xff] }
 0x305   :  { %1311 = vmatprep.subr.mxu1 %v1221_v7  ;;  %v1170_v7 = vld [vmem:[#allocation7 + $0x160] sm:$0xff] }
 0x306   :  { %1285 = vmatpush2.msra.mxu0 %v1170_v7 }
 0x307   :  { %1286 = vmatprep.subr.mxu0 %v1169_v9 }
 0x308   :  { %1287 = vmatpush2.msra.mxu0 %v1168_v11 }
 0x309   :  { %1288 = vmatprep.subr.mxu0 %v1167_v13 }
 0x30a   :  { %1289 = vmatpush2.msra.mxu0 %v1166_v15 }
 0x30b   :  { %1290 = vmatprep.subr.mxu0 %v1165_v17 }
 0x30c   :  { %1291 = vmatpush2.msra.mxu0 %v1164_v19 }
 0x30d   :  { %1292 = vmatprep.subr.mxu0 %v1163_v21 }
 0x30e   :  { %1293 = vmatpush2.msra.mxu0 %v1162_v23 }
 0x30f   :  { %1294 = vmatprep.subr.mxu0 %v1161_v25 }
 0x310   :  { %1295 = vmatpush2.msra.mxu0 %v1160_v27 }
 0x311   :  { %1296 = vmatprep.subr.mxu0 %v1159_v29 }
 0x312   :  { %1297 = vmatpush2.msra.mxu0 %v1158_v31  ;;  %v1511_v31 = vld [vmem:[#allocation17 + $0xf8] sm:$0xff] }
 0x385   :  { %v935_v45 = vpop.f32.mrf.mxu1 }
 0x387   :  { %v937_v47 = vpop.f32.mrf.mxu1 }
 0x388   :  { %1074 = vmatprep.mubr.f32.mxu1 %v937_v47 }
 0x389   :  { %v941_v50 = vpop.f32.mrf.mxu1  ;;  %1075 = vmatmul.mubr.f32.vlgmr.msra.gmra.mxu1 %v935_v45 }
 0x38a   :  { %1312 = vmatpush1.msra.mxu1 %v1220_v48 }
 0x38b   :  { %v943_v53 = vpop.f32.mrf.mxu1  ;;  %1313 = vmatprep.subr.mxu1 %v1219_v49 }
 0x38c   :  { %1080 = vmatprep.mubr.f32.mxu1 %v943_v53  ;;  %1314 = vmatpush1.msra.mxu1 %v1218_v51  ;;  %v1122_v53 = vpop.permute.xlu1 %1121 }
 0x38d   :  { %1081 = vmatmul.mubr.f32.gmra.mxu1 %v941_v50  ;;  %1315 = vmatprep.subr.mxu1 %v1217_v52 }
 0x38e   :  { %1316 = vmatpush1.msra.mxu1 %v1216_v54  ;;  %1375 = vmatprep.mubr.f32.mxu1 %v4112_v5  ;;  %v1103_v54 = vpop.permute.xlu0 %1102 }
 0x38f   :  { %1317 = vmatprep.subr.mxu1 %v1215_v55 }
 0x390   :  { %1318 = vmatpush1.msra.mxu1 %v1214_v56 }
 0x391   :  { %1319 = vmatprep.subr.mxu1 %v1213_v57  ;;  %v1222_v57 = vld [vmem:[%s4620_s6] sm:$0x3] }
 0x392   :  { %1320 = vmatpush1.msra.mxu1 %v1212_v58  ;;  %v1227_v58 = vrot.slane %v1222_v57, %v4403_v42 }
 0x393   :  { %1321 = vmatprep.subr.mxu1 %v1211_v59  ;;  %v1231_v59 = vrot.slane %v1222_v57, %v4407_v46  ;;  %v1486_v57 = vld [vmem:[#allocation17 + $0x30] sm:$0xff] }
 0x394   :  { %1322 = vmatpush1.msra.mxu1 %v1210_v60 }
 0x395   :  { %1323 = vmatprep.subr.mxu1 %v1209_v61 }
 0x396   :  { %1324 = vmatpush1.msra.mxu1 %v1208_v62 }
 0x397   :  { %1325 = vmatprep.subr.mxu1 %v1207_v63 }
 0x398   :  { %1326 = vmatpush1.msra.mxu1 %v1206_v0 }
 0x399   :  { %1327 = vmatprep.subr.mxu1 %v1205_v1 }
 0x39a   :  { %1328 = vmatpush1.msra.mxu1 %v1204_v2 }
 0x39b   :  { %1329 = vmatprep.subr.mxu1 %v1203_v6 }
 0x39c   :  { %1330 = vmatpush1.msra.mxu1 %v1202_v8 }
 0x39d   :  { %1331 = vmatprep.subr.mxu1 %v1201_v10 }
 0x39e   :  { %1332 = vmatpush1.msra.mxu1 %v1200_v12 }
 0x39f   :  { %1333 = vmatprep.subr.mxu1 %v1199_v14 }
 0x3a0   :  { %1334 = vmatpush1.msra.mxu1 %v1198_v16 }
 0x3a1   :  { %1335 = vmatprep.subr.mxu1 %v1197_v18 }
 0x3a2   :  { %1336 = vmatpush1.msra.mxu1 %v1196_v20 }
 0x3a3   :  { %1337 = vmatprep.subr.mxu1 %v1195_v22 }
 0x3a4   :  { %1338 = vmatpush1.msra.mxu1 %v1194_v24 }
 0x3a5   :  { %1339 = vmatprep.subr.mxu1 %v1193_v26 }
 0x3a6   :  { %1340 = vmatpush1.msra.mxu1 %v1192_v28 }
 0x3a7   :  { %1341 = vmatprep.subr.mxu1 %v1191_v30  ;;  %v1404_v30 = vld [vmem:[#allocation14] sm:$0xff] }
 0x3a8   :  { %1342 = vmatpush1.msra.mxu1 %v1190_v32  ;;  %v1510_v32 = vld [vmem:[#allocation17 + $0xf0] sm:$0xff] }
 0x449   :  { %v1076_v33 = vpop.f32.mrf.mxu1 }
 0x44b   :  { %v1078_v34 = vpop.f32.mrf.mxu1 }
 0x44c   :  { %v1087_v35 = vmax.f32 %v1076_v33, %v1078_v34  ;;  %v1509_v33 = vld [vmem:[#allocation17 + $0xe8] sm:$0xff]  ;;  %v1508_v34 = vld [vmem:[#allocation17 + $0xe0] sm:$0xff] }
 0x44d   :  { %v1082_v36 = vpop.f32.mrf.mxu1 }
 0x44e   :  { %1298 = vmatprep.mubr.f32.mxu0 %v1087_v35  ;;  %v1089_v41 = vrot.slane %v1087_v35, 7  ;;  %v1107_v43 = vrot.slane %v1087_v35, 1  ;;  %v1507_v35 = vld [vmem:[#allocation17 + $0xd8] sm:$0xff] }
 0x44f   :  { %v1084_v37 = vpop.f32.mrf.mxu1 }
 0x450   :  { %v1088_v38 = vmax.f32 %v1082_v36, %v1084_v37  ;;  %v1505_v36 = vld [vmem:[#allocation17 + $0xc8] sm:$0xff]  ;;  %v1504_v37 = vld [vmem:[#allocation17 + $0xc0] sm:$0xff] }
 0x452   :  { %v1090_v44 = vrot.slane %v1088_v38, 7  ;;  %v1108_v45 = vrot.slane %v1088_v38, 1 }
 0x454   :  { %v1092_v47 = vsel %vm471_vm0, %v1090_v44, %v1089_v41  ;;  %v1109_v48 = vsel %vm508_vm1, %v1107_v43, %v1108_v45  ;;  %v1091_v51 = vsel %vm471_vm0, %v1089_v41, %v1090_v44  ;;  %v1110_v52 = vsel %vm508_vm1, %v1108_v45, %v1107_v43  ;;  %v1500_v41 = vld [vmem:[#allocation17 + $0xa0] sm:$0xff]  ;;  %v1499_v43 = vld [vmem:[#allocation17 + $0x98] sm:$0xff]  ;;  %v1498_v44 = vld [vmem:[#allocation17 + $0x90] sm:$0xff] }
 0x455   :  { %v1105_v49 = vmul.f32 %v1098_v40, %v1092_v47  ;;  %v1124_v50 = vmul.f32 %v1117_v39, %v1109_v48  ;;  %v1106_v55 = vmul.f32 %v1103_v54, %v1091_v51  ;;  %v1125_v56 = vmul.f32 %v1122_v53, %v1110_v52  ;;  %v1502_v39 = vld [vmem:[#allocation17 + $0xb0] sm:$0xff]  ;;  %v1501_v40 = vld [vmem:[#allocation17 + $0xa8] sm:$0xff]  ;;  %v1496_v47 = vld [vmem:[#allocation17 + $0x80] sm:$0xff] }
 0x456   :  { %v1497_v45 = vld [vmem:[#allocation17 + $0x88] sm:$0xff]  ;;  %v1495_v48 = vld [vmem:[#allocation17 + $0x78] sm:$0xff]  ;;  %v1492_v51 = vld [vmem:[#allocation17 + $0x60] sm:$0xff] }
 0x457   :  { %1299 = vmatmul.mubr.f32.vlgmr.msra.gmra.mxu0 %v1105_v49  ;;  %1376 = vmatmul.mubr.f32.vlgmr.msra.gmra.mxu1 %v1124_v50  ;;  %v1494_v49 = vld [vmem:[#allocation17 + $0x70] sm:$0xff]  ;;  %v1493_v50 = vld [vmem:[#allocation17 + $0x68] sm:$0xff]  ;;  %v1491_v52 = vld [vmem:[#allocation17 + $0x58] sm:$0xff] }
 0x458   :  { %1304 = vmatprep.mubr.f32.mxu0 %v1088_v38  ;;  %1381 = vmatprep.mubr.f32.mxu1 %v4112_v5  ;;  %v1503_v38 = vld [vmem:[#allocation17 + $0xb8] sm:$0xff]  ;;  %v1490_v53 = vld [vmem:[#allocation17 + $0x50] sm:$0xff]  ;;  %v1489_v54 = vld [vmem:[#allocation17 + $0x48] sm:$0xff] }
 0x45b   :  { %1305 = vmatmul.mubr.f32.gmra.mxu0 %v1106_v55  ;;  %1382 = vmatmul.mubr.f32.gmra.mxu1 %v1125_v56  ;;  %v1488_v55 = vld [vmem:[#allocation17 + $0x40] sm:$0xff]  ;;  %v1487_v56 = vld [vmem:[#allocation17 + $0x38] sm:$0xff] }
 0x45c   :  { %1473 = vmatprep.mubr.f32.mxu0 %v4112_v5 }
 0x517   :  { %v1300_v60 = vpop.f32.mrf.mxu0  ;;  %v1377_v61 = vpop.f32.mrf.mxu1 }
 0x518   :  { %v1301_v62 = vadd.f32 %v1300_v60, %v1227_v58  ;;  %v1483_v60 = vld [vmem:[#allocation17 + $0x18] sm:$0xff] }
 0x519   :  { %v1302_v63 = vpop.f32.mrf.mxu0  ;;  %v1379_v0 = vpop.f32.mrf.mxu1 }
 0x51a   :  { %v1303_v1 = vadd.f32 %v1302_v63, %v1231_v59  ;;  %v1378_v2 = vadd.f32 %v1377_v61, %v1301_v62  ;;  %v1482_v61 = vld [vmem:[#allocation17 + $0x10] sm:$0xff]  ;;  %v1481_v62 = vld [vmem:[#allocation17 + $0x8] sm:$0xff]  ;;  %v1480_v63 = vld [vmem:[#allocation17] sm:$0xff] }
 0x51b   :  { %v1306_v4 = vpop.f32.mrf.mxu0  ;;  %v1383_v6 = vpop.f32.mrf.mxu1 }
 0x51c   :  { %v1380_v7 = vadd.f32 %v1379_v0, %v1303_v1  ;;  %v1307_v8 = vadd.f32 %v1306_v4, %v1227_v58  ;;  %v1388_v12 = vmax.f32 %v1378_v2, 0.0  ;;  %v1485_v58 = vld [vmem:[#allocation17 + $0x28] sm:$0xff]  ;;  %v1543_v0 = vld [vmem:[#allocation17 + $0x1f8] sm:$0xff]  ;;  %v1542_v1 = vld [vmem:[#allocation17 + $0x1f0] sm:$0xff] }
 0x51d   :  { %v1308_v9 = vpop.f32.mrf.mxu0  ;;  %v1385_v13 = vpop.f32.mrf.mxu1  ;;  %v1541_v2 = vld [vmem:[#allocation17 + $0x1e8] sm:$0xff]  ;;  %v1540_v4 = vld [vmem:[#allocation17 + $0x1e0] sm:$0xff] }
 0x51e   :  { %v1384_v10 = vadd.f32 %v1383_v6, %v1307_v8  ;;  %v1309_v11 = vadd.f32 %v1308_v9, %v1231_v59  ;;  %v1389_v14 = vmax.f32 %v1380_v7, 0.0  ;;  %v1392_v19 = vrot.slane %v1388_v12, 1  ;;  %v1484_v59 = vld [vmem:[#allocation17 + $0x20] sm:$0xff]  ;;  %v1539_v6 = vld [vmem:[#allocation17 + $0x1d8] sm:$0xff]  ;;  %v1538_v7 = vld [vmem:[#allocation17 + $0x1d0] sm:$0xff] }
 0x51f   :  { %v1537_v8 = vld [vmem:[#allocation17 + $0x1c8] sm:$0xff]  ;;  %v1536_v9 = vld [vmem:[#allocation17 + $0x1c0] sm:$0xff] }
 0x520   :  { %v1390_v15 = vmax.f32 %v1384_v10, 0.0  ;;  %v1386_v16 = vadd.f32 %v1385_v13, %v1309_v11  ;;  %v1393_v20 = vrot.slane %v1389_v14, 1  ;;  %v1535_v10 = vld [vmem:[#allocation17 + $0x1b8] sm:$0xff]  ;;  %v1534_v11 = vld [vmem:[#allocation17 + $0x1b0] sm:$0xff]  ;;  %v1532_v13 = vld [vmem:[#allocation17 + $0x1a0] sm:$0xff] }
 0x522   :  { %v1394_v17 = vrot.slane %v1390_v15, 1  ;;  %v1391_v18 = vmax.f32 %v1386_v16, 0.0  ;;  %v1529_v16 = vld [vmem:[#allocation17 + $0x188] sm:$0xff] }
 0x524   :  { %v1395_v21 = vrot.slane %v1391_v18, 1  ;;  %v1398_v22 = vsel %vm508_vm1, %v1394_v17, %v1392_v19  ;;  %v1396_v25 = vsel %vm508_vm1, %v1392_v19, %v1394_v17  ;;  %v1528_v17 = vld [vmem:[#allocation17 + $0x180] sm:$0xff]  ;;  %v1526_v19 = vld [vmem:[#allocation17 + $0x170] sm:$0xff] }
 0x525   :  { %v1402_v27 = vmax.f32 %v1390_v15, %v1398_v22  ;;  %v1400_v29 = vmax.f32 %v1388_v12, %v1396_v25  ;;  %v1533_v12 = vld [vmem:[#allocation17 + $0x1a8] sm:$0xff]  ;;  %v1530_v15 = vld [vmem:[#allocation17 + $0x190] sm:$0xff]  ;;  %v1523_v22 = vld [vmem:[#allocation17 + $0x158] sm:$0xff] }
 0x526   :  { %v1399_v23 = vsel %vm508_vm1, %v1395_v21, %v1393_v20  ;;  %v1397_v24 = vsel %vm508_vm1, %v1393_v20, %v1395_v21  ;;  %v1525_v20 = vld [vmem:[#allocation17 + $0x168] sm:$0xff]  ;;  %v1524_v21 = vld [vmem:[#allocation17 + $0x160] sm:$0xff] }
 0x527   :  { %v1403_v26 = vmax.f32 %v1391_v18, %v1399_v23  ;;  %v1401_v28 = vmax.f32 %v1389_v14, %v1397_v24  ;;  %v1531_v14 = vld [vmem:[#allocation17 + $0x198] sm:$0xff]  ;;  %v1522_v23 = vld [vmem:[#allocation17 + $0x150] sm:$0xff]  ;;  %v1521_v24 = vld [vmem:[#allocation17 + $0x148] sm:$0xff] }
 0x528   :  { %v1527_v18 = vld [vmem:[#allocation17 + $0x178] sm:$0xff]  ;;  %v1520_v25 = vld [vmem:[#allocation17 + $0x140] sm:$0xff] }
 0x529   :  { %1437 = vmatprep.subr.mxu0 %v1403_v26  ;;  %v1519_v26 = vld [vmem:[#allocation17 + $0x138] sm:$0xff] }
 0x52a   :  { %1438 = vmatpush1.msra.mxu0 %v1402_v27  ;;  %v1518_v27 = vld [vmem:[#allocation17 + $0x130] sm:$0xff] }
 0x52b   :  { %1439 = vmatprep.subr.mxu0 %v1401_v28  ;;  %v1517_v28 = vld [vmem:[#allocation17 + $0x128] sm:$0xff] }
 0x52c   :  { %1440 = vmatpush1.msra.mxu0 %v1400_v29  ;;  %v1516_v29 = vld [vmem:[#allocation17 + $0x120] sm:$0xff] }
 0x52d   :  { %3202 = vmatmul.mubr.msk.f32.vlgmr.msra.gmra.mxu0 %vm1405_vm3, %v1404_v30  ;;  %1544 = vmatprep.subr.mxu0 %v1511_v31  ;;  %v1515_v30 = vld [vmem:[#allocation17 + $0x118] sm:$0xff]  ;;  %v1514_v31 = vld [vmem:[#allocation17 + $0x110] sm:$0xff] }
 0x52e   :  { %1545 = vmatpush1.msra.mxu0 %v1510_v32  ;;  %v1513_v32 = vld [vmem:[#allocation17 + $0x108] sm:$0xff] }
 0x52f   :  { %1546 = vmatprep.subr.mxu0 %v1509_v33  ;;  %v1512_v33 = vld [vmem:[#allocation17 + $0x100] sm:$0xff] }
 0x530   :  { %1547 = vmatpush1.msra.mxu0 %v1508_v34  ;;  %v1664_v34 = vld [vmem:[#allocation8 + $0xf8] sm:$0xff] }
 0x531   :  { %1548 = vmatprep.subr.mxu0 %v1507_v35  ;;  %v1663_v35 = vld [vmem:[#allocation8 + $0xf0] sm:$0xff]  ;;  %1741 = vmatprep.subr.mxu1 %v1664_v34  ;;  %v1724_v34 = vld [vmem:[#allocation8 + $0x2d8] sm:$0xff] }
 0x532   :  { %1549 = vmatpush1.msra.mxu0 %v1506_v3  ;;  %v1662_v3 = vld [vmem:[#allocation8 + $0xe8] sm:$0xff]  ;;  %1742 = vmatpush1.msra.mxu1 %v1663_v35  ;;  %v1723_v35 = vld [vmem:[#allocation8 + $0x2d0] sm:$0xff] }
 0x533   :  { %1550 = vmatprep.subr.mxu0 %v1505_v36  ;;  %v1661_v36 = vld [vmem:[#allocation8 + $0xe0] sm:$0xff]  ;;  %1743 = vmatprep.subr.mxu1 %v1662_v3  ;;  %v1722_v3 = vld [vmem:[#allocation8 + $0x2c8] sm:$0xff] }
 0x534   :  { %1551 = vmatpush1.msra.mxu0 %v1504_v37  ;;  %v1660_v37 = vld [vmem:[#allocation8 + $0xd8] sm:$0xff]  ;;  %1744 = vmatpush1.msra.mxu1 %v1661_v36  ;;  %v1721_v36 = vld [vmem:[#allocation8 + $0x2c0] sm:$0xff] }
 0x535   :  { %1552 = vmatprep.subr.mxu0 %v1503_v38  ;;  %v1659_v38 = vld [vmem:[#allocation8 + $0xd0] sm:$0xff]  ;;  %1745 = vmatprep.subr.mxu1 %v1660_v37  ;;  %v1720_v37 = vld [vmem:[#allocation8 + $0x2b8] sm:$0xff] }
 0x536   :  { %1553 = vmatpush1.msra.mxu0 %v1502_v39  ;;  %v1658_v39 = vld [vmem:[#allocation8 + $0xc8] sm:$0xff]  ;;  %1746 = vmatpush1.msra.mxu1 %v1659_v38  ;;  %v1719_v38 = vld [vmem:[#allocation8 + $0x2b0] sm:$0xff] }
 0x537   :  { %1554 = vmatprep.subr.mxu0 %v1501_v40  ;;  %v1657_v40 = vld [vmem:[#allocation8 + $0xc0] sm:$0xff]  ;;  %1747 = vmatprep.subr.mxu1 %v1658_v39  ;;  %v1718_v39 = vld [vmem:[#allocation8 + $0x2a8] sm:$0xff] }
 0x538   :  { %1555 = vmatpush1.msra.mxu0 %v1500_v41  ;;  %v1656_v41 = vld [vmem:[#allocation8 + $0xb8] sm:$0xff]  ;;  %1748 = vmatpush1.msra.mxu1 %v1657_v40  ;;  %v1717_v40 = vld [vmem:[#allocation8 + $0x2a0] sm:$0xff] }
 0x539   :  { %1556 = vmatprep.subr.mxu0 %v1499_v43  ;;  %v1655_v43 = vld [vmem:[#allocation8 + $0xb0] sm:$0xff]  ;;  %1749 = vmatprep.subr.mxu1 %v1656_v41  ;;  %v1716_v41 = vld [vmem:[#allocation8 + $0x298] sm:$0xff] }
 0x53a   :  { %1557 = vmatpush1.msra.mxu0 %v1498_v44  ;;  %v1654_v44 = vld [vmem:[#allocation8 + $0xa8] sm:$0xff]  ;;  %1750 = vmatpush1.msra.mxu1 %v1655_v43  ;;  %v1715_v43 = vld [vmem:[#allocation8 + $0x290] sm:$0xff] }
 0x53b   :  { %1558 = vmatprep.subr.mxu0 %v1497_v45  ;;  %v1653_v45 = vld [vmem:[#allocation8 + $0xa0] sm:$0xff]  ;;  %1751 = vmatprep.subr.mxu1 %v1654_v44  ;;  %v1714_v44 = vld [vmem:[#allocation8 + $0x288] sm:$0xff] }
 0x53c   :  { %1559 = vmatpush1.msra.mxu0 %v1496_v47  ;;  %v1652_v47 = vld [vmem:[#allocation8 + $0x98] sm:$0xff]  ;;  %1752 = vmatpush1.msra.mxu1 %v1653_v45  ;;  %v1713_v45 = vld [vmem:[#allocation8 + $0x280] sm:$0xff] }
 0x53d   :  { %1560 = vmatprep.subr.mxu0 %v1495_v48  ;;  %v1651_v48 = vld [vmem:[#allocation8 + $0x90] sm:$0xff]  ;;  %1753 = vmatprep.subr.mxu1 %v1652_v47  ;;  %v1712_v47 = vld [vmem:[#allocation8 + $0x278] sm:$0xff] }
 0x53e   :  { %1561 = vmatpush1.msra.mxu0 %v1494_v49  ;;  %v1728_v49 = vld [vmem:[#allocation8 + $0x2f8] sm:$0xff]  ;;  %1754 = vmatpush1.msra.mxu1 %v1651_v48  ;;  %v1711_v48 = vld [vmem:[#allocation8 + $0x270] sm:$0xff] }
 0x53f   :  { %1562 = vmatprep.subr.mxu0 %v1493_v50  ;;  %v1650_v50 = vld [vmem:[#allocation8 + $0x88] sm:$0xff] }
 0x540   :  { %1563 = vmatpush1.msra.mxu0 %v1492_v51  ;;  %v1649_v51 = vld [vmem:[#allocation8 + $0x80] sm:$0xff]  ;;  %1755 = vmatprep.subr.mxu1 %v1650_v50 }
 0x541   :  { %1564 = vmatprep.subr.mxu0 %v1491_v52  ;;  %v1648_v52 = vld [vmem:[#allocation8 + $0x78] sm:$0xff]  ;;  %1756 = vmatpush1.msra.mxu1 %v1649_v51  ;;  %v1709_v50 = vld [vmem:[#allocation8 + $0x260] sm:$0xff] }
 0x542   :  { %1565 = vmatpush1.msra.mxu0 %v1490_v53  ;;  %v1647_v53 = vld [vmem:[#allocation8 + $0x70] sm:$0xff]  ;;  %1757 = vmatprep.subr.mxu1 %v1648_v52  ;;  %v1708_v51 = vld [vmem:[#allocation8 + $0x258] sm:$0xff] }
 0x543   :  { %1566 = vmatprep.subr.mxu0 %v1489_v54  ;;  %v1646_v54 = vld [vmem:[#allocation8 + $0x68] sm:$0xff]  ;;  %1758 = vmatpush1.msra.mxu1 %v1647_v53  ;;  %v1707_v52 = vld [vmem:[#allocation8 + $0x250] sm:$0xff] }
 0x544   :  { %1567 = vmatpush1.msra.mxu0 %v1488_v55  ;;  %v1645_v55 = vld [vmem:[#allocation8 + $0x60] sm:$0xff]  ;;  %1759 = vmatprep.subr.mxu1 %v1646_v54  ;;  %v1706_v53 = vld [vmem:[#allocation8 + $0x248] sm:$0xff] }
 0x545   :  { %1568 = vmatprep.subr.mxu0 %v1487_v56  ;;  %v1644_v56 = vld [vmem:[#allocation8 + $0x58] sm:$0xff]  ;;  %1760 = vmatpush1.msra.mxu1 %v1645_v55  ;;  %v1673_v54 = vld [vmem:[#allocation8 + $0x140] sm:$0xff] }
 0x546   :  { %1569 = vmatpush1.msra.mxu0 %v1486_v57  ;;  %v1643_v57 = vld [vmem:[#allocation8 + $0x50] sm:$0xff]  ;;  %1761 = vmatprep.subr.mxu1 %v1644_v56  ;;  %v1705_v55 = vld [vmem:[#allocation8 + $0x240] sm:$0xff]  ;;  %v1672_v56 = vld [vmem:[#allocation8 + $0x138] sm:$0xff] }
 0x547   :  { %1570 = vmatprep.subr.mxu0 %v1485_v58  ;;  %v1642_v58 = vld [vmem:[#allocation8 + $0x48] sm:$0xff]  ;;  %1762 = vmatpush1.msra.mxu1 %v1643_v57  ;;  %v1704_v57 = vld [vmem:[#allocation8 + $0x238] sm:$0xff] }
 0x548   :  { %1571 = vmatpush1.msra.mxu0 %v1484_v59  ;;  %v1641_v59 = vld [vmem:[#allocation8 + $0x40] sm:$0xff]  ;;  %1763 = vmatprep.subr.mxu1 %v1642_v58  ;;  %v1671_v58 = vld [vmem:[#allocation8 + $0x130] sm:$0xff] }
 0x549   :  { %1572 = vmatprep.subr.mxu0 %v1483_v60  ;;  %v1640_v60 = vld [vmem:[#allocation8 + $0x38] sm:$0xff]  ;;  %1764 = vmatpush1.msra.mxu1 %v1641_v59  ;;  %v1703_v59 = vld [vmem:[#allocation8 + $0x230] sm:$0xff] }
 0x54a   :  { %1573 = vmatpush1.msra.mxu0 %v1482_v61  ;;  %v1639_v61 = vld [vmem:[#allocation8 + $0x30] sm:$0xff]  ;;  %1765 = vmatprep.subr.mxu1 %v1640_v60  ;;  %v1670_v60 = vld [vmem:[#allocation8 + $0x128] sm:$0xff] }
 0x54b   :  { %1574 = vmatprep.subr.mxu0 %v1481_v62  ;;  %v1638_v62 = vld [vmem:[#allocation8 + $0x28] sm:$0xff]  ;;  %1766 = vmatpush1.msra.mxu1 %v1639_v61 }
 0x54c   :  { %1575 = vmatpush1.msra.mxu0 %v1480_v63  ;;  %v1637_v63 = vld [vmem:[#allocation8 + $0x20] sm:$0xff]  ;;  %1767 = vmatprep.subr.mxu1 %v1638_v62  ;;  %v1702_v61 = vld [vmem:[#allocation8 + $0x228] sm:$0xff] }
 0x54d   :  { %1576 = vmatprep.subr.mxu0 %v1543_v0  ;;  %v1636_v0 = vld [vmem:[#allocation8 + $0x18] sm:$0xff]  ;;  %1768 = vmatpush1.msra.mxu1 %v1637_v63  ;;  %v1669_v62 = vld [vmem:[#allocation8 + $0x120] sm:$0xff] }
 0x54e   :  { %1577 = vmatpush2.msra.mxu0 %v1542_v1  ;;  %v1635_v1 = vld [vmem:[#allocation8 + $0x10] sm:$0xff]  ;;  %1769 = vmatprep.subr.mxu1 %v1636_v0  ;;  %v1701_v63 = vld [vmem:[#allocation8 + $0x220] sm:$0xff]  ;;  %v1668_v0 = vld [vmem:[#allocation8 + $0x118] sm:$0xff] }
 0x54f   :  { %1578 = vmatprep.subr.mxu0 %v1541_v2  ;;  %v1634_v2 = vld [vmem:[#allocation8 + $0x8] sm:$0xff]  ;;  %1770 = vmatpush1.msra.mxu1 %v1635_v1  ;;  %v1700_v1 = vld [vmem:[#allocation8 + $0x218] sm:$0xff] }
 0x550   :  { %1579 = vmatpush2.msra.mxu0 %v1540_v4  ;;  %v1633_v4 = vld [vmem:[#allocation8] sm:$0xff]  ;;  %1771 = vmatprep.subr.mxu1 %v1634_v2  ;;  %v1667_v2 = vld [vmem:[#allocation8 + $0x110] sm:$0xff] }
 0x551   :  { %1580 = vmatprep.subr.mxu0 %v1539_v6  ;;  %v1696_v6 = vld [vmem:[#allocation8 + $0x1f8] sm:$0xff]  ;;  %1772 = vmatpush1.msra.mxu1 %v1633_v4  ;;  %v1699_v4 = vld [vmem:[#allocation8 + $0x210] sm:$0xff] }
 0x552   :  { %1581 = vmatpush2.msra.mxu0 %v1538_v7  ;;  %v1695_v7 = vld [vmem:[#allocation8 + $0x1f0] sm:$0xff]  ;;  %1773 = vmatprep.subr.mxu1 %v1696_v6  ;;  %v1666_v6 = vld [vmem:[#allocation8 + $0x108] sm:$0xff] }
 0x553   :  { %1582 = vmatprep.subr.mxu0 %v1537_v8  ;;  %v1694_v8 = vld [vmem:[#allocation8 + $0x1e8] sm:$0xff]  ;;  %1774 = vmatpush2.msra.mxu1 %v1695_v7 }
 0x554   :  { %1583 = vmatpush2.msra.mxu0 %v1536_v9  ;;  %v1693_v9 = vld [vmem:[#allocation8 + $0x1e0] sm:$0xff]  ;;  %1775 = vmatprep.subr.mxu1 %v1694_v8  ;;  %v1698_v7 = vld [vmem:[#allocation8 + $0x208] sm:$0xff] }
 0x555   :  { %1584 = vmatprep.subr.mxu0 %v1535_v10  ;;  %v1692_v10 = vld [vmem:[#allocation8 + $0x1d8] sm:$0xff]  ;;  %1776 = vmatpush2.msra.mxu1 %v1693_v9  ;;  %v1665_v8 = vld [vmem:[#allocation8 + $0x100] sm:$0xff] }
 0x556   :  { %1585 = vmatpush2.msra.mxu0 %v1534_v11  ;;  %v1691_v11 = vld [vmem:[#allocation8 + $0x1d0] sm:$0xff]  ;;  %1777 = vmatprep.subr.mxu1 %v1692_v10  ;;  %v1697_v9 = vld [vmem:[#allocation8 + $0x200] sm:$0xff] }
 0x557   :  { %1586 = vmatprep.subr.mxu0 %v1533_v12  ;;  %v1690_v12 = vld [vmem:[#allocation8 + $0x1c8] sm:$0xff]  ;;  %1778 = vmatpush2.msra.mxu1 %v1691_v11 }
 0x558   :  { %1587 = vmatpush2.msra.mxu0 %v1532_v13  ;;  %v1689_v13 = vld [vmem:[#allocation8 + $0x1c0] sm:$0xff]  ;;  %1779 = vmatprep.subr.mxu1 %v1690_v12 }
 0x559   :  { %1588 = vmatprep.subr.mxu0 %v1531_v14  ;;  %v1688_v14 = vld [vmem:[#allocation8 + $0x1b8] sm:$0xff]  ;;  %1780 = vmatpush2.msra.mxu1 %v1689_v13 }
 0x55a   :  { %1589 = vmatpush2.msra.mxu0 %v1530_v15  ;;  %v1687_v15 = vld [vmem:[#allocation8 + $0x1b0] sm:$0xff]  ;;  %1781 = vmatprep.subr.mxu1 %v1688_v14 }
 0x55b   :  { %1590 = vmatprep.subr.mxu0 %v1529_v16  ;;  %v1686_v16 = vld [vmem:[#allocation8 + $0x1a8] sm:$0xff]  ;;  %1782 = vmatpush2.msra.mxu1 %v1687_v15  ;;  %v1630_v15 = vpop.permute.xlu1 %1629 }
 0x55c   :  { %1591 = vmatpush2.msra.mxu0 %v1528_v17  ;;  %v1685_v17 = vld [vmem:[#allocation8 + $0x1a0] sm:$0xff]  ;;  %1783 = vmatprep.subr.mxu1 %v1686_v16  ;;  %v1621_v16 = vpop.permute.xlu0 %1620 }
 0x55d   :  { %1592 = vmatprep.subr.mxu0 %v1527_v18  ;;  %v1684_v18 = vld [vmem:[#allocation8 + $0x198] sm:$0xff]  ;;  %1784 = vmatpush2.msra.mxu1 %v1685_v17 }
 0x55e   :  { %1593 = vmatpush2.msra.mxu0 %v1526_v19  ;;  %v1683_v19 = vld [vmem:[#allocation8 + $0x190] sm:$0xff]  ;;  %1785 = vmatprep.subr.mxu1 %v1684_v18 }
 0x55f   :  { %1594 = vmatprep.subr.mxu0 %v1525_v20  ;;  %v1682_v20 = vld [vmem:[#allocation8 + $0x188] sm:$0xff]  ;;  %1786 = vmatpush2.msra.mxu1 %v1683_v19  ;;  %v1729_v19 = vld [vmem:[%s4621_s23] sm:$0x3] }
 0x560   :  { %1595 = vmatpush2.msra.mxu0 %v1524_v21  ;;  %v1681_v21 = vld [vmem:[#allocation8 + $0x180] sm:$0xff]  ;;  %1787 = vmatprep.subr.mxu1 %v1682_v20  ;;  %v1734_v20 = vrot.slane %v1729_v19, %v4403_v42  ;;  %v1995_v42 = vld [vmem:[#allocation19 + $0xf0] sm:$0xff] }
 0x561   :  { %1596 = vmatprep.subr.mxu0 %v1523_v22  ;;  %v1680_v22 = vld [vmem:[#allocation8 + $0x178] sm:$0xff]  ;;  %1788 = vmatpush2.msra.mxu1 %v1681_v21  ;;  %v1738_v21 = vrot.slane %v1729_v19, %v4407_v46  ;;  %v1994_v46 = vld [vmem:[#allocation19 + $0xe8] sm:$0xff]  ;;  %v2015_v19 = vld [vmem:[#allocation19 + $0x190] sm:$0xff] }
 0x562   :  { %1597 = vmatpush2.msra.mxu0 %v1522_v23  ;;  %v1679_v23 = vld [vmem:[#allocation8 + $0x170] sm:$0xff]  ;;  %1789 = vmatprep.subr.mxu1 %v1680_v22 }
 0x563   :  { %1598 = vmatprep.subr.mxu0 %v1521_v24  ;;  %v1678_v24 = vld [vmem:[#allocation8 + $0x168] sm:$0xff]  ;;  %1790 = vmatpush2.msra.mxu1 %v1679_v23 }
 0x564   :  { %1599 = vmatpush2.msra.mxu0 %v1520_v25  ;;  %v1677_v25 = vld [vmem:[#allocation8 + $0x160] sm:$0xff]  ;;  %1791 = vmatprep.subr.mxu1 %v1678_v24 }
 0x565   :  { %1600 = vmatprep.subr.mxu0 %v1519_v26  ;;  %v1676_v26 = vld [vmem:[#allocation8 + $0x158] sm:$0xff]  ;;  %1792 = vmatpush2.msra.mxu1 %v1677_v25 }
 0x566   :  { %1601 = vmatpush2.msra.mxu0 %v1518_v27  ;;  %v1675_v27 = vld [vmem:[#allocation8 + $0x150] sm:$0xff]  ;;  %1793 = vmatprep.subr.mxu1 %v1676_v26 }
 0x567   :  { %1602 = vmatprep.subr.mxu0 %v1517_v28  ;;  %v1674_v28 = vld [vmem:[#allocation8 + $0x148] sm:$0xff]  ;;  %1794 = vmatpush2.msra.mxu1 %v1675_v27 }
 0x568   :  { %1603 = vmatpush2.msra.mxu0 %v1516_v29  ;;  %1795 = vmatprep.subr.mxu1 %v1674_v28 }
 0x569   :  { %1604 = vmatprep.subr.mxu0 %v1515_v30  ;;  %1796 = vmatpush2.msra.mxu1 %v1673_v54  ;;  %v1978_v54 = vld [vmem:[#allocation19 + $0x68] sm:$0xff] }
 0x56a   :  { %1605 = vmatpush2.msra.mxu0 %v1514_v31  ;;  %v1727_v31 = vld [vmem:[#allocation8 + $0x2f0] sm:$0xff]  ;;  %1797 = vmatprep.subr.mxu1 %v1672_v56  ;;  %v1976_v56 = vld [vmem:[#allocation19 + $0x58] sm:$0xff] }
 0x56b   :  { %1606 = vmatprep.subr.mxu0 %v1513_v32  ;;  %v1726_v32 = vld [vmem:[#allocation8 + $0x2e8] sm:$0xff]  ;;  %1798 = vmatpush2.msra.mxu1 %v1671_v58 }
 0x56c   :  { %1607 = vmatpush2.msra.mxu0 %v1512_v33  ;;  %v1725_v33 = vld [vmem:[#allocation8 + $0x2e0] sm:$0xff]  ;;  %1799 = vmatprep.subr.mxu1 %v1670_v60  ;;  %v1974_v58 = vld [vmem:[#allocation19 + $0x48] sm:$0xff]  ;;  %v1972_v60 = vld [vmem:[#allocation19 + $0x38] sm:$0xff] }
 0x56d   :  { %1812 = vmatprep.subr.mxu0 %v1728_v49  ;;  %v1710_v49 = vld [vmem:[#allocation8 + $0x268] sm:$0xff]  ;;  %1800 = vmatpush2.msra.mxu1 %v1669_v62 }
 0x56e   :  { %1801 = vmatprep.subr.mxu1 %v1668_v0  ;;  %v1970_v62 = vld [vmem:[#allocation19 + $0x28] sm:$0xff]  ;;  %v1968_v0 = vld [vmem:[#allocation19 + $0x18] sm:$0xff] }
 0x56f   :  { %1802 = vmatpush2.msra.mxu1 %v1667_v2  ;;  %v1966_v2 = vld [vmem:[#allocation19 + $0x8] sm:$0xff] }
 0x570   :  { %1803 = vmatprep.subr.mxu1 %v1666_v6  ;;  %v2028_v6 = vld [vmem:[#allocation19 + $0x1f8] sm:$0xff] }
 0x571   :  { %1804 = vmatpush2.msra.mxu1 %v1665_v8  ;;  %v2026_v8 = vld [vmem:[#allocation19 + $0x1e8] sm:$0xff] }
 0x5ed   :  { %v1475_v29 = vpop.f32.mrf.mxu0 }
 0x5ef   :  { %v1477_v30 = vpop.f32.mrf.mxu0 }
 0x5f0   :  { %1608 = vmatprep.mubr.f32.mxu0 %v1477_v30 }
 0x5f1   :  { %1609 = vmatmul.mubr.f32.vlgmr.msra.gmra.mxu0 %v1475_v29 }
 0x5f2   :  { %1813 = vmatpush1.msra.mxu0 %v1727_v31  ;;  %1876 = vmatprep.mubr.f32.mxu0 %v4112_v5 }
 0x5f3   :  { %1814 = vmatprep.subr.mxu0 %v1726_v32 }
 0x5f4   :  { %1815 = vmatpush1.msra.mxu0 %v1725_v33 }
 0x5f5   :  { %1816 = vmatprep.subr.mxu0 %v1724_v34 }
 0x5f6   :  { %1817 = vmatpush1.msra.mxu0 %v1723_v35 }
 0x5f7   :  { %1818 = vmatprep.subr.mxu0 %v1722_v3  ;;  %v1889_v3 = vld [vmem:[#allocation16] sm:$0xff] }
 0x5f8   :  { %1819 = vmatpush1.msra.mxu0 %v1721_v36  ;;  %v1996_v36 = vld [vmem:[#allocation19 + $0xf8] sm:$0xff] }
 0x5f9   :  { %1820 = vmatprep.subr.mxu0 %v1720_v37  ;;  %v1993_v37 = vld [vmem:[#allocation19 + $0xe0] sm:$0xff] }
 0x5fa   :  { %1821 = vmatpush1.msra.mxu0 %v1719_v38  ;;  %v1992_v38 = vld [vmem:[#allocation19 + $0xd8] sm:$0xff] }
 0x5fb   :  { %1822 = vmatprep.subr.mxu0 %v1718_v39  ;;  %v1991_v39 = vld [vmem:[#allocation19 + $0xd0] sm:$0xff] }
 0x5fc   :  { %1823 = vmatpush1.msra.mxu0 %v1717_v40  ;;  %v1990_v40 = vld [vmem:[#allocation19 + $0xc8] sm:$0xff] }
 0x5fd   :  { %1824 = vmatprep.subr.mxu0 %v1716_v41  ;;  %v1989_v41 = vld [vmem:[#allocation19 + $0xc0] sm:$0xff] }
 0x5fe   :  { %1825 = vmatpush1.msra.mxu0 %v1715_v43  ;;  %v1988_v43 = vld [vmem:[#allocation19 + $0xb8] sm:$0xff] }
 0x5ff   :  { %1826 = vmatprep.subr.mxu0 %v1714_v44  ;;  %v1987_v44 = vld [vmem:[#allocation19 + $0xb0] sm:$0xff] }
 0x600   :  { %1827 = vmatpush1.msra.mxu0 %v1713_v45  ;;  %v1986_v45 = vld [vmem:[#allocation19 + $0xa8] sm:$0xff] }
 0x601   :  { %1828 = vmatprep.subr.mxu0 %v1712_v47  ;;  %v1985_v47 = vld [vmem:[#allocation19 + $0xa0] sm:$0xff] }
 0x602   :  { %1829 = vmatpush1.msra.mxu0 %v1711_v48  ;;  %v1984_v48 = vld [vmem:[#allocation19 + $0x98] sm:$0xff] }
 0x603   :  { %1830 = vmatprep.subr.mxu0 %v1710_v49  ;;  %v1983_v49 = vld [vmem:[#allocation19 + $0x90] sm:$0xff] }
 0x604   :  { %1831 = vmatpush1.msra.mxu0 %v1709_v50  ;;  %v1982_v50 = vld [vmem:[#allocation19 + $0x88] sm:$0xff] }
 0x605   :  { %1832 = vmatprep.subr.mxu0 %v1708_v51  ;;  %v1981_v51 = vld [vmem:[#allocation19 + $0x80] sm:$0xff] }
 0x606   :  { %1833 = vmatpush1.msra.mxu0 %v1707_v52  ;;  %v1980_v52 = vld [vmem:[#allocation19 + $0x78] sm:$0xff] }
 0x607   :  { %1834 = vmatprep.subr.mxu0 %v1706_v53  ;;  %v1979_v53 = vld [vmem:[#allocation19 + $0x70] sm:$0xff] }
 0x608   :  { %1835 = vmatpush1.msra.mxu0 %v1705_v55  ;;  %v1977_v55 = vld [vmem:[#allocation19 + $0x60] sm:$0xff] }
 0x609   :  { %1836 = vmatprep.subr.mxu0 %v1704_v57  ;;  %v1975_v57 = vld [vmem:[#allocation19 + $0x50] sm:$0xff] }
 0x60a   :  { %1837 = vmatpush1.msra.mxu0 %v1703_v59  ;;  %v1973_v59 = vld [vmem:[#allocation19 + $0x40] sm:$0xff] }
 0x60b   :  { %1838 = vmatprep.subr.mxu0 %v1702_v61  ;;  %v1971_v61 = vld [vmem:[#allocation19 + $0x30] sm:$0xff] }
 0x60c   :  { %1839 = vmatpush1.msra.mxu0 %v1701_v63  ;;  %v1969_v63 = vld [vmem:[#allocation19 + $0x20] sm:$0xff] }
 0x60d   :  { %1840 = vmatprep.subr.mxu0 %v1700_v1  ;;  %v1967_v1 = vld [vmem:[#allocation19 + $0x10] sm:$0xff] }
 0x60e   :  { %1841 = vmatpush1.msra.mxu0 %v1699_v4  ;;  %v1965_v4 = vld [vmem:[#allocation19] sm:$0xff] }
 0x60f   :  { %1842 = vmatprep.subr.mxu0 %v1698_v7  ;;  %v2027_v7 = vld [vmem:[#allocation19 + $0x1f0] sm:$0xff] }
 0x610   :  { %1843 = vmatpush1.msra.mxu0 %v1697_v9  ;;  %v2025_v9 = vld [vmem:[#allocation19 + $0x1e0] sm:$0xff] }
 0x611   :  { %3319 = vmatprep.subr.mxu0 %v4112_v5 }
 0x6b1   :  { %v1610_v10 = vpop.f32.mrf.mxu0 }
 0x6b3   :  { %v1612_v11 = vpop.f32.mrf.mxu0 }
 0x6b4   :  { %v1615_v12 = vmax.f32 %v1610_v10, %v1612_v11  ;;  %v2024_v10 = vld [vmem:[#allocation19 + $0x1d8] sm:$0xff]  ;;  %v2023_v11 = vld [vmem:[#allocation19 + $0x1d0] sm:$0xff] }
 0x6b6   :  { %v1616_v13 = vrot.slane %v1615_v12, 7  ;;  %v1624_v14 = vrot.slane %v1615_v12, 1  ;;  %1805 = vmatprep.mubr.f32.mxu1 %v1615_v12  ;;  %v2022_v12 = vld [vmem:[#allocation19 + $0x1c8] sm:$0xff] }
 0x6b8   :  { %v1623_v17 = vmul.f32 %v1621_v16, %v1616_v13  ;;  %v1632_v18 = vmul.f32 %v1630_v15, %v1624_v14  ;;  %v2021_v13 = vld [vmem:[#allocation19 + $0x1c0] sm:$0xff]  ;;  %v2020_v14 = vld [vmem:[#allocation19 + $0x1b8] sm:$0xff]  ;;  %v2019_v15 = vld [vmem:[#allocation19 + $0x1b0] sm:$0xff] }
 0x6b9   :  { %v2018_v16 = vld [vmem:[#allocation19 + $0x1a8] sm:$0xff] }
 0x6ba   :  { %1806 = vmatmul.mubr.f32.vlgmr.msra.gmra.mxu1 %v1623_v17  ;;  %1877 = vmatmul.mubr.f32.vlgmr.msra.gmra.mxu0 %v1632_v18  ;;  %v2017_v17 = vld [vmem:[#allocation19 + $0x1a0] sm:$0xff]  ;;  %v2016_v18 = vld [vmem:[#allocation19 + $0x198] sm:$0xff] }
 0x6bb   :  { %1958 = vmatprep.mubr.f32.mxu1 %v4112_v5  ;;  %3321 = vmatprep.mubr.msk.f32.mxu0 %vm4113_vm5, %v4112_v5 }
 0x77a   :  { %v1807_v22 = vpop.f32.mrf.mxu1  ;;  %v1878_v23 = vpop.f32.mrf.mxu0 }
 0x77b   :  { %v1808_v24 = vadd.f32 %v1807_v22, %v1734_v20  ;;  %v2014_v20 = vld [vmem:[#allocation19 + $0x188] sm:$0xff]  ;;  %v2012_v22 = vld [vmem:[#allocation19 + $0x178] sm:$0xff] }
 0x77c   :  { %v1809_v25 = vpop.f32.mrf.mxu1  ;;  %v1880_v28 = vpop.f32.mrf.mxu0 }
 0x77d   :  { %v1879_v26 = vadd.f32 %v1878_v23, %v1808_v24  ;;  %v1810_v27 = vadd.f32 %v1809_v25, %v1738_v21  ;;  %v2013_v21 = vld [vmem:[#allocation19 + $0x180] sm:$0xff]  ;;  %v2011_v23 = vld [vmem:[#allocation19 + $0x170] sm:$0xff]  ;;  %v2010_v24 = vld [vmem:[#allocation19 + $0x168] sm:$0xff] }
 0x77e   :  { %v2009_v25 = vld [vmem:[#allocation19 + $0x160] sm:$0xff] }
 0x77f   :  { %v1883_v29 = vmax.f32 %v1879_v26, 0.0  ;;  %v1881_v30 = vadd.f32 %v1880_v28, %v1810_v27  ;;  %v2008_v26 = vld [vmem:[#allocation19 + $0x158] sm:$0xff]  ;;  %v2007_v27 = vld [vmem:[#allocation19 + $0x150] sm:$0xff]  ;;  %v2006_v28 = vld [vmem:[#allocation19 + $0x148] sm:$0xff] }
 0x781   :  { %v1884_v31 = vmax.f32 %v1881_v30, 0.0  ;;  %v1885_v32 = vrot.slane %v1883_v29, 1  ;;  %v2004_v30 = vld [vmem:[#allocation19 + $0x138] sm:$0xff] }
 0x783   :  { %v1886_v33 = vrot.slane %v1884_v31, 1  ;;  %v1887_v35 = vmax.f32 %v1883_v29, %v1885_v32  ;;  %v2005_v29 = vld [vmem:[#allocation19 + $0x140] sm:$0xff]  ;;  %v2002_v32 = vld [vmem:[#allocation19 + $0x128] sm:$0xff] }
 0x785   :  { %v1888_v34 = vmax.f32 %v1884_v31, %v1886_v33  ;;  %v2003_v31 = vld [vmem:[#allocation19 + $0x130] sm:$0xff]  ;;  %v2001_v33 = vld [vmem:[#allocation19 + $0x120] sm:$0xff] }
 0x787   :  { %1924 = vmatprep.subr.mxu1 %v1888_v34  ;;  %v2000_v34 = vld [vmem:[#allocation19 + $0x118] sm:$0xff] }
 0x788   :  { %1925 = vmatpush1.msra.mxu1 %v1887_v35  ;;  %v1999_v35 = vld [vmem:[#allocation19 + $0x110] sm:$0xff] }
 0x789   :  { %3204 = vmatmul.mubr.msk.f32.vlgmr.msra.gmra.mxu1 %vm1890_vm4, %v1889_v3  ;;  %2029 = vmatprep.subr.mxu1 %v1996_v36  ;;  %v1998_v3 = vld [vmem:[#allocation19 + $0x108] sm:$0xff]  ;;  %v1997_v36 = vld [vmem:[#allocation19 + $0x100] sm:$0xff] }
 0x78a   :  { %2030 = vmatpush1.msra.mxu1 %v1995_v42 }
 0x78b   :  { %2031 = vmatprep.subr.mxu1 %v1994_v46 }
 0x78c   :  { %2032 = vmatpush1.msra.mxu1 %v1993_v37 }
 0x78d   :  { %2033 = vmatprep.subr.mxu1 %v1992_v38 }
 0x78e   :  { %2034 = vmatpush1.msra.mxu1 %v1991_v39 }
 0x78f   :  { %2035 = vmatprep.subr.mxu1 %v1990_v40  ;;  %v2101_v40 = vld [vmem:[%s4622_s26] sm:$0x3] }
 0x790   :  { %2036 = vmatpush1.msra.mxu1 %v1989_v41  ;;  %v2281_v41 = vld [vmem:[#allocation20 + $0xf8] sm:$0xff] }
 0x791   :  { %2037 = vmatprep.subr.mxu1 %v1988_v43  ;;  %v3206_v43 = vld [vmem:[%s4622_s26 + $0x2] sm:$0x3] }
 0x792   :  { %2038 = vmatpush1.msra.mxu1 %v1987_v44  ;;  %v2265_v44 = vld [vmem:[#allocation20 + $0x78] sm:$0xff] }
 0x793   :  { %2039 = vmatprep.subr.mxu1 %v1986_v45  ;;  %v2280_v45 = vld [vmem:[#allocation20 + $0xf0] sm:$0xff] }
 0x794   :  { %2040 = vmatpush1.msra.mxu1 %v1985_v47  ;;  %v2264_v47 = vld [vmem:[#allocation20 + $0x70] sm:$0xff] }
 0x795   :  { %2041 = vmatprep.subr.mxu1 %v1984_v48  ;;  %v2279_v48 = vld [vmem:[#allocation20 + $0xe8] sm:$0xff] }
 0x796   :  { %2042 = vmatpush1.msra.mxu1 %v1983_v49  ;;  %v2263_v49 = vld [vmem:[#allocation20 + $0x68] sm:$0xff] }
 0x797   :  { %2043 = vmatprep.subr.mxu1 %v1982_v50  ;;  %v2278_v50 = vld [vmem:[#allocation20 + $0xe0] sm:$0xff] }
 0x798   :  { %2044 = vmatpush1.msra.mxu1 %v1981_v51  ;;  %v2262_v51 = vld [vmem:[#allocation20 + $0x60] sm:$0xff] }
 0x799   :  { %2045 = vmatprep.subr.mxu1 %v1980_v52  ;;  %v2277_v52 = vld [vmem:[#allocation20 + $0xd8] sm:$0xff] }
 0x79a   :  { %2046 = vmatpush1.msra.mxu1 %v1979_v53  ;;  %v2261_v53 = vld [vmem:[#allocation20 + $0x58] sm:$0xff] }
 0x79b   :  { %2047 = vmatprep.subr.mxu1 %v1978_v54  ;;  %v2276_v54 = vld [vmem:[#allocation20 + $0xd0] sm:$0xff] }
 0x79c   :  { %2048 = vmatpush1.msra.mxu1 %v1977_v55  ;;  %v2260_v55 = vld [vmem:[#allocation20 + $0x50] sm:$0xff] }
 0x79d   :  { %2049 = vmatprep.subr.mxu1 %v1976_v56  ;;  %v2275_v56 = vld [vmem:[#allocation20 + $0xc8] sm:$0xff] }
 0x79e   :  { %2050 = vmatpush1.msra.mxu1 %v1975_v57  ;;  %v2259_v57 = vld [vmem:[#allocation20 + $0x48] sm:$0xff] }
 0x79f   :  { %2051 = vmatprep.subr.mxu1 %v1974_v58  ;;  %v2274_v58 = vld [vmem:[#allocation20 + $0xc0] sm:$0xff] }
 0x7a0   :  { %2052 = vmatpush1.msra.mxu1 %v1973_v59  ;;  %v2258_v59 = vld [vmem:[#allocation20 + $0x40] sm:$0xff] }
 0x7a1   :  { %2053 = vmatprep.subr.mxu1 %v1972_v60  ;;  %v2273_v60 = vld [vmem:[#allocation20 + $0xb8] sm:$0xff] }
 0x7a2   :  { %2054 = vmatpush1.msra.mxu1 %v1971_v61  ;;  %v2257_v61 = vld [vmem:[#allocation20 + $0x38] sm:$0xff] }
 0x7a3   :  { %2055 = vmatprep.subr.mxu1 %v1970_v62  ;;  %v2272_v62 = vld [vmem:[#allocation20 + $0xb0] sm:$0xff] }
 0x7a4   :  { %2056 = vmatpush1.msra.mxu1 %v1969_v63  ;;  %v2256_v63 = vld [vmem:[#allocation20 + $0x30] sm:$0xff] }
 0x7a5   :  { %2057 = vmatprep.subr.mxu1 %v1968_v0  ;;  %v2271_v0 = vld [vmem:[#allocation20 + $0xa8] sm:$0xff] }
 0x7a6   :  { %2058 = vmatpush1.msra.mxu1 %v1967_v1  ;;  %v2255_v1 = vld [vmem:[#allocation20 + $0x28] sm:$0xff] }
 0x7a7   :  { %2059 = vmatprep.subr.mxu1 %v1966_v2  ;;  %v2270_v2 = vld [vmem:[#allocation20 + $0xa0] sm:$0xff] }
 0x7a8   :  { %2060 = vmatpush1.msra.mxu1 %v1965_v4  ;;  %v2254_v4 = vld [vmem:[#allocation20 + $0x20] sm:$0xff] }
 0x7a9   :  { %2061 = vmatprep.subr.mxu1 %v2028_v6  ;;  %v2269_v6 = vld [vmem:[#allocation20 + $0x98] sm:$0xff] }
 0x7aa   :  { %2062 = vmatpush2.msra.mxu1 %v2027_v7  ;;  %v2253_v7 = vld [vmem:[#allocation20 + $0x18] sm:$0xff] }
 0x7ab   :  { %2063 = vmatprep.subr.mxu1 %v2026_v8  ;;  %v2268_v8 = vld [vmem:[#allocation20 + $0x90] sm:$0xff] }
 0x7ac   :  { %2064 = vmatpush2.msra.mxu1 %v2025_v9  ;;  %v2252_v9 = vld [vmem:[#allocation20 + $0x10] sm:$0xff] }
 0x7ad   :  { %2065 = vmatprep.subr.mxu1 %v2024_v10  ;;  %v2267_v10 = vld [vmem:[#allocation20 + $0x88] sm:$0xff] }
 0x7ae   :  { %2066 = vmatpush2.msra.mxu1 %v2023_v11  ;;  %v2251_v11 = vld [vmem:[#allocation20 + $0x8] sm:$0xff] }
 0x7af   :  { %2067 = vmatprep.subr.mxu1 %v2022_v12  ;;  %v2266_v12 = vld [vmem:[#allocation20 + $0x80] sm:$0xff] }
 0x7b0   :  { %2068 = vmatpush2.msra.mxu1 %v2021_v13  ;;  %v2250_v13 = vld [vmem:[#allocation20] sm:$0xff] }
 0x7b1   :  { %2069 = vmatprep.subr.mxu1 %v2020_v14 }
 0x7b2   :  { %2070 = vmatpush2.msra.mxu1 %v2019_v15 }
 0x7b3   :  { %2071 = vmatprep.subr.mxu1 %v2018_v16 }
 0x7b4   :  { %2072 = vmatpush2.msra.mxu1 %v2017_v17  ;;  %v2361_v17 = vld [vmem:[#allocation23] sm:$0x7] }
 0x7b5   :  { %2073 = vmatprep.subr.mxu1 %v2016_v18 }
 0x7b6   :  { %2074 = vmatpush2.msra.mxu1 %v2015_v19  ;;  %v2360_v19 = vld [vmem:[#allocation2] sm:$0x3] }
 0x7b7   :  { %2075 = vmatprep.subr.mxu1 %v2014_v20  ;;  %v2451_v20 = vld [vmem:[#allocation26 + $0x18] sm:$0xff] }
 0x7b8   :  { %2076 = vmatpush2.msra.mxu1 %v2013_v21  ;;  %v2450_v21 = vld [vmem:[#allocation26 + $0x10] sm:$0xff] }
 0x7b9   :  { %2077 = vmatprep.subr.mxu1 %v2012_v22  ;;  %v2449_v22 = vld [vmem:[#allocation26 + $0x8] sm:$0xff] }
 0x7ba   :  { %2078 = vmatpush2.msra.mxu1 %v2011_v23  ;;  %v2448_v23 = vld [vmem:[#allocation26] sm:$0xff] }
 0x7bb   :  { %2079 = vmatprep.subr.mxu1 %v2010_v24  ;;  %v2621_v24 = vld [vmem:[%s4623_s28] sm:$0x7] }
 0x7bc   :  { %2080 = vmatpush2.msra.mxu1 %v2009_v25  ;;  %v2536_v25 = vld [vmem:[#allocation29 + $0x18] sm:$0xff] }
 0x7bd   :  { %2081 = vmatprep.subr.mxu1 %v2008_v26 }
 0x7be   :  { %2082 = vmatpush2.msra.mxu1 %v2007_v27 }
 0x7bf   :  { %2083 = vmatprep.subr.mxu1 %v2006_v28  ;;  %v3209_v28 = vld [vmem:[#allocation25] ss:$0 sm:$0xff] }
 0x7c0   :  { %2084 = vmatpush2.msra.mxu1 %v2005_v29 }
 0x7c1   :  { %2085 = vmatprep.subr.mxu1 %v2004_v30 }
 0x7c2   :  { %2086 = vmatpush2.msra.mxu1 %v2003_v31 }
 0x7c3   :  { %2087 = vmatprep.subr.mxu1 %v2002_v32 }
 0x7c4   :  { %2088 = vmatpush2.msra.mxu1 %v2001_v33 }
 0x7c5   :  { %2089 = vmatprep.subr.mxu1 %v2000_v34  ;;  %v2617_v34 = vld [vmem:[#allocation32] sm:$0xff] }
 0x7c6   :  { %2090 = vmatpush2.msra.mxu1 %v1999_v35  ;;  %v2618_v35 = vld [vmem:[#allocation32 + $0x8] sm:$0xff] }
 0x7c7   :  { %2091 = vmatprep.subr.mxu1 %v1998_v3  ;;  %v2619_v3 = vld [vmem:[#allocation32 + $0x10] sm:$0xff] }
 0x7c8   :  { %2092 = vmatpush2.msra.mxu1 %v1997_v36  ;;  %v2620_v36 = vld [vmem:[#allocation32 + $0x18] sm:$0xff] }
 0x7c9   :  { %3345 = vmatprep.subr.mxu1 %v4112_v5 }
 0x849   :  { %v1960_v42 = vpop.f32.mrf.mxu1 }
 0x84b   :  { %v1962_v46 = vpop.f32.mrf.mxu1 }
 0x84c   :  { %2093 = vmatprep.mubr.f32.mxu1 %v1962_v46  ;;  %v2534_v46 = vld [vmem:[#allocation29 + $0x8] sm:$0xff] }
 0x84d   :  { %2094 = vmatmul.mubr.f32.vlgmr.msra.gmra.mxu1 %v1960_v42  ;;  %v2535_v42 = vld [vmem:[#allocation29 + $0x10] sm:$0xff] }
 0x84e   :  { %3353 = vmatprep.mubr.msk.f32.mxu1 %vm4113_vm5, %v4112_v5  ;;  %3346 = vmatpush3.msra.mxu1 %v2536_v25 }
 0x84f   :  { %3347 = vmatprep.subr.mxu1 %v4112_v5 }
 0x850   :  { %3348 = vmatpush3.msra.mxu1 %v2535_v42 }
 0x851   :  { %3349 = vmatprep.subr.mxu1 %v4112_v5 }
 0x852   :  { %3350 = vmatpush3.msra.mxu1 %v2534_v46 }
 0x853   :  { %3351 = vmatprep.subr.mxu1 %v4112_v5 }
 0x90d   :  { %v2095_v37 = vpop.f32.mrf.mxu1 }
 0x90f   :  { %v2097_v38 = vpop.f32.mrf.mxu1 }
 0x910   :  { %v2100_v39 = vmax.f32 %v2095_v37, %v2097_v38  ;;  %v2533_v37 = vld [vmem:[#allocation29] sm:$0xff]  ;;  %v3212_v38 = vld [vmem:[#allocation28] ss:$0 sm:$0xff] }
 0x911   :  { %3352 = vmatpush3.msra.mxu1 %v2533_v37 }
 0x912   :  { %3320 = vmatpush3.msra.mxu0 %v2100_v39 }
 0x913   :  { %3322 = vmatmul.mubr.msk.f32.vlgmr.msra.gmra.mxu0 %vm1890_vm4, %v2101_v40  ;;  %3324 = vmatprep.subr.mxu0 %v4112_v5 }
 0x914   :  { %3325 = vmatpush3.msra.mxu0 %v2100_v39  ;;  %3326 = vmatprep.mubr.msk.f32.mxu0 %vm4113_vm5, %v4112_v5 }
 0x915   :  { %3238 = vmatprep.subr.mxu0 %v2281_v41 }
 0x917   :  { %3327 = vmatmul.mubr.msk.f32.vlgmr.msra.gmra.mxu0 %vm1890_vm4, %v3206_v43 }
 0x918   :  { %3239 = vmatpush3.msra.mxu0 %v2265_v44  ;;  %v2750_v44 = vld [vmem:[#allocation35] sm:$0xff] }
 0x919   :  { %3240 = vmatprep.subr.mxu0 %v2280_v45  ;;  %v2644_v45 = vpop.permute.xlu0 %2643 }
 0x91a   :  { %3241 = vmatpush3.msra.mxu0 %v2264_v47 }
 0x91b   :  { %3242 = vmatprep.subr.mxu0 %v2279_v48  ;;  %v2639_v48 = vpop.permute.xlu1 %2638 }
 0x91c   :  { %3243 = vmatpush3.msra.mxu0 %v2263_v49 }
 0x91d   :  { %3244 = vmatprep.subr.mxu0 %v2278_v50 }
 0x91e   :  { %3245 = vmatpush3.msra.mxu0 %v2262_v51 }
 0x91f   :  { %3246 = vmatprep.subr.mxu0 %v2277_v52  ;;  %v2634_v52 = vpop.permute.xlu0 %2633 }
 0x920   :  { %3247 = vmatpush3.msra.mxu0 %v2261_v53 }
 0x921   :  { %3248 = vmatprep.subr.mxu0 %v2276_v54 }
 0x922   :  { %3249 = vmatpush3.msra.mxu0 %v2260_v55 }
 0x923   :  { %3250 = vmatprep.subr.mxu0 %v2275_v56  ;;  %v2629_v56 = vpop.permute.xlu1 %2628 }
 0x924   :  { %3251 = vmatpush3.msra.mxu0 %v2259_v57 }
 0x925   :  { %3252 = vmatprep.subr.mxu0 %v2274_v58 }
 0x926   :  { %3253 = vmatpush3.msra.mxu0 %v2258_v59 }
 0x927   :  { %3254 = vmatprep.subr.mxu0 %v2273_v60 }
 0x928   :  { %3255 = vmatpush3.msra.mxu0 %v2257_v61 }
 0x929   :  { %3256 = vmatprep.subr.mxu0 %v2272_v62  ;;  %v2751_v62 = vld [vmem:[#allocation35 + $0x8] sm:$0xff] }
 0x92a   :  { %3257 = vmatpush3.msra.mxu0 %v2256_v63  ;;  %v2752_v63 = vld [vmem:[#allocation35 + $0x10] sm:$0xff] }
 0x92b   :  { %3258 = vmatprep.subr.mxu0 %v2271_v0  ;;  %v2753_v0 = vld [vmem:[#allocation35 + $0x18] sm:$0xff] }
 0x92c   :  { %3259 = vmatpush3.msra.mxu0 %v2255_v1  ;;  %v2879_v1 = vld [vmem:[#allocation38] sm:$0xff] }
 0x92d   :  { %3260 = vmatprep.subr.mxu0 %v2270_v2  ;;  %v3208_v2 = vld [vmem:[#allocation22] ss:$0 sm:$0xff] }
 0x92e   :  { %3261 = vmatpush3.msra.mxu0 %v2254_v4 }
 0x92f   :  { %3262 = vmatprep.subr.mxu0 %v2269_v6  ;;  %v3214_v6 = vld [vmem:[#allocation31] ss:$0 sm:$0xff] }
 0x930   :  { %3263 = vmatpush3.msra.mxu0 %v2253_v7 }
 0x931   :  { %3264 = vmatprep.subr.mxu0 %v2268_v8 }
 0x932   :  { %3265 = vmatpush3.msra.mxu0 %v2252_v9 }
 0x933   :  { %3266 = vmatprep.subr.mxu0 %v2267_v10 }
 0x934   :  { %3267 = vmatpush3.msra.mxu0 %v2251_v11 }
 0x935   :  { %3268 = vmatprep.subr.mxu0 %v2266_v12  ;;  %v2776_v12 = vpop.permute.xlu0 %2775 }
 0x936   :  { %3269 = vmatpush3.msra.mxu0 %v2250_v13 }
 0x937   :  { %3329 = vmatprep.subr.mxu0 %v4112_v5 }
 0x9d3   :  { %v2171_v14 = vpop.f32.mrf.mxu0 }
 0x9d5   :  { %v3323_v15 = vpop.f32.mrf.mxu0 }
 0x9d7   :  { %v2246_v16 = vpop.f32.mrf.mxu0 }
 0x9d8   :  { %2353 = vmatprep.mubr.f32.mxu0 %v2246_v16 }
 0x9d9   :  { %2354 = vmatmul.mubr.f32.vlgmr.msra.gmra.mxu0 %v2171_v14  ;;  %v3328_v18 = vpop.f32.mrf.mxu0  ;;  %v2771_v14 = vpop.permute.xlu1 %2770 }
 0x9da   :  { %3330 = vmatpush3.msk.msra.mxu0 %vm2373_vm6, %v2361_v17  ;;  %3331 = vmatprep.mubr.msk.f32.mxu0 %vm4113_vm5, %v4112_v5  ;;  %v2766_v18 = vpop.permute.xlu0 %2765 }
 0x9db   :  { %3334 = vmatprep.subr.mxu0 %v4112_v5 }
 0x9dd   :  { %3332 = vmatmul.mubr.msk.f32.vlgmr.msra.gmra.mxu0 %vm2369_vm7, %v2360_v19 }
 0x9de   :  { %3342 = vmatprep.mubr.msk.f32.mxu0 %vm4113_vm5, %v4112_v5  ;;  %3335 = vmatpush3.msra.mxu0 %v2451_v20  ;;  %v2933_v42 = vpop.permute.xlu0 %2932 }
 0x9df   :  { %3336 = vmatprep.subr.mxu0 %v4112_v5 }
 0x9e0   :  { %3337 = vmatpush3.msra.mxu0 %v2450_v21 }
 0x9e1   :  { %3338 = vmatprep.subr.mxu0 %v4112_v5 }
 0x9e2   :  { %3339 = vmatpush3.msra.mxu0 %v2449_v22  ;;  %v2761_v22 = vpop.permute.xlu1 %2760 }
 0x9e3   :  { %3340 = vmatprep.subr.mxu0 %v4112_v5 }
 0x9e4   :  { %3341 = vmatpush3.msra.mxu0 %v2448_v23 }
 0x9e5   :  { %3356 = vmatprep.subr.msk.mxu0 %vm2373_vm6, %v2621_v24 }
 0x9e6   :  { %v2928_v37 = vpop.permute.xlu1 %2927 }
 0xa99   :  { %v3270_v26 = vpop.f32.mrf.mxu0 }
 0xa9b   :  { %v3271_v27 = vpop.f32.mrf.mxu0 }
 0xa9c   :  { %v4549_v29 = vadd.f32 %v3271_v27, %v3270_v26 }
 0xa9d   :  { %v2443_v30 = vpop.f32.mrf.mxu0 }
 0xa9e   :  { %v2444_v31 = vadd.f32 %v3209_v28, %v2443_v30  ;;  %v2356_v4 = vadd.f32 %v4549_v29, %v3208_v2  ;;  %v2880_v28 = vld [vmem:[#allocation38 + $0x8] sm:$0xff]  ;;  %v2881_v29 = vld [vmem:[#allocation38 + $0x10] sm:$0xff]  ;;  %v2882_v30 = vld [vmem:[#allocation38 + $0x18] sm:$0xff] }
 0xa9f   :  { %v3333_v32 = vpop.f32.mrf.mxu0 }
 0xaa0   :  { %v2447_v33 = vmax.f32 %v2444_v31, 0.0  ;;  %v2359_v8 = vmax.f32 %v2356_v4, 0.0  ;;  %v2883_v31 = vld [vmem:[#allocation38 + $0x20] sm:$0xff]  ;;  %v2884_v32 = vld [vmem:[#allocation38 + $0x28] sm:$0xff] }
 0xaa2   :  { %3343 = vmatmul.mubr.msk.f32.vlgmr.msra.gmra.mxu0 %vm862_vm2, %v2447_v33  ;;  %v2885_v33 = vld [vmem:[#allocation38 + $0x30] sm:$0xff] }
 0xaa3   :  { %3357 = vmatpush3.msk.msra.mxu0 %vm2373_vm6, %v2621_v24  ;;  %3358 = vmatprep.mubr.msk.f32.mxu0 %vm2369_vm7, %v2617_v34  ;;  %v2886_v34 = vld [vmem:[#allocation38 + $0x38] sm:$0xff] }
 0xaa6   :  { %3359 = vmatmul.mubr.msk.f32.vlgmr.msra.gmra.mxu0 %vm2369_vm7, %v2618_v35 }
 0xaa7   :  { %3361 = vmatprep.mubr.msk.f32.mxu0 %vm2369_vm7, %v2619_v3 }
 0xaaa   :  { %3362 = vmatmul.mubr.msk.f32.gmra.mxu0 %vm2369_vm7, %v2620_v36 }
 0xaab   :  { %3386 = vmatprep.mubr.msk.f32.mxu0 %vm862_vm2, %v2879_v1 }
 0xb62   :  { %v2528_v39 = vpop.f32.mrf.mxu0 }
 0xb63   :  { %v2529_v40 = vadd.f32 %v3212_v38, %v2528_v39 }
 0xb64   :  { %v3344_v41 = vpop.f32.mrf.mxu0 }
 0xb65   :  { %v2532_v43 = vmax.f32 %v2529_v40, 0.0  ;;  %v2923_v40 = vpop.permute.xlu0 %2922 }
 0xb66   :  { %v3360_v47 = vpop.f32.mrf.mxu0 }
 0xb67   :  { %3354 = vmatmul.mubr.msk.f32.vlgmr.msra.gmra.mxu1 %vm862_vm2, %v2532_v43  ;;  %v2733_v54 = vadd.f32 %v3360_v47, %v2634_v52 }
 0xb68   :  { %v2727_v49 = vpop.f32.mrf.mxu0  ;;  %3372 = vmatprep.mubr.msk.f32.mxu1 %vm862_vm2, %v2750_v44  ;;  %v2918_v44 = vpop.permute.xlu1 %2917 }
 0xb69   :  { %v2728_v57 = vadd.f32 %v2727_v49, %v2629_v56  ;;  %v2913_v49 = vpop.permute.xlu0 %2912 }
 0xb6a   :  { %v3363_v50 = vpop.f32.mrf.mxu0 }
 0xb6b   :  { %v2743_v51 = vadd.f32 %v3363_v50, %v2644_v45 }
 0xb6c   :  { %v2737_v53 = vpop.f32.mrf.mxu0 }
 0xb6d   :  { %3485 = vtanh.f32 %v2743_v51  ;;  %v2738_v55 = vadd.f32 %v2737_v53, %v2639_v48  ;;  %v2908_v51 = vpop.permute.xlu1 %2907 }
 0xb6f   :  { %3487 = vtanh.f32 %v2738_v55 }
 0xb70   :  { %3489 = vtanh.f32 %v2733_v54  ;;  %v2903_v54 = vpop.permute.xlu0 %2902 }
 0xb71   :  { %3491 = vtanh.f32 %v2728_v57  ;;  %v2898_v56 = vpop.permute.xlu1 %2897 }
 0xb7a   :  { %v3486_v58 = vpop.eup %3485 }
 0xb7b   :  { %3364 = vmatprep.subr.mxu1 %v3486_v58 }
 0xb7c   :  { %v3488_v59 = vpop.eup %3487  ;;  %3365 = vmatpush3.msra.mxu1 %v3486_v58 }
 0xb7d   :  { %3366 = vmatprep.subr.mxu1 %v3488_v59  ;;  %v3490_v60 = vpop.eup %3489 }
 0xb7e   :  { %3367 = vmatpush3.msra.mxu1 %v3488_v59  ;;  %v3492_v61 = vpop.eup %3491 }
 0xb7f   :  { %3368 = vmatprep.subr.mxu1 %v3490_v60 }
 0xb80   :  { %3369 = vmatpush3.msra.mxu1 %v3490_v60 }
 0xb81   :  { %3370 = vmatprep.subr.mxu1 %v3492_v61 }
 0xb82   :  { %3371 = vmatpush3.msra.mxu1 %v3492_v61 }
 0xb83   :  { %3373 = vmatmul.mubr.msk.f32.vlgmr.msra.gmra.mxu1 %vm862_vm2, %v2751_v62  ;;  %3398 = vmatprep.subr.mxu1 %v4112_v5 }
 0xb84   :  { %3375 = vmatprep.mubr.msk.f32.mxu1 %vm862_vm2, %v2752_v63 }
 0xb87   :  { %3376 = vmatmul.mubr.msk.f32.gmra.mxu1 %vm862_vm2, %v2753_v0 }
 0xb88   :  { %3414 = vmatprep.mubr.msk.f32.mxu1 %vm4113_vm5, %v4112_v5 }
 0xc27   :  { %v2613_v7 = vpop.f32.mrf.mxu1 }
 0xc28   :  { %v2614_v9 = vadd.f32 %v3214_v6, %v2613_v7 }
 0xc29   :  { %v3355_v10 = vpop.f32.mrf.mxu1 }
 0xc2a   :  { %v4569_v11 = vmul.f32 %v2614_v9, %v2359_v8 }
 0xc43   :  { %v3374_v13 = vpop.f32.mrf.mxu1 }
 0xc44   :  { %v2862_v20 = vadd.f32 %v3374_v13, %v2766_v18 }
 0xc45   :  { %v2856_v15 = vpop.f32.mrf.mxu1 }
 0xc46   :  { %v2857_v23 = vadd.f32 %v2856_v15, %v2761_v22 }
 0xc47   :  { %v3377_v16 = vpop.f32.mrf.mxu1 }
 0xc48   :  { %v2872_v17 = vadd.f32 %v3377_v16, %v2776_v12 }
 0xc49   :  { %v2866_v19 = vpop.f32.mrf.mxu1 }
 0xc4a   :  { %3493 = vtanh.f32 %v2872_v17  ;;  %v2867_v21 = vadd.f32 %v2866_v19, %v2771_v14 }
 0xc4c   :  { %3495 = vtanh.f32 %v2867_v21 }
 0xc4d   :  { %3497 = vtanh.f32 %v2862_v20 }
 0xc4e   :  { %3499 = vtanh.f32 %v2857_v23 }
 0xc57   :  { %v3494_v24 = vpop.eup %3493 }
 0xc58   :  { %3378 = vmatprep.subr.mxu0 %v3494_v24 }
 0xc59   :  { %v3496_v25 = vpop.eup %3495  ;;  %3379 = vmatpush3.msra.mxu0 %v3494_v24 }
 0xc5a   :  { %3380 = vmatprep.subr.mxu0 %v3496_v25  ;;  %v3498_v26 = vpop.eup %3497 }
 0xc5b   :  { %3381 = vmatpush3.msra.mxu0 %v3496_v25  ;;  %v3500_v27 = vpop.eup %3499 }
 0xc5c   :  { %3382 = vmatprep.subr.mxu0 %v3498_v26 }
 0xc5d   :  { %3383 = vmatpush3.msra.mxu0 %v3498_v26 }
 0xc5e   :  { %3384 = vmatprep.subr.mxu0 %v3500_v27 }
 0xc5f   :  { %3385 = vmatpush3.msra.mxu0 %v3500_v27 }
 0xc60   :  { %3387 = vmatmul.mubr.msk.f32.vlgmr.msra.gmra.mxu0 %vm862_vm2, %v2880_v28 }
 0xc61   :  { %3389 = vmatprep.mubr.msk.f32.mxu0 %vm862_vm2, %v2881_v29 }
 0xc64   :  { %3390 = vmatmul.mubr.msk.f32.gmra.mxu0 %vm862_vm2, %v2882_v30 }
 0xc65   :  { %3392 = vmatprep.mubr.msk.f32.mxu0 %vm862_vm2, %v2883_v31 }
 0xc68   :  { %3393 = vmatmul.mubr.msk.f32.gmra.mxu0 %vm862_vm2, %v2884_v32 }
 0xc69   :  { %3395 = vmatprep.mubr.msk.f32.mxu0 %vm862_vm2, %v2885_v33 }
 0xc6c   :  { %3396 = vmatmul.mubr.msk.f32.gmra.mxu0 %vm862_vm2, %v2886_v34 }
 0xd20   :  { %v3388_v35 = vpop.f32.mrf.mxu0 }
 0xd21   :  { %v3031_v55 = vadd.f32 %v3388_v35, %v2903_v54 }
 0xd22   :  { %v3025_v3 = vpop.f32.mrf.mxu0 }
 0xd23   :  { %v3026_v57 = vadd.f32 %v3025_v3, %v2898_v56 }
 0xd24   :  { %v3391_v36 = vpop.f32.mrf.mxu0 }
 0xd25   :  { %v3041_v52 = vadd.f32 %v3391_v36, %v2913_v49 }
 0xd26   :  { %v3035_v46 = vpop.f32.mrf.mxu0 }
 0xd27   :  { %v3036_v53 = vadd.f32 %v3035_v46, %v2908_v51 }
 0xd28   :  { %v3394_v38 = vpop.f32.mrf.mxu0 }
 0xd29   :  { %v3051_v48 = vadd.f32 %v3394_v38, %v2923_v40 }
 0xd2a   :  { %v3045_v39 = vpop.f32.mrf.mxu0 }
 0xd2b   :  { %v3046_v50 = vadd.f32 %v3045_v39, %v2918_v44 }
 0xd2c   :  { %v3397_v41 = vpop.f32.mrf.mxu0 }
 0xd2d   :  { %v3061_v43 = vadd.f32 %v3397_v41, %v2933_v42 }
 0xd2e   :  { %v3055_v45 = vpop.f32.mrf.mxu0 }
 0xd2f   :  { %v3056_v47 = vadd.f32 %v3055_v45, %v2928_v37  ;;  %3399 = vmatpush3.msra.mxu1 %v3061_v43 }
 0xd30   :  { %3400 = vmatprep.subr.mxu1 %v4112_v5 }
 0xd31   :  { %3401 = vmatpush3.msra.mxu1 %v3056_v47 }
 0xd32   :  { %3402 = vmatprep.subr.mxu1 %v4112_v5 }
 0xd33   :  { %3403 = vmatpush3.msra.mxu1 %v3051_v48 }
 0xd34   :  { %3404 = vmatprep.subr.mxu1 %v4112_v5 }
 0xd35   :  { %3405 = vmatpush3.msra.mxu1 %v3046_v50 }
 0xd36   :  { %3406 = vmatprep.subr.mxu1 %v4112_v5 }
 0xd37   :  { %3407 = vmatpush3.msra.mxu1 %v3041_v52 }
 0xd38   :  { %3408 = vmatprep.subr.mxu1 %v4112_v5 }
 0xd39   :  { %3409 = vmatpush3.msra.mxu1 %v3036_v53 }
 0xd3a   :  { %3410 = vmatprep.subr.mxu1 %v4112_v5 }
 0xd3b   :  { %3411 = vmatpush3.msra.mxu1 %v3031_v55 }
 0xd3c   :  { %3412 = vmatprep.subr.mxu1 %v4112_v5 }
 0xd3d   :  { %3413 = vmatpush3.msra.mxu1 %v3026_v57 }
 0xd3e   :  { %3415 = vmatmul.mubr.msk.f32.vlgmr.msra.gmra.mxu1 %vm3065_vm8, %v4569_v11 }
 0xdfe   :  { %v3135_v58 = vpop.f32.mrf.mxu1 }
 0xdff   :  { %3139 = vst [vmem:[#allocation41] sm:$0x3] %v3135_v58 }
 0xe00   :  { %v3416_v59 = vpop.f32.mrf.mxu1 }
 0xe01   :  { %4012 = shalt.err (!%p4009_p3)
}
 0xe02   :  { %3149 = dma.vmem_to_hbm [thread:$0]  %s3147_s0, 32, %s4288_s30, [#allocation4]  }
 0xe03   :  { %4047 = dma.done.wait [#allocation4], 32  }
 0xe04   :  { %4048 = vsyncadd [#allocation4], 4294967264 }
 0xe05   :  { %3153 = vsyncpa [#allocation3], 1 }
 0xe06   :  { %3154 = vsyncpa [#allocation6], 1 }
 0xe07   :  { %3155 = vsyncpa [#allocation9], 1 }
 0xe08   :  { %3156 = vsyncpa [#allocation12], 1 }
 0xe09   :  { %3157 = vsyncpa [#allocation15], 1 }
 0xe0a   :  { %3158 = vsyncpa [#allocation18], 1 }
 0xe0b   :  { %3159 = vsyncpa [#allocation21], 1 }
 0xe0c   :  { %3160 = vsyncpa [#allocation24], 1 }
 0xe0d   :  { %3161 = vsyncpa [#allocation27], 1 }
 0xe0e   :  { %3162 = vsyncpa [#allocation30], 1 }
 0xe0f   :  { %3163 = vsyncpa [#allocation33], 1 }
 0xe10   :  { %3164 = vsyncpa [#allocation36], 1 }
 0xe11   :  { %3165 = vsyncpa [#allocation39], 1 }
 0xe12   :  { %3166 = vsyncpa [#allocation4], 1 }

</bundles_post_ra>
